<compile_context>
chip_gen: v6e
topology: v6e:2x2x1
jax: 0.10.0
libtpu: 0.0.40
codegen_flags: <defaults>
</compile_context>

<pallas_src>
import math
import functools

import jax
import jax.numpy as jnp
from jax.experimental import pallas as pl
from jax.experimental.pallas import tpu as pltpu

EPS = 1e-5            # nn.LayerNorm default eps
NEG_SLOPE = 0.01      # nn.LeakyReLU default negative_slope
MASK_FILL = -1e8      # masked_fill value in MultiHeadAttention


def _layer_norm(x, gamma, beta):
    # x: (M, D); gamma/beta: (1, D)
    mu = jnp.mean(x, axis=-1, keepdims=True)
    var = jnp.mean((x - mu) ** 2, axis=-1, keepdims=True)
    return (x - mu) * jax.lax.rsqrt(var + EPS) * gamma + beta


def decoder_layer_kernel(q_ref, k_ref, bias_ref, vec_ref,
                         wq_ref, wkv_ref, wo_ref,
                         w1_ref, b1_ref, w2_ref,
                         *out_and_scratch,
                         n_head, key_dim, batch_block, n_query, n_key,
                         emit_attn):
    if emit_attn:
        o_ref, attn_ref, heads_ref = out_and_scratch
    else:
        o_ref, heads_ref = out_and_scratch
        attn_ref = None

    H, kd, Bt, Nq, Nk = n_head, key_dim, batch_block, n_query, n_key
    D = q_ref.shape[-1]

    # Flatten (Bt, N, D) -> (Bt*N, D): D stays on lanes, batch*seq on sublanes,
    # so LayerNorm / projections / MLP run as single full-width ops per step.
    xq = q_ref[...].reshape(Bt * Nq, D)            # residual input h0
    xk = k_ref[...].reshape(Bt * Nk, D)

    vecs = vec_ref[...]                            # (7, D) packed small params
    ln1_g, ln1_b = vecs[0:1, :], vecs[1:2, :]
    ln2_g, ln2_b = vecs[2:3, :], vecs[3:4, :]
    ln3_g, ln3_b = vecs[4:5, :], vecs[5:6, :]
    mlp_b2 = vecs[6:7, :]

    xn_q = _layer_norm(xq, ln1_g, ln1_b)           # ln1(q), f32
    xn_k = _layer_norm(xk, ln2_g, ln2_b)           # ln2(k), f32

    # ---- fused QKV projections: bf16 operands (MXU-native), f32 accumulation
    q_proj = jnp.dot(xn_q.astype(jnp.bfloat16), wq_ref[...],
                     preferred_element_type=jnp.float32)   # (Bt*Nq, H*kd), pre-scaled 1/sqrt(kd)
    kv_proj = jnp.dot(xn_k.astype(jnp.bfloat16), wkv_ref[...],
                      preferred_element_type=jnp.float32)  # (Bt*Nk, 2*H*kd)
    k_proj = kv_proj[:, :H * kd]
    v_proj = kv_proj[:, H * kd:]

    bias = bias_ref[...]                           # (Bt, Nq, Nk) additive mask (0 / -1e8)

    for h in range(H):                             # static unroll; softmax is per head
        lo, hi = h * kd, (h + 1) * kd
        qh = q_proj[:, lo:hi].reshape(Bt, Nq, kd)
        kh = k_proj[:, lo:hi].reshape(Bt, Nk, kd)
        vh = v_proj[:, lo:hi].reshape(Bt, Nk, kd)
        # scores: f32 operands on purpose (kd=16 contraction, softmax-sensitive)
        s = jnp.einsum('bqd,bkd->bqk', qh, kh,
                       preferred_element_type=jnp.float32) + bias
        s = s - jnp.max(s, axis=-1, keepdims=True)
        p = jnp.exp(s)
        p = p / jnp.sum(p, axis=-1, keepdims=True)          # exact normalization
        if emit_attn:
            # lane-dense attention slab: head h occupies lanes [h*Nk, (h+1)*Nk)
            attn_ref[:, :, h * Nk:(h + 1) * Nk] = p
        o_h = jnp.einsum('bqk,bkd->bqd', p, vh,
                         preferred_element_type=jnp.float32)
        # stage head output into the bf16 VMEM slab (no list / concatenate)
        heads_ref[:, lo:hi] = o_h.reshape(Bt * Nq, kd).astype(jnp.bfloat16)

    # ---- fused output projection: one bf16 matmul, contraction H*kd ---------
    attn_out = jnp.dot(heads_ref[...], wo_ref[...],
                       preferred_element_type=jnp.float32)   # (Bt*Nq, D)

    h1 = attn_out + xq

    # ---- ln3 + MLP (Linear -> LeakyReLU -> Linear) + residual ----------------
    xn2 = _layer_norm(h1, ln3_g, ln3_b)
    hid = jnp.dot(xn2.astype(jnp.bfloat16), w1_ref[...],
                  preferred_element_type=jnp.float32) + b1_ref[...]
    hid = jnp.where(hid > 0, hid, NEG_SLOPE * hid)
    y = jnp.dot(hid.astype(jnp.bfloat16), w2_ref[...],
                preferred_element_type=jnp.float32) + mlp_b2

    o_ref[...] = (y + h1).reshape(Bt, Nq, D)


# --------------------------- host-side wrappers -------------------------------
def _pack_layer_params(params, matmul_dtype=jnp.bfloat16):
    """Fuse per-head projection weights into full-width matrices, fold the
    1/sqrt(key_dim) score scale into w_query (exact: kd is a power of two, so
    folding commutes with the bf16 cast), and cast matmul weights to bf16 so
    they DMA at half the bytes and feed the MXU natively."""
    H, D, kd = params["w_query"].shape
    scale = 1.0 / math.sqrt(kd)
    wq = (scale * params["w_query"]).transpose(1, 0, 2).reshape(D, H * kd)
    wk = params["w_key"].transpose(1, 0, 2).reshape(D, H * kd)
    wv = params["w_value"].transpose(1, 0, 2).reshape(D, H * kd)
    wkv = jnp.concatenate([wk, wv], axis=-1)                # (D, 2*H*kd)
    wo = params["w_out"].reshape(H * kd, D)                 # (H*kd, D)
    vecs = jnp.concatenate([params["ln1_g"], params["ln1_b"],
                            params["ln2_g"], params["ln2_b"],
                            params["ln3_g"], params["ln3_b"],
                            params["b2"]], axis=0)          # (7, D), kept f32
    return (wq.astype(matmul_dtype), wkv.astype(matmul_dtype),
            wo.astype(matmul_dtype),
            params["w1"].astype(matmul_dtype), params["w2"].astype(matmul_dtype),
            vecs, params["b1"])


def _build_attn_bias(B, Nq, Nk, key_padding_mask, attn_mask):
    """Additive attention bias: 0 where attended, MASK_FILL where masked out.
    Mirrors MultiHeadAttention's masked_fill(mask == 0, -1e8)."""
    if attn_mask is None and key_padding_mask is None:
        return jnp.zeros((B, Nq, Nk), jnp.float32)
    mask = jnp.zeros((B, Nq, Nk), jnp.float32)
    if attn_mask is not None:
        mask = mask + attn_mask.astype(jnp.float32)
    if key_padding_mask is not None:
        # TODO(synk): PyTorch's repeat(1, n_query, 1).view(...) scrambles batches
        # when B > 1; we implement the intended per-batch broadcast instead.
        mask = mask + jnp.broadcast_to(
            key_padding_mask.astype(jnp.float32)[:, None, :], (B, Nq, Nk))
    return jnp.where(mask == 0, jnp.float32(MASK_FILL), jnp.float32(0.0))


def _pick_batch_block(B, Nq, Nk, D, H, target_rows=256, max_block_bytes=8 << 20):
    """Rows-per-matmul (Bt*Nq) is the main MXU-utilization lever: only split
    the batch across grid steps if every step still has >= target_rows rows
    (or VMEM forces it).  At small B this yields grid=(1,); on v7x that idles
    the second TensorCore, but M-starving every matmul would cost more."""
    def block_bytes(bt):
        per_batch = (2 * Nq * D + Nk * D + Nq * Nk + Nq * H * Nk) * 4
        return 2 * bt * per_batch          # x2: double-buffered pipeline copies
    bt = B
    while bt % 2 == 0 and ((bt // 2) * Nq >= target_rows
                           or block_bytes(bt) > max_block_bytes):
        bt //= 2
    return bt


def decoder_layer_forward(q, k, bias, params, batch_block, need_attn):
    B, Nq, D = q.shape
    Nk = k.shape[1]
    H, _, kd = params["w_query"].shape
    hidden = params["w1"].shape[1]
    Bt = batch_block
    assert B % Bt == 0, (B, Bt)

    wq, wkv, wo, w1, w2, vecs, b1 = _pack_layer_params(params)

    kernel = functools.partial(decoder_layer_kernel, n_head=H, key_dim=kd,
                               batch_block=Bt, n_query=Nq, n_key=Nk,
                               emit_attn=need_attn)

    # Grid-invariant params: constant index_map => not re-DMA'd across steps.
    # TODO(synk): at large D/hidden add pipeline_mode=pl.Buffered(1) here to
    # single-buffer the weights (halves weight VMEM, matters on v7x's 64 MiB);
    # at D=128 the whole bf16 weight set is ~0.4 MiB so default buffering is fine.
    def const(*shape):
        return pl.BlockSpec(shape, lambda b: (0,) * len(shape))

    if need_attn:
        out_shape = (jax.ShapeDtypeStruct((B, Nq, D), jnp.float32),
                     jax.ShapeDtypeStruct((B, Nq, H * Nk), jnp.float32))
        out_specs = (pl.BlockSpec((Bt, Nq, D), lambda b: (b, 0, 0)),
                     pl.BlockSpec((Bt, Nq, H * Nk), lambda b: (b, 0, 0)))
    else:
        out_shape = jax.ShapeDtypeStruct((B, Nq, D), jnp.float32)
        out_specs = pl.BlockSpec((Bt, Nq, D), lambda b: (b, 0, 0))

    result = pl.pallas_call(
        kernel,
        out_shape=out_shape,
        grid=(B // Bt,),
        in_specs=[
            pl.BlockSpec((Bt, Nq, D), lambda b: (b, 0, 0)),    # q block
            pl.BlockSpec((Bt, Nk, D), lambda b: (b, 0, 0)),    # k block
            pl.BlockSpec((Bt, Nq, Nk), lambda b: (b, 0, 0)),   # additive mask bias
            const(7, D),                                       # LN params + mlp b2 (f32)
            const(D, H * kd),                                  # fused w_query (bf16, pre-scaled)
            const(D, 2 * H * kd),                              # fused [w_key | w_value] (bf16)
            const(H * kd, D),                                  # fused w_out (bf16)
            const(D, hidden),                                  # mlp W1 (bf16)
            const(1, hidden),                                  # mlp b1 (f32)
            const(hidden, D),                                  # mlp W2 (bf16)
        ],
        out_specs=out_specs,
        scratch_shapes=[pltpu.VMEM((Bt * Nq, H * kd), jnp.bfloat16)],  # heads slab
        compiler_params=pltpu.CompilerParams(
            dimension_semantics=("parallel",),
            vmem_limit_bytes=32 * 1024 * 1024),
    )(q, k, bias, vecs, wq, wkv, wo, w1, b1, w2)

    if need_attn:
        out, attn_packed = result
        # unpack the lane-dense (B, Nq, H, Nk) layout to the module's (H, B, Nq, Nk)
        attn = attn_packed.reshape(B, Nq, H, Nk).transpose(2, 0, 1, 3)
        return out, attn
    return result, None


def decoder_multi_head_attention(q, k, layers, key_padding_mask=None,
                                 attn_mask=None, batch_block=None):
    """q: (B, Nq, D), k: (B, Nk, D). Returns (out, attention-of-last-layer)."""
    B, Nq, D = q.shape
    Nk = k.shape[1]
    H = layers[0]["w_query"].shape[0]
    if batch_block is None:
        batch_block = _pick_batch_block(B, Nq, Nk, D, H)
    bias = _build_attn_bias(B, Nq, Nk, key_padding_mask, attn_mask)
    attention = None
    n = len(layers)
    for i, params in enumerate(layers):
        # intermediate layers skip the attention HBM writeback entirely
        q, attn_i = decoder_layer_forward(q, k, bias, params, batch_block,
                                          need_attn=(i == n - 1))
        if attn_i is not None:
            attention = attn_i
    return q, attention


# --------------------------- pure-JAX reference -------------------------------
def decoder_mha_ref(q, k, layers, key_padding_mask=None, attn_mask=None,
                    matmul_dtype=None):
    """Pure-JAX reference.  matmul_dtype=None -> exact f32 (PyTorch module
    semantics, precision='highest' so XLA does not silently downcast);
    matmul_dtype=jnp.bfloat16 -> mirrors the kernel's bf16 MXU operand casts
    (f32 accumulation) for a tight numerical comparison."""
    def mm(a, b):
        if matmul_dtype is None:
            return jnp.matmul(a, b, precision="highest")
        return jnp.matmul(a.astype(matmul_dtype), b.astype(matmul_dtype),
                          preferred_element_type=jnp.float32)

    def ln(x, g, b):
        mu = jnp.mean(x, -1, keepdims=True)
        var = jnp.mean((x - mu) ** 2, -1, keepdims=True)
        return (x - mu) / jnp.sqrt(var + EPS) * g + b

    attention = None
    for params in layers:
        B, Nq, D = q.shape
        Nk = k.shape[1]
        H, _, kd = params["w_query"].shape
        h0 = q
        hq = ln(q, params["ln1_g"], params["ln1_b"])
        hk = ln(k, params["ln2_g"], params["ln2_b"])
        Q = mm(hq.reshape(-1, D), params["w_query"]).reshape(H, B, Nq, kd)
        K = mm(hk.reshape(-1, D), params["w_key"]).reshape(H, B, Nk, kd)
        V = mm(hk.reshape(-1, D), params["w_value"]).reshape(H, B, Nk, kd)
        U = (1.0 / math.sqrt(kd)) * jnp.einsum("hbqd,hbkd->hbqk", Q, K,
                                               precision="highest")
        mask = None
        if attn_mask is not None:
            mask = attn_mask.astype(jnp.float32)[None]
        if key_padding_mask is not None:
            kpm = jnp.broadcast_to(
                key_padding_mask.astype(jnp.float32)[:, None, :], (B, Nq, Nk))[None]
            mask = kpm if mask is None else mask + kpm
        if mask is not None:
            U = jnp.where(mask == 0, MASK_FILL, U)
        attention = jax.nn.softmax(U, axis=-1)
        heads = jnp.einsum("hbqk,hbkd->hbqd", attention, V, precision="highest")
        out = mm(jnp.transpose(heads, (1, 2, 0, 3)).reshape(-1, H * kd),
                 params["w_out"].reshape(H * kd, D)).reshape(B, Nq, D)
        h1 = out + h0
        xn2 = ln(h1, params["ln3_g"], params["ln3_b"])
        hid = mm(xn2, params["w1"]) + params["b1"]
        hid = jnp.where(hid > 0, hid, NEG_SLOPE * hid)
        q = mm(hid, params["w2"]) + params["b2"] + h1
    return q, attention


# ------------------------------------------------------------------------------
def make_layer_params(key, D, H, hidden=512):
    kd = D // H
    ks = jax.random.split(key, 14)

    def u(kk, shape, fan):
        lim = 1.0 / math.sqrt(fan)
        return jax.random.uniform(kk, shape, jnp.float32, -lim, lim)

    return {
        # MultiHeadAttention params (PyTorch init: uniform(+-1/sqrt(last dim)))
        "w_query": u(ks[0], (H, D, kd), kd),
        "w_key":   u(ks[1], (H, D, kd), kd),
        "w_value": u(ks[2], (H, D, kd), kd),
        "w_out":   u(ks[3], (H, kd, D), D),
        # LayerNorm affine params (randomized so the check is non-trivial)
        "ln1_g": 1.0 + 0.1 * jax.random.normal(ks[4], (1, D), jnp.float32),
        "ln1_b": 0.1 * jax.random.normal(ks[5], (1, D), jnp.float32),
        "ln2_g": 1.0 + 0.1 * jax.random.normal(ks[6], (1, D), jnp.float32),
        "ln2_b": 0.1 * jax.random.normal(ks[7], (1, D), jnp.float32),
        "ln3_g": 1.0 + 0.1 * jax.random.normal(ks[8], (1, D), jnp.float32),
        "ln3_b": 0.1 * jax.random.normal(ks[9], (1, D), jnp.float32),
        # MLP Linear(D, 512) -> LeakyReLU -> Linear(512, D), weights stored for x @ W
        "w1": u(ks[10], (D, hidden), D),
        "b1": u(ks[11], (1, hidden), D),
        "w2": u(ks[12], (hidden, D), hidden),
        "b2": u(ks[13], (1, D), hidden),
    }


if __name__ == "__main__":
    B, Nq, Nk = 4, 8, 16
    D, H, HIDDEN = 128, 8, 512         # module defaults: embedding_dim=128, n_head=8

    root = jax.random.PRNGKey(0)
    kq, kk, kmask, kparams = jax.random.split(root, 4)

    q = jax.random.normal(kq, (B, Nq, D), jnp.float32)
    k = jax.random.normal(kk, (B, Nk, D), jnp.float32)

    # random 0/1 edge-connection mask; column 0 kept so every query attends somewhere
    attn_mask = (jax.random.uniform(kmask, (B, Nq, Nk)) > 0.3).astype(jnp.float32)
    attn_mask = attn_mask.at[:, :, 0].set(1.0)

    layer_keys = jax.random.split(kparams, 2)

    # ---- single layer (module default n_layer=1) -----------------------------
    layers1 = [make_layer_params(layer_keys[0], D, H, HIDDEN)]
    out, attn = decoder_multi_head_attention(q, k, layers1, attn_mask=attn_mask)
    out, attn = jax.block_until_ready((out, attn))
    assert out.shape == (B, Nq, D) and attn.shape == (H, B, Nq, Nk)

    # (1) faithful-implementation check: reference with the SAME bf16 operand
    #     casts as the kernel -> residual diffs are accumulation-order only.
    bf_out, bf_attn = decoder_mha_ref(q, k, layers1, attn_mask=attn_mask,
                                      matmul_dtype=jnp.bfloat16)
    assert jnp.allclose(attn, bf_attn, atol=5e-3, rtol=5e-3), \
        float(jnp.max(jnp.abs(attn - bf_attn)))
    assert jnp.allclose(out, bf_out, atol=5e-3, rtol=5e-3), \
        float(jnp.max(jnp.abs(out - bf_out)))

    # (2) accuracy vs the exact-f32 module semantics; tolerance sized for bf16
    #     MXU operands (~2^-8 relative per operand) amplified through the
    #     softmax exponent and the two MLP contractions.
    ref_out, ref_attn = decoder_mha_ref(q, k, layers1, attn_mask=attn_mask)
    assert jnp.allclose(attn, ref_attn, atol=5e-2, rtol=5e-2), \
        float(jnp.max(jnp.abs(attn - ref_attn)))
    assert jnp.allclose(out, ref_out, atol=1e-1, rtol=1e-1), \
        float(jnp.max(jnp.abs(out - ref_out)))

    # ---- two stacked layers: exercises the "skip attention writeback on
    # non-final layers" kernel variant, checked against the bf16-mirrored ref.
    layers2 = [make_layer_params(lk, D, H, HIDDEN) for lk in layer_keys]
    out2, attn2 = decoder_multi_head_attention(q, k, layers2, attn_mask=attn_mask)
    out2, attn2 = jax.block_until_ready((out2, attn2))
    assert out2.shape == (B, Nq, D) and attn2.shape == (H, B, Nq, Nk)
    bf2_out, bf2_attn = decoder_mha_ref(q, k, layers2, attn_mask=attn_mask,
                                        matmul_dtype=jnp.bfloat16)
    assert jnp.allclose(attn2, bf2_attn, atol=5e-3, rtol=5e-3), \
        float(jnp.max(jnp.abs(attn2 - bf2_attn)))
    assert jnp.allclose(out2, bf2_out, atol=5e-3, rtol=5e-3), \
        float(jnp.max(jnp.abs(out2 - bf2_out)))

    print("KERNEL_OK")
</pallas_src>

<mosaic_0001>
module attributes {stable_mosaic.version = 11 : i64} {
  func.func @decoder_layer_kernel(%arg0: i32, %arg1: memref<4x8x128xf32, #tpu.memory_space<vmem>>, %arg2: memref<4x16x128xf32, #tpu.memory_space<vmem>>, %arg3: memref<4x8x16xf32, #tpu.memory_space<vmem>>, %arg4: memref<7x128xf32, #tpu.memory_space<vmem>>, %arg5: memref<128x128xbf16, #tpu.memory_space<vmem>>, %arg6: memref<128x256xbf16, #tpu.memory_space<vmem>>, %arg7: memref<128x128xbf16, #tpu.memory_space<vmem>>, %arg8: memref<128x512xbf16, #tpu.memory_space<vmem>>, %arg9: memref<1x512xf32, #tpu.memory_space<vmem>>, %arg10: memref<512x128xbf16, #tpu.memory_space<vmem>>, %arg11: memref<4x8x128xf32, #tpu.memory_space<vmem>>, %arg12: memref<4x8x128xf32, #tpu.memory_space<vmem>>, %arg13: memref<32x128xbf16, #tpu.memory_space<vmem>>) attributes {dimension_semantics = [#tpu.dimension_semantics<parallel>], iteration_bounds = array<i64: 1>, scalar_prefetch = 0 : i64, scratch_operands = 1 : i64, tpu.core_type = #tpu.core_type<tc>, window_params = [{transform_indices = @transform_0, window_bounds = array<i64: 4, 8, 128>}, {transform_indices = @transform_1, window_bounds = array<i64: 4, 16, 128>}, {transform_indices = @transform_2, window_bounds = array<i64: 4, 8, 16>}, {pipeline_mode = #tpu.pipeline_mode<synchronous>, transform_indices = @transform_3, window_bounds = array<i64: 7, 128>}, {pipeline_mode = #tpu.pipeline_mode<synchronous>, transform_indices = @transform_4, window_bounds = array<i64: 128, 128>}, {pipeline_mode = #tpu.pipeline_mode<synchronous>, transform_indices = @transform_5, window_bounds = array<i64: 128, 256>}, {pipeline_mode = #tpu.pipeline_mode<synchronous>, transform_indices = @transform_6, window_bounds = array<i64: 128, 128>}, {pipeline_mode = #tpu.pipeline_mode<synchronous>, transform_indices = @transform_7, window_bounds = array<i64: 128, 512>}, {pipeline_mode = #tpu.pipeline_mode<synchronous>, transform_indices = @transform_8, window_bounds = array<i64: 1, 512>}, {pipeline_mode = #tpu.pipeline_mode<synchronous>, transform_indices = @transform_9, window_bounds = array<i64: 512, 128>}, {transform_indices = @transform_10, window_bounds = array<i64: 4, 8, 128>}, {transform_indices = @transform_11, window_bounds = array<i64: 4, 8, 128>}]} {
    %c0 = arith.constant 0 : index
    %c0_0 = arith.constant 0 : index
    %c0_1 = arith.constant 0 : index
    %0 = vector.load %arg1[%c0, %c0_0, %c0_1] : memref<4x8x128xf32, #tpu.memory_space<vmem>>, vector<4x8x128xf32>
    %1 = vector.shape_cast %0 : vector<4x8x128xf32> to vector<32x128xf32>
    %c0_2 = arith.constant 0 : index
    %c0_3 = arith.constant 0 : index
    %c0_4 = arith.constant 0 : index
    %2 = vector.load %arg2[%c0_2, %c0_3, %c0_4] : memref<4x16x128xf32, #tpu.memory_space<vmem>>, vector<4x16x128xf32>
    %3 = vector.shape_cast %2 : vector<4x16x128xf32> to vector<64x128xf32>
    %c0_5 = arith.constant 0 : index
    %c0_6 = arith.constant 0 : index
    %4 = vector.load %arg4[%c0_5, %c0_6] : memref<7x128xf32, #tpu.memory_space<vmem>>, vector<7x128xf32>
    %5 = vector.extract_strided_slice %4 {offsets = [0, 0], sizes = [1, 128], strides = [1, 1]} : vector<7x128xf32> to vector<1x128xf32>
    %6 = vector.extract_strided_slice %4 {offsets = [1, 0], sizes = [1, 128], strides = [1, 1]} : vector<7x128xf32> to vector<1x128xf32>
    %7 = vector.extract_strided_slice %4 {offsets = [2, 0], sizes = [1, 128], strides = [1, 1]} : vector<7x128xf32> to vector<1x128xf32>
    %8 = vector.extract_strided_slice %4 {offsets = [3, 0], sizes = [1, 128], strides = [1, 1]} : vector<7x128xf32> to vector<1x128xf32>
    %9 = vector.extract_strided_slice %4 {offsets = [4, 0], sizes = [1, 128], strides = [1, 1]} : vector<7x128xf32> to vector<1x128xf32>
    %10 = vector.extract_strided_slice %4 {offsets = [5, 0], sizes = [1, 128], strides = [1, 1]} : vector<7x128xf32> to vector<1x128xf32>
    %11 = vector.extract_strided_slice %4 {offsets = [6, 0], sizes = [1, 128], strides = [1, 1]} : vector<7x128xf32> to vector<1x128xf32>
    %cst = arith.constant dense<0.000000e+00> : vector<32xf32>
    %12 = vector.multi_reduction <add>, %1, %cst [1] : vector<32x128xf32> to vector<32xf32>
    %13 = vector.shape_cast %12 : vector<32xf32> to vector<32x1xf32>
    %cst_7 = arith.constant 1.280000e+02 : f32
    %14 = vector.broadcast %cst_7 : f32 to vector<32x1xf32>
    %15 = arith.divf %13, %14 : vector<32x1xf32>
    %16 = vector.broadcast %15 : vector<32x1xf32> to vector<32x128xf32>
    %17 = arith.subf %1, %16 : vector<32x128xf32>
    %18 = arith.mulf %17, %17 : vector<32x128xf32>
    %cst_8 = arith.constant dense<0.000000e+00> : vector<32xf32>
    %19 = vector.multi_reduction <add>, %18, %cst_8 [1] : vector<32x128xf32> to vector<32xf32>
    %20 = vector.shape_cast %19 : vector<32xf32> to vector<32x1xf32>
    %cst_9 = arith.constant 1.280000e+02 : f32
    %21 = vector.broadcast %cst_9 : f32 to vector<32x1xf32>
    %22 = arith.divf %20, %21 : vector<32x1xf32>
    %23 = vector.broadcast %15 : vector<32x1xf32> to vector<32x128xf32>
    %24 = arith.subf %1, %23 : vector<32x128xf32>
    %cst_10 = arith.constant 9.99999974E-6 : f32
    %25 = vector.broadcast %cst_10 : f32 to vector<32x1xf32>
    %26 = arith.addf %22, %25 : vector<32x1xf32>
    %27 = math.rsqrt %26 : vector<32x1xf32>
    %28 = vector.broadcast %27 : vector<32x1xf32> to vector<32x128xf32>
    %29 = arith.mulf %24, %28 : vector<32x128xf32>
    %30 = vector.broadcast %5 : vector<1x128xf32> to vector<32x128xf32>
    %31 = arith.mulf %29, %30 : vector<32x128xf32>
    %32 = vector.broadcast %6 : vector<1x128xf32> to vector<32x128xf32>
    %33 = arith.addf %31, %32 : vector<32x128xf32>
    %cst_11 = arith.constant dense<0.000000e+00> : vector<64xf32>
    %34 = vector.multi_reduction <add>, %3, %cst_11 [1] : vector<64x128xf32> to vector<64xf32>
    %35 = vector.shape_cast %34 : vector<64xf32> to vector<64x1xf32>
    %cst_12 = arith.constant 1.280000e+02 : f32
    %36 = vector.broadcast %cst_12 : f32 to vector<64x1xf32>
    %37 = arith.divf %35, %36 : vector<64x1xf32>
    %38 = vector.broadcast %37 : vector<64x1xf32> to vector<64x128xf32>
    %39 = arith.subf %3, %38 : vector<64x128xf32>
    %40 = arith.mulf %39, %39 : vector<64x128xf32>
    %cst_13 = arith.constant dense<0.000000e+00> : vector<64xf32>
    %41 = vector.multi_reduction <add>, %40, %cst_13 [1] : vector<64x128xf32> to vector<64xf32>
    %42 = vector.shape_cast %41 : vector<64xf32> to vector<64x1xf32>
    %cst_14 = arith.constant 1.280000e+02 : f32
    %43 = vector.broadcast %cst_14 : f32 to vector<64x1xf32>
    %44 = arith.divf %42, %43 : vector<64x1xf32>
    %45 = vector.broadcast %37 : vector<64x1xf32> to vector<64x128xf32>
    %46 = arith.subf %3, %45 : vector<64x128xf32>
    %cst_15 = arith.constant 9.99999974E-6 : f32
    %47 = vector.broadcast %cst_15 : f32 to vector<64x1xf32>
    %48 = arith.addf %44, %47 : vector<64x1xf32>
    %49 = math.rsqrt %48 : vector<64x1xf32>
    %50 = vector.broadcast %49 : vector<64x1xf32> to vector<64x128xf32>
    %51 = arith.mulf %46, %50 : vector<64x128xf32>
    %52 = vector.broadcast %7 : vector<1x128xf32> to vector<64x128xf32>
    %53 = arith.mulf %51, %52 : vector<64x128xf32>
    %54 = vector.broadcast %8 : vector<1x128xf32> to vector<64x128xf32>
    %55 = arith.addf %53, %54 : vector<64x128xf32>
    %56 = arith.truncf %33 : vector<32x128xf32> to vector<32x128xbf16>
    %c0_16 = arith.constant 0 : index
    %c0_17 = arith.constant 0 : index
    %57 = vector.load %arg5[%c0_16, %c0_17] : memref<128x128xbf16, #tpu.memory_space<vmem>>, vector<128x128xbf16>
    %cst_18 = arith.constant dense<0.000000e+00> : vector<32x128xf32>
    %58 = tpu.matmul %56, %57, %cst_18 {dimension_numbers = #tpu.dot_dimension_numbers<[1], [0], [0], [1], [0, 0, 1, 1], [], []>} : vector<32x128xbf16>, vector<128x128xbf16>, vector<32x128xf32> -> vector<32x128xf32>
    %59 = arith.truncf %55 : vector<64x128xf32> to vector<64x128xbf16>
    %c0_19 = arith.constant 0 : index
    %c0_20 = arith.constant 0 : index
    %60 = vector.load %arg6[%c0_19, %c0_20] : memref<128x256xbf16, #tpu.memory_space<vmem>>, vector<128x256xbf16>
    %cst_21 = arith.constant dense<0.000000e+00> : vector<64x256xf32>
    %61 = tpu.matmul %59, %60, %cst_21 {dimension_numbers = #tpu.dot_dimension_numbers<[1], [0], [0], [1], [0, 0, 1, 1], [], []>} : vector<64x128xbf16>, vector<128x256xbf16>, vector<64x256xf32> -> vector<64x256xf32>
    %62 = vector.extract_strided_slice %61 {offsets = [0, 0], sizes = [64, 128], strides = [1, 1]} : vector<64x256xf32> to vector<64x128xf32>
    %63 = vector.extract_strided_slice %61 {offsets = [0, 128], sizes = [64, 128], strides = [1, 1]} : vector<64x256xf32> to vector<64x128xf32>
    %c0_22 = arith.constant 0 : index
    %c0_23 = arith.constant 0 : index
    %c0_24 = arith.constant 0 : index
    %64 = vector.load %arg3[%c0_22, %c0_23, %c0_24] : memref<4x8x16xf32, #tpu.memory_space<vmem>>, vector<4x8x16xf32>
    %65 = vector.extract_strided_slice %58 {offsets = [0, 0], sizes = [32, 16], strides = [1, 1]} : vector<32x128xf32> to vector<32x16xf32>
    %66 = vector.shape_cast %65 : vector<32x16xf32> to vector<4x8x16xf32>
    %67 = vector.extract_strided_slice %62 {offsets = [0, 0], sizes = [64, 16], strides = [1, 1]} : vector<64x128xf32> to vector<64x16xf32>
    %68 = vector.shape_cast %67 : vector<64x16xf32> to vector<4x16x16xf32>
    %69 = vector.extract_strided_slice %63 {offsets = [0, 0], sizes = [64, 16], strides = [1, 1]} : vector<64x128xf32> to vector<64x16xf32>
    %70 = vector.shape_cast %69 : vector<64x16xf32> to vector<4x16x16xf32>
    "tpu.trace_start"() <{level = 10 : i32, message = "bqd,bkd->bqk"}> : () -> ()
    %cst_25 = arith.constant dense<0.000000e+00> : vector<4x8x16xf32>
    %71 = tpu.matmul %66, %68, %cst_25 {dimension_numbers = #tpu.dot_dimension_numbers<[2], [2], [1], [1], [0, 0, 0, 1, 1, 1], [0], [0]>} : vector<4x8x16xf32>, vector<4x16x16xf32>, vector<4x8x16xf32> -> vector<4x8x16xf32>
    "tpu.trace_stop"() : () -> ()
    %72 = arith.addf %71, %64 : vector<4x8x16xf32>
    %cst_26 = arith.constant dense<0xFF800000> : vector<4x8xf32>
    %73 = vector.multi_reduction <maximumf>, %72, %cst_26 [2] : vector<4x8x16xf32> to vector<4x8xf32>
    %74 = vector.shape_cast %73 : vector<4x8xf32> to vector<4x8x1xf32>
    %75 = vector.broadcast %74 : vector<4x8x1xf32> to vector<4x8x16xf32>
    %76 = arith.subf %72, %75 : vector<4x8x16xf32>
    %77 = math.exp %76 : vector<4x8x16xf32>
    %cst_27 = arith.constant dense<0.000000e+00> : vector<4x8xf32>
    %78 = vector.multi_reduction <add>, %77, %cst_27 [2] : vector<4x8x16xf32> to vector<4x8xf32>
    %79 = vector.shape_cast %78 : vector<4x8xf32> to vector<4x8x1xf32>
    %80 = vector.broadcast %79 : vector<4x8x1xf32> to vector<4x8x16xf32>
    %81 = arith.divf %77, %80 : vector<4x8x16xf32>
    %c0_28 = arith.constant 0 : index
    %c0_29 = arith.constant 0 : index
    %c0_30 = arith.constant 0 : index
    %82 = vector.load %arg12[%c0_28, %c0_29, %c0_30] : memref<4x8x128xf32, #tpu.memory_space<vmem>>, vector<4x8x16xf32>
    tpu.vector_store %arg12[%c0_28, %c0_29, %c0_30], %81 {strides = array<i32>} : memref<4x8x128xf32, #tpu.memory_space<vmem>>, vector<4x8x16xf32>,
    "tpu.trace_start"() <{level = 10 : i32, message = "bqk,bkd->bqd"}> : () -> ()
    %cst_31 = arith.constant dense<0.000000e+00> : vector<4x8x16xf32>
    %83 = tpu.matmul %81, %70, %cst_31 {dimension_numbers = #tpu.dot_dimension_numbers<[2], [1], [1], [2], [0, 0, 0, 1, 1, 2], [0], [0]>} : vector<4x8x16xf32>, vector<4x16x16xf32>, vector<4x8x16xf32> -> vector<4x8x16xf32>
    "tpu.trace_stop"() : () -> ()
    %84 = vector.shape_cast %83 : vector<4x8x16xf32> to vector<32x16xf32>
    %85 = arith.truncf %84 : vector<32x16xf32> to vector<32x16xbf16>
    %c0_32 = arith.constant 0 : index
    %c0_33 = arith.constant 0 : index
    %86 = vector.load %arg13[%c0_32, %c0_33] : memref<32x128xbf16, #tpu.memory_space<vmem>>, vector<32x16xbf16>
    tpu.vector_store %arg13[%c0_32, %c0_33], %85 {strides = array<i32>} : memref<32x128xbf16, #tpu.memory_space<vmem>>, vector<32x16xbf16>,
    %87 = vector.extract_strided_slice %58 {offsets = [0, 16], sizes = [32, 16], strides = [1, 1]} : vector<32x128xf32> to vector<32x16xf32>
    %88 = vector.shape_cast %87 : vector<32x16xf32> to vector<4x8x16xf32>
    %89 = vector.extract_strided_slice %62 {offsets = [0, 16], sizes = [64, 16], strides = [1, 1]} : vector<64x128xf32> to vector<64x16xf32>
    %90 = vector.shape_cast %89 : vector<64x16xf32> to vector<4x16x16xf32>
    %91 = vector.extract_strided_slice %63 {offsets = [0, 16], sizes = [64, 16], strides = [1, 1]} : vector<64x128xf32> to vector<64x16xf32>
    %92 = vector.shape_cast %91 : vector<64x16xf32> to vector<4x16x16xf32>
    "tpu.trace_start"() <{level = 10 : i32, message = "bqd,bkd->bqk"}> : () -> ()
    %cst_34 = arith.constant dense<0.000000e+00> : vector<4x8x16xf32>
    %93 = tpu.matmul %88, %90, %cst_34 {dimension_numbers = #tpu.dot_dimension_numbers<[2], [2], [1], [1], [0, 0, 0, 1, 1, 1], [0], [0]>} : vector<4x8x16xf32>, vector<4x16x16xf32>, vector<4x8x16xf32> -> vector<4x8x16xf32>
    "tpu.trace_stop"() : () -> ()
    %94 = arith.addf %93, %64 : vector<4x8x16xf32>
    %cst_35 = arith.constant dense<0xFF800000> : vector<4x8xf32>
    %95 = vector.multi_reduction <maximumf>, %94, %cst_35 [2] : vector<4x8x16xf32> to vector<4x8xf32>
    %96 = vector.shape_cast %95 : vector<4x8xf32> to vector<4x8x1xf32>
    %97 = vector.broadcast %96 : vector<4x8x1xf32> to vector<4x8x16xf32>
    %98 = arith.subf %94, %97 : vector<4x8x16xf32>
    %99 = math.exp %98 : vector<4x8x16xf32>
    %cst_36 = arith.constant dense<0.000000e+00> : vector<4x8xf32>
    %100 = vector.multi_reduction <add>, %99, %cst_36 [2] : vector<4x8x16xf32> to vector<4x8xf32>
    %101 = vector.shape_cast %100 : vector<4x8xf32> to vector<4x8x1xf32>
    %102 = vector.broadcast %101 : vector<4x8x1xf32> to vector<4x8x16xf32>
    %103 = arith.divf %99, %102 : vector<4x8x16xf32>
    %c0_37 = arith.constant 0 : index
    %c0_38 = arith.constant 0 : index
    %c16 = arith.constant 16 : index
    %104 = vector.load %arg12[%c0_37, %c0_38, %c16] : memref<4x8x128xf32, #tpu.memory_space<vmem>>, vector<4x8x16xf32>
    tpu.vector_store %arg12[%c0_37, %c0_38, %c16], %103 {strides = array<i32>} : memref<4x8x128xf32, #tpu.memory_space<vmem>>, vector<4x8x16xf32>,
    "tpu.trace_start"() <{level = 10 : i32, message = "bqk,bkd->bqd"}> : () -> ()
    %cst_39 = arith.constant dense<0.000000e+00> : vector<4x8x16xf32>
    %105 = tpu.matmul %103, %92, %cst_39 {dimension_numbers = #tpu.dot_dimension_numbers<[2], [1], [1], [2], [0, 0, 0, 1, 1, 2], [0], [0]>} : vector<4x8x16xf32>, vector<4x16x16xf32>, vector<4x8x16xf32> -> vector<4x8x16xf32>
    "tpu.trace_stop"() : () -> ()
    %106 = vector.shape_cast %105 : vector<4x8x16xf32> to vector<32x16xf32>
    %107 = arith.truncf %106 : vector<32x16xf32> to vector<32x16xbf16>
    %c0_40 = arith.constant 0 : index
    %c16_41 = arith.constant 16 : index
    %108 = vector.load %arg13[%c0_40, %c16_41] : memref<32x128xbf16, #tpu.memory_space<vmem>>, vector<32x16xbf16>
    tpu.vector_store %arg13[%c0_40, %c16_41], %107 {strides = array<i32>} : memref<32x128xbf16, #tpu.memory_space<vmem>>, vector<32x16xbf16>,
    %109 = vector.extract_strided_slice %58 {offsets = [0, 32], sizes = [32, 16], strides = [1, 1]} : vector<32x128xf32> to vector<32x16xf32>
    %110 = vector.shape_cast %109 : vector<32x16xf32> to vector<4x8x16xf32>
    %111 = vector.extract_strided_slice %62 {offsets = [0, 32], sizes = [64, 16], strides = [1, 1]} : vector<64x128xf32> to vector<64x16xf32>
    %112 = vector.shape_cast %111 : vector<64x16xf32> to vector<4x16x16xf32>
    %113 = vector.extract_strided_slice %63 {offsets = [0, 32], sizes = [64, 16], strides = [1, 1]} : vector<64x128xf32> to vector<64x16xf32>
    %114 = vector.shape_cast %113 : vector<64x16xf32> to vector<4x16x16xf32>
    "tpu.trace_start"() <{level = 10 : i32, message = "bqd,bkd->bqk"}> : () -> ()
    %cst_42 = arith.constant dense<0.000000e+00> : vector<4x8x16xf32>
    %115 = tpu.matmul %110, %112, %cst_42 {dimension_numbers = #tpu.dot_dimension_numbers<[2], [2], [1], [1], [0, 0, 0, 1, 1, 1], [0], [0]>} : vector<4x8x16xf32>, vector<4x16x16xf32>, vector<4x8x16xf32> -> vector<4x8x16xf32>
    "tpu.trace_stop"() : () -> ()
    %116 = arith.addf %115, %64 : vector<4x8x16xf32>
    %cst_43 = arith.constant dense<0xFF800000> : vector<4x8xf32>
    %117 = vector.multi_reduction <maximumf>, %116, %cst_43 [2] : vector<4x8x16xf32> to vector<4x8xf32>
    %118 = vector.shape_cast %117 : vector<4x8xf32> to vector<4x8x1xf32>
    %119 = vector.broadcast %118 : vector<4x8x1xf32> to vector<4x8x16xf32>
    %120 = arith.subf %116, %119 : vector<4x8x16xf32>
    %121 = math.exp %120 : vector<4x8x16xf32>
    %cst_44 = arith.constant dense<0.000000e+00> : vector<4x8xf32>
    %122 = vector.multi_reduction <add>, %121, %cst_44 [2] : vector<4x8x16xf32> to vector<4x8xf32>
    %123 = vector.shape_cast %122 : vector<4x8xf32> to vector<4x8x1xf32>
    %124 = vector.broadcast %123 : vector<4x8x1xf32> to vector<4x8x16xf32>
    %125 = arith.divf %121, %124 : vector<4x8x16xf32>
    %c0_45 = arith.constant 0 : index
    %c0_46 = arith.constant 0 : index
    %c32 = arith.constant 32 : index
    %126 = vector.load %arg12[%c0_45, %c0_46, %c32] : memref<4x8x128xf32, #tpu.memory_space<vmem>>, vector<4x8x16xf32>
    tpu.vector_store %arg12[%c0_45, %c0_46, %c32], %125 {strides = array<i32>} : memref<4x8x128xf32, #tpu.memory_space<vmem>>, vector<4x8x16xf32>,
    "tpu.trace_start"() <{level = 10 : i32, message = "bqk,bkd->bqd"}> : () -> ()
    %cst_47 = arith.constant dense<0.000000e+00> : vector<4x8x16xf32>
    %127 = tpu.matmul %125, %114, %cst_47 {dimension_numbers = #tpu.dot_dimension_numbers<[2], [1], [1], [2], [0, 0, 0, 1, 1, 2], [0], [0]>} : vector<4x8x16xf32>, vector<4x16x16xf32>, vector<4x8x16xf32> -> vector<4x8x16xf32>
    "tpu.trace_stop"() : () -> ()
    %128 = vector.shape_cast %127 : vector<4x8x16xf32> to vector<32x16xf32>
    %129 = arith.truncf %128 : vector<32x16xf32> to vector<32x16xbf16>
    %c0_48 = arith.constant 0 : index
    %c32_49 = arith.constant 32 : index
    %130 = vector.load %arg13[%c0_48, %c32_49] : memref<32x128xbf16, #tpu.memory_space<vmem>>, vector<32x16xbf16>
    tpu.vector_store %arg13[%c0_48, %c32_49], %129 {strides = array<i32>} : memref<32x128xbf16, #tpu.memory_space<vmem>>, vector<32x16xbf16>,
    %131 = vector.extract_strided_slice %58 {offsets = [0, 48], sizes = [32, 16], strides = [1, 1]} : vector<32x128xf32> to vector<32x16xf32>
    %132 = vector.shape_cast %131 : vector<32x16xf32> to vector<4x8x16xf32>
    %133 = vector.extract_strided_slice %62 {offsets = [0, 48], sizes = [64, 16], strides = [1, 1]} : vector<64x128xf32> to vector<64x16xf32>
    %134 = vector.shape_cast %133 : vector<64x16xf32> to vector<4x16x16xf32>
    %135 = vector.extract_strided_slice %63 {offsets = [0, 48], sizes = [64, 16], strides = [1, 1]} : vector<64x128xf32> to vector<64x16xf32>
    %136 = vector.shape_cast %135 : vector<64x16xf32> to vector<4x16x16xf32>
    "tpu.trace_start"() <{level = 10 : i32, message = "bqd,bkd->bqk"}> : () -> ()
    %cst_50 = arith.constant dense<0.000000e+00> : vector<4x8x16xf32>
    %137 = tpu.matmul %132, %134, %cst_50 {dimension_numbers = #tpu.dot_dimension_numbers<[2], [2], [1], [1], [0, 0, 0, 1, 1, 1], [0], [0]>} : vector<4x8x16xf32>, vector<4x16x16xf32>, vector<4x8x16xf32> -> vector<4x8x16xf32>
    "tpu.trace_stop"() : () -> ()
    %138 = arith.addf %137, %64 : vector<4x8x16xf32>
    %cst_51 = arith.constant dense<0xFF800000> : vector<4x8xf32>
    %139 = vector.multi_reduction <maximumf>, %138, %cst_51 [2] : vector<4x8x16xf32> to vector<4x8xf32>
    %140 = vector.shape_cast %139 : vector<4x8xf32> to vector<4x8x1xf32>
    %141 = vector.broadcast %140 : vector<4x8x1xf32> to vector<4x8x16xf32>
    %142 = arith.subf %138, %141 : vector<4x8x16xf32>
    %143 = math.exp %142 : vector<4x8x16xf32>
    %cst_52 = arith.constant dense<0.000000e+00> : vector<4x8xf32>
    %144 = vector.multi_reduction <add>, %143, %cst_52 [2] : vector<4x8x16xf32> to vector<4x8xf32>
    %145 = vector.shape_cast %144 : vector<4x8xf32> to vector<4x8x1xf32>
    %146 = vector.broadcast %145 : vector<4x8x1xf32> to vector<4x8x16xf32>
    %147 = arith.divf %143, %146 : vector<4x8x16xf32>
    %c0_53 = arith.constant 0 : index
    %c0_54 = arith.constant 0 : index
    %c48 = arith.constant 48 : index
    %148 = vector.load %arg12[%c0_53, %c0_54, %c48] : memref<4x8x128xf32, #tpu.memory_space<vmem>>, vector<4x8x16xf32>
    tpu.vector_store %arg12[%c0_53, %c0_54, %c48], %147 {strides = array<i32>} : memref<4x8x128xf32, #tpu.memory_space<vmem>>, vector<4x8x16xf32>,
    "tpu.trace_start"() <{level = 10 : i32, message = "bqk,bkd->bqd"}> : () -> ()
    %cst_55 = arith.constant dense<0.000000e+00> : vector<4x8x16xf32>
    %149 = tpu.matmul %147, %136, %cst_55 {dimension_numbers = #tpu.dot_dimension_numbers<[2], [1], [1], [2], [0, 0, 0, 1, 1, 2], [0], [0]>} : vector<4x8x16xf32>, vector<4x16x16xf32>, vector<4x8x16xf32> -> vector<4x8x16xf32>
    "tpu.trace_stop"() : () -> ()
    %150 = vector.shape_cast %149 : vector<4x8x16xf32> to vector<32x16xf32>
    %151 = arith.truncf %150 : vector<32x16xf32> to vector<32x16xbf16>
    %c0_56 = arith.constant 0 : index
    %c48_57 = arith.constant 48 : index
    %152 = vector.load %arg13[%c0_56, %c48_57] : memref<32x128xbf16, #tpu.memory_space<vmem>>, vector<32x16xbf16>
    tpu.vector_store %arg13[%c0_56, %c48_57], %151 {strides = array<i32>} : memref<32x128xbf16, #tpu.memory_space<vmem>>, vector<32x16xbf16>,
    %153 = vector.extract_strided_slice %58 {offsets = [0, 64], sizes = [32, 16], strides = [1, 1]} : vector<32x128xf32> to vector<32x16xf32>
    %154 = vector.shape_cast %153 : vector<32x16xf32> to vector<4x8x16xf32>
    %155 = vector.extract_strided_slice %62 {offsets = [0, 64], sizes = [64, 16], strides = [1, 1]} : vector<64x128xf32> to vector<64x16xf32>
    %156 = vector.shape_cast %155 : vector<64x16xf32> to vector<4x16x16xf32>
    %157 = vector.extract_strided_slice %63 {offsets = [0, 64], sizes = [64, 16], strides = [1, 1]} : vector<64x128xf32> to vector<64x16xf32>
    %158 = vector.shape_cast %157 : vector<64x16xf32> to vector<4x16x16xf32>
    "tpu.trace_start"() <{level = 10 : i32, message = "bqd,bkd->bqk"}> : () -> ()
    %cst_58 = arith.constant dense<0.000000e+00> : vector<4x8x16xf32>
    %159 = tpu.matmul %154, %156, %cst_58 {dimension_numbers = #tpu.dot_dimension_numbers<[2], [2], [1], [1], [0, 0, 0, 1, 1, 1], [0], [0]>} : vector<4x8x16xf32>, vector<4x16x16xf32>, vector<4x8x16xf32> -> vector<4x8x16xf32>
    "tpu.trace_stop"() : () -> ()
    %160 = arith.addf %159, %64 : vector<4x8x16xf32>
    %cst_59 = arith.constant dense<0xFF800000> : vector<4x8xf32>
    %161 = vector.multi_reduction <maximumf>, %160, %cst_59 [2] : vector<4x8x16xf32> to vector<4x8xf32>
    %162 = vector.shape_cast %161 : vector<4x8xf32> to vector<4x8x1xf32>
    %163 = vector.broadcast %162 : vector<4x8x1xf32> to vector<4x8x16xf32>
    %164 = arith.subf %160, %163 : vector<4x8x16xf32>
    %165 = math.exp %164 : vector<4x8x16xf32>
    %cst_60 = arith.constant dense<0.000000e+00> : vector<4x8xf32>
    %166 = vector.multi_reduction <add>, %165, %cst_60 [2] : vector<4x8x16xf32> to vector<4x8xf32>
    %167 = vector.shape_cast %166 : vector<4x8xf32> to vector<4x8x1xf32>
    %168 = vector.broadcast %167 : vector<4x8x1xf32> to vector<4x8x16xf32>
    %169 = arith.divf %165, %168 : vector<4x8x16xf32>
    %c0_61 = arith.constant 0 : index
    %c0_62 = arith.constant 0 : index
    %c64 = arith.constant 64 : index
    %170 = vector.load %arg12[%c0_61, %c0_62, %c64] : memref<4x8x128xf32, #tpu.memory_space<vmem>>, vector<4x8x16xf32>
    tpu.vector_store %arg12[%c0_61, %c0_62, %c64], %169 {strides = array<i32>} : memref<4x8x128xf32, #tpu.memory_space<vmem>>, vector<4x8x16xf32>,
    "tpu.trace_start"() <{level = 10 : i32, message = "bqk,bkd->bqd"}> : () -> ()
    %cst_63 = arith.constant dense<0.000000e+00> : vector<4x8x16xf32>
    %171 = tpu.matmul %169, %158, %cst_63 {dimension_numbers = #tpu.dot_dimension_numbers<[2], [1], [1], [2], [0, 0, 0, 1, 1, 2], [0], [0]>} : vector<4x8x16xf32>, vector<4x16x16xf32>, vector<4x8x16xf32> -> vector<4x8x16xf32>
    "tpu.trace_stop"() : () -> ()
    %172 = vector.shape_cast %171 : vector<4x8x16xf32> to vector<32x16xf32>
    %173 = arith.truncf %172 : vector<32x16xf32> to vector<32x16xbf16>
    %c0_64 = arith.constant 0 : index
    %c64_65 = arith.constant 64 : index
    %174 = vector.load %arg13[%c0_64, %c64_65] : memref<32x128xbf16, #tpu.memory_space<vmem>>, vector<32x16xbf16>
    tpu.vector_store %arg13[%c0_64, %c64_65], %173 {strides = array<i32>} : memref<32x128xbf16, #tpu.memory_space<vmem>>, vector<32x16xbf16>,
    %175 = vector.extract_strided_slice %58 {offsets = [0, 80], sizes = [32, 16], strides = [1, 1]} : vector<32x128xf32> to vector<32x16xf32>
    %176 = vector.shape_cast %175 : vector<32x16xf32> to vector<4x8x16xf32>
    %177 = vector.extract_strided_slice %62 {offsets = [0, 80], sizes = [64, 16], strides = [1, 1]} : vector<64x128xf32> to vector<64x16xf32>
    %178 = vector.shape_cast %177 : vector<64x16xf32> to vector<4x16x16xf32>
    %179 = vector.extract_strided_slice %63 {offsets = [0, 80], sizes = [64, 16], strides = [1, 1]} : vector<64x128xf32> to vector<64x16xf32>
    %180 = vector.shape_cast %179 : vector<64x16xf32> to vector<4x16x16xf32>
    "tpu.trace_start"() <{level = 10 : i32, message = "bqd,bkd->bqk"}> : () -> ()
    %cst_66 = arith.constant dense<0.000000e+00> : vector<4x8x16xf32>
    %181 = tpu.matmul %176, %178, %cst_66 {dimension_numbers = #tpu.dot_dimension_numbers<[2], [2], [1], [1], [0, 0, 0, 1, 1, 1], [0], [0]>} : vector<4x8x16xf32>, vector<4x16x16xf32>, vector<4x8x16xf32> -> vector<4x8x16xf32>
    "tpu.trace_stop"() : () -> ()
    %182 = arith.addf %181, %64 : vector<4x8x16xf32>
    %cst_67 = arith.constant dense<0xFF800000> : vector<4x8xf32>
    %183 = vector.multi_reduction <maximumf>, %182, %cst_67 [2] : vector<4x8x16xf32> to vector<4x8xf32>
    %184 = vector.shape_cast %183 : vector<4x8xf32> to vector<4x8x1xf32>
    %185 = vector.broadcast %184 : vector<4x8x1xf32> to vector<4x8x16xf32>
    %186 = arith.subf %182, %185 : vector<4x8x16xf32>
    %187 = math.exp %186 : vector<4x8x16xf32>
    %cst_68 = arith.constant dense<0.000000e+00> : vector<4x8xf32>
    %188 = vector.multi_reduction <add>, %187, %cst_68 [2] : vector<4x8x16xf32> to vector<4x8xf32>
    %189 = vector.shape_cast %188 : vector<4x8xf32> to vector<4x8x1xf32>
    %190 = vector.broadcast %189 : vector<4x8x1xf32> to vector<4x8x16xf32>
    %191 = arith.divf %187, %190 : vector<4x8x16xf32>
    %c0_69 = arith.constant 0 : index
    %c0_70 = arith.constant 0 : index
    %c80 = arith.constant 80 : index
    %192 = vector.load %arg12[%c0_69, %c0_70, %c80] : memref<4x8x128xf32, #tpu.memory_space<vmem>>, vector<4x8x16xf32>
    tpu.vector_store %arg12[%c0_69, %c0_70, %c80], %191 {strides = array<i32>} : memref<4x8x128xf32, #tpu.memory_space<vmem>>, vector<4x8x16xf32>,
    "tpu.trace_start"() <{level = 10 : i32, message = "bqk,bkd->bqd"}> : () -> ()
    %cst_71 = arith.constant dense<0.000000e+00> : vector<4x8x16xf32>
    %193 = tpu.matmul %191, %180, %cst_71 {dimension_numbers = #tpu.dot_dimension_numbers<[2], [1], [1], [2], [0, 0, 0, 1, 1, 2], [0], [0]>} : vector<4x8x16xf32>, vector<4x16x16xf32>, vector<4x8x16xf32> -> vector<4x8x16xf32>
    "tpu.trace_stop"() : () -> ()
    %194 = vector.shape_cast %193 : vector<4x8x16xf32> to vector<32x16xf32>
    %195 = arith.truncf %194 : vector<32x16xf32> to vector<32x16xbf16>
    %c0_72 = arith.constant 0 : index
    %c80_73 = arith.constant 80 : index
    %196 = vector.load %arg13[%c0_72, %c80_73] : memref<32x128xbf16, #tpu.memory_space<vmem>>, vector<32x16xbf16>
    tpu.vector_store %arg13[%c0_72, %c80_73], %195 {strides = array<i32>} : memref<32x128xbf16, #tpu.memory_space<vmem>>, vector<32x16xbf16>,
    %197 = vector.extract_strided_slice %58 {offsets = [0, 96], sizes = [32, 16], strides = [1, 1]} : vector<32x128xf32> to vector<32x16xf32>
    %198 = vector.shape_cast %197 : vector<32x16xf32> to vector<4x8x16xf32>
    %199 = vector.extract_strided_slice %62 {offsets = [0, 96], sizes = [64, 16], strides = [1, 1]} : vector<64x128xf32> to vector<64x16xf32>
    %200 = vector.shape_cast %199 : vector<64x16xf32> to vector<4x16x16xf32>
    %201 = vector.extract_strided_slice %63 {offsets = [0, 96], sizes = [64, 16], strides = [1, 1]} : vector<64x128xf32> to vector<64x16xf32>
    %202 = vector.shape_cast %201 : vector<64x16xf32> to vector<4x16x16xf32>
    "tpu.trace_start"() <{level = 10 : i32, message = "bqd,bkd->bqk"}> : () -> ()
    %cst_74 = arith.constant dense<0.000000e+00> : vector<4x8x16xf32>
    %203 = tpu.matmul %198, %200, %cst_74 {dimension_numbers = #tpu.dot_dimension_numbers<[2], [2], [1], [1], [0, 0, 0, 1, 1, 1], [0], [0]>} : vector<4x8x16xf32>, vector<4x16x16xf32>, vector<4x8x16xf32> -> vector<4x8x16xf32>
    "tpu.trace_stop"() : () -> ()
    %204 = arith.addf %203, %64 : vector<4x8x16xf32>
    %cst_75 = arith.constant dense<0xFF800000> : vector<4x8xf32>
    %205 = vector.multi_reduction <maximumf>, %204, %cst_75 [2] : vector<4x8x16xf32> to vector<4x8xf32>
    %206 = vector.shape_cast %205 : vector<4x8xf32> to vector<4x8x1xf32>
    %207 = vector.broadcast %206 : vector<4x8x1xf32> to vector<4x8x16xf32>
    %208 = arith.subf %204, %207 : vector<4x8x16xf32>
    %209 = math.exp %208 : vector<4x8x16xf32>
    %cst_76 = arith.constant dense<0.000000e+00> : vector<4x8xf32>
    %210 = vector.multi_reduction <add>, %209, %cst_76 [2] : vector<4x8x16xf32> to vector<4x8xf32>
    %211 = vector.shape_cast %210 : vector<4x8xf32> to vector<4x8x1xf32>
    %212 = vector.broadcast %211 : vector<4x8x1xf32> to vector<4x8x16xf32>
    %213 = arith.divf %209, %212 : vector<4x8x16xf32>
    %c0_77 = arith.constant 0 : index
    %c0_78 = arith.constant 0 : index
    %c96 = arith.constant 96 : index
    %214 = vector.load %arg12[%c0_77, %c0_78, %c96] : memref<4x8x128xf32, #tpu.memory_space<vmem>>, vector<4x8x16xf32>
    tpu.vector_store %arg12[%c0_77, %c0_78, %c96], %213 {strides = array<i32>} : memref<4x8x128xf32, #tpu.memory_space<vmem>>, vector<4x8x16xf32>,
    "tpu.trace_start"() <{level = 10 : i32, message = "bqk,bkd->bqd"}> : () -> ()
    %cst_79 = arith.constant dense<0.000000e+00> : vector<4x8x16xf32>
    %215 = tpu.matmul %213, %202, %cst_79 {dimension_numbers = #tpu.dot_dimension_numbers<[2], [1], [1], [2], [0, 0, 0, 1, 1, 2], [0], [0]>} : vector<4x8x16xf32>, vector<4x16x16xf32>, vector<4x8x16xf32> -> vector<4x8x16xf32>
    "tpu.trace_stop"() : () -> ()
    %216 = vector.shape_cast %215 : vector<4x8x16xf32> to vector<32x16xf32>
    %217 = arith.truncf %216 : vector<32x16xf32> to vector<32x16xbf16>
    %c0_80 = arith.constant 0 : index
    %c96_81 = arith.constant 96 : index
    %218 = vector.load %arg13[%c0_80, %c96_81] : memref<32x128xbf16, #tpu.memory_space<vmem>>, vector<32x16xbf16>
    tpu.vector_store %arg13[%c0_80, %c96_81], %217 {strides = array<i32>} : memref<32x128xbf16, #tpu.memory_space<vmem>>, vector<32x16xbf16>,
    %219 = vector.extract_strided_slice %58 {offsets = [0, 112], sizes = [32, 16], strides = [1, 1]} : vector<32x128xf32> to vector<32x16xf32>
    %220 = vector.shape_cast %219 : vector<32x16xf32> to vector<4x8x16xf32>
    %221 = vector.extract_strided_slice %62 {offsets = [0, 112], sizes = [64, 16], strides = [1, 1]} : vector<64x128xf32> to vector<64x16xf32>
    %222 = vector.shape_cast %221 : vector<64x16xf32> to vector<4x16x16xf32>
    %223 = vector.extract_strided_slice %63 {offsets = [0, 112], sizes = [64, 16], strides = [1, 1]} : vector<64x128xf32> to vector<64x16xf32>
    %224 = vector.shape_cast %223 : vector<64x16xf32> to vector<4x16x16xf32>
    "tpu.trace_start"() <{level = 10 : i32, message = "bqd,bkd->bqk"}> : () -> ()
    %cst_82 = arith.constant dense<0.000000e+00> : vector<4x8x16xf32>
    %225 = tpu.matmul %220, %222, %cst_82 {dimension_numbers = #tpu.dot_dimension_numbers<[2], [2], [1], [1], [0, 0, 0, 1, 1, 1], [0], [0]>} : vector<4x8x16xf32>, vector<4x16x16xf32>, vector<4x8x16xf32> -> vector<4x8x16xf32>
    "tpu.trace_stop"() : () -> ()
    %226 = arith.addf %225, %64 : vector<4x8x16xf32>
    %cst_83 = arith.constant dense<0xFF800000> : vector<4x8xf32>
    %227 = vector.multi_reduction <maximumf>, %226, %cst_83 [2] : vector<4x8x16xf32> to vector<4x8xf32>
    %228 = vector.shape_cast %227 : vector<4x8xf32> to vector<4x8x1xf32>
    %229 = vector.broadcast %228 : vector<4x8x1xf32> to vector<4x8x16xf32>
    %230 = arith.subf %226, %229 : vector<4x8x16xf32>
    %231 = math.exp %230 : vector<4x8x16xf32>
    %cst_84 = arith.constant dense<0.000000e+00> : vector<4x8xf32>
    %232 = vector.multi_reduction <add>, %231, %cst_84 [2] : vector<4x8x16xf32> to vector<4x8xf32>
    %233 = vector.shape_cast %232 : vector<4x8xf32> to vector<4x8x1xf32>
    %234 = vector.broadcast %233 : vector<4x8x1xf32> to vector<4x8x16xf32>
    %235 = arith.divf %231, %234 : vector<4x8x16xf32>
    %c0_85 = arith.constant 0 : index
    %c0_86 = arith.constant 0 : index
    %c112 = arith.constant 112 : index
    %236 = vector.load %arg12[%c0_85, %c0_86, %c112] : memref<4x8x128xf32, #tpu.memory_space<vmem>>, vector<4x8x16xf32>
    tpu.vector_store %arg12[%c0_85, %c0_86, %c112], %235 {strides = array<i32>} : memref<4x8x128xf32, #tpu.memory_space<vmem>>, vector<4x8x16xf32>,
    "tpu.trace_start"() <{level = 10 : i32, message = "bqk,bkd->bqd"}> : () -> ()
    %cst_87 = arith.constant dense<0.000000e+00> : vector<4x8x16xf32>
    %237 = tpu.matmul %235, %224, %cst_87 {dimension_numbers = #tpu.dot_dimension_numbers<[2], [1], [1], [2], [0, 0, 0, 1, 1, 2], [0], [0]>} : vector<4x8x16xf32>, vector<4x16x16xf32>, vector<4x8x16xf32> -> vector<4x8x16xf32>
    "tpu.trace_stop"() : () -> ()
    %238 = vector.shape_cast %237 : vector<4x8x16xf32> to vector<32x16xf32>
    %239 = arith.truncf %238 : vector<32x16xf32> to vector<32x16xbf16>
    %c0_88 = arith.constant 0 : index
    %c112_89 = arith.constant 112 : index
    %240 = vector.load %arg13[%c0_88, %c112_89] : memref<32x128xbf16, #tpu.memory_space<vmem>>, vector<32x16xbf16>
    tpu.vector_store %arg13[%c0_88, %c112_89], %239 {strides = array<i32>} : memref<32x128xbf16, #tpu.memory_space<vmem>>, vector<32x16xbf16>,
    %c0_90 = arith.constant 0 : index
    %c0_91 = arith.constant 0 : index
    %241 = vector.load %arg13[%c0_90, %c0_91] : memref<32x128xbf16, #tpu.memory_space<vmem>>, vector<32x128xbf16>
    %c0_92 = arith.constant 0 : index
    %c0_93 = arith.constant 0 : index
    %242 = vector.load %arg7[%c0_92, %c0_93] : memref<128x128xbf16, #tpu.memory_space<vmem>>, vector<128x128xbf16>
    %cst_94 = arith.constant dense<0.000000e+00> : vector<32x128xf32>
    %243 = tpu.matmul %241, %242, %cst_94 {dimension_numbers = #tpu.dot_dimension_numbers<[1], [0], [0], [1], [0, 0, 1, 1], [], []>} : vector<32x128xbf16>, vector<128x128xbf16>, vector<32x128xf32> -> vector<32x128xf32>
    %244 = arith.addf %243, %1 : vector<32x128xf32>
    %cst_95 = arith.constant dense<0.000000e+00> : vector<32xf32>
    %245 = vector.multi_reduction <add>, %244, %cst_95 [1] : vector<32x128xf32> to vector<32xf32>
    %246 = vector.shape_cast %245 : vector<32xf32> to vector<32x1xf32>
    %cst_96 = arith.constant 1.280000e+02 : f32
    %247 = vector.broadcast %cst_96 : f32 to vector<32x1xf32>
    %248 = arith.divf %246, %247 : vector<32x1xf32>
    %249 = vector.broadcast %248 : vector<32x1xf32> to vector<32x128xf32>
    %250 = arith.subf %244, %249 : vector<32x128xf32>
    %251 = arith.mulf %250, %250 : vector<32x128xf32>
    %cst_97 = arith.constant dense<0.000000e+00> : vector<32xf32>
    %252 = vector.multi_reduction <add>, %251, %cst_97 [1] : vector<32x128xf32> to vector<32xf32>
    %253 = vector.shape_cast %252 : vector<32xf32> to vector<32x1xf32>
    %cst_98 = arith.constant 1.280000e+02 : f32
    %254 = vector.broadcast %cst_98 : f32 to vector<32x1xf32>
    %255 = arith.divf %253, %254 : vector<32x1xf32>
    %256 = vector.broadcast %248 : vector<32x1xf32> to vector<32x128xf32>
    %257 = arith.subf %244, %256 : vector<32x128xf32>
    %cst_99 = arith.constant 9.99999974E-6 : f32
    %258 = vector.broadcast %cst_99 : f32 to vector<32x1xf32>
    %259 = arith.addf %255, %258 : vector<32x1xf32>
    %260 = math.rsqrt %259 : vector<32x1xf32>
    %261 = vector.broadcast %260 : vector<32x1xf32> to vector<32x128xf32>
    %262 = arith.mulf %257, %261 : vector<32x128xf32>
    %263 = vector.broadcast %9 : vector<1x128xf32> to vector<32x128xf32>
    %264 = arith.mulf %262, %263 : vector<32x128xf32>
    %265 = vector.broadcast %10 : vector<1x128xf32> to vector<32x128xf32>
    %266 = arith.addf %264, %265 : vector<32x128xf32>
    %267 = arith.truncf %266 : vector<32x128xf32> to vector<32x128xbf16>
    %c0_100 = arith.constant 0 : index
    %c0_101 = arith.constant 0 : index
    %268 = vector.load %arg8[%c0_100, %c0_101] : memref<128x512xbf16, #tpu.memory_space<vmem>>, vector<128x512xbf16>
    %cst_102 = arith.constant dense<0.000000e+00> : vector<32x512xf32>
    %269 = tpu.matmul %267, %268, %cst_102 {dimension_numbers = #tpu.dot_dimension_numbers<[1], [0], [0], [1], [0, 0, 1, 1], [], []>} : vector<32x128xbf16>, vector<128x512xbf16>, vector<32x512xf32> -> vector<32x512xf32>
    %c0_103 = arith.constant 0 : index
    %c0_104 = arith.constant 0 : index
    %270 = vector.load %arg9[%c0_103, %c0_104] : memref<1x512xf32, #tpu.memory_space<vmem>>, vector<1x512xf32>
    %271 = vector.broadcast %270 : vector<1x512xf32> to vector<32x512xf32>
    %272 = arith.addf %269, %271 : vector<32x512xf32>
    %cst_105 = arith.constant 0.000000e+00 : f32
    %273 = vector.broadcast %cst_105 : f32 to vector<32x512xf32>
    %274 = arith.cmpf ogt, %272, %273 : vector<32x512xf32>
    %cst_106 = arith.constant 0.00999999977 : f32
    %275 = vector.broadcast %cst_106 : f32 to vector<32x512xf32>
    %276 = arith.mulf %275, %272 : vector<32x512xf32>
    %277 = arith.select %274, %272, %276 : vector<32x512xi1>, vector<32x512xf32>
    %278 = arith.truncf %277 : vector<32x512xf32> to vector<32x512xbf16>
    %c0_107 = arith.constant 0 : index
    %c0_108 = arith.constant 0 : index
    %279 = vector.load %arg10[%c0_107, %c0_108] : memref<512x128xbf16, #tpu.memory_space<vmem>>, vector<512x128xbf16>
    %cst_109 = arith.constant dense<0.000000e+00> : vector<32x128xf32>
    %280 = tpu.matmul %278, %279, %cst_109 {dimension_numbers = #tpu.dot_dimension_numbers<[1], [0], [0], [1], [0, 0, 1, 1], [], []>} : vector<32x512xbf16>, vector<512x128xbf16>, vector<32x128xf32> -> vector<32x128xf32>
    %281 = vector.broadcast %11 : vector<1x128xf32> to vector<32x128xf32>
    %282 = arith.addf %280, %281 : vector<32x128xf32>
    %283 = arith.addf %282, %244 : vector<32x128xf32>
    %284 = vector.shape_cast %283 : vector<32x128xf32> to vector<4x8x128xf32>
    %c0_110 = arith.constant 0 : index
    %c0_111 = arith.constant 0 : index
    %c0_112 = arith.constant 0 : index
    %285 = vector.load %arg11[%c0_110, %c0_111, %c0_112] : memref<4x8x128xf32, #tpu.memory_space<vmem>>, vector<4x8x128xf32>
    tpu.vector_store %arg11[%c0_110, %c0_111, %c0_112], %284 {strides = array<i32>} : memref<4x8x128xf32, #tpu.memory_space<vmem>>, vector<4x8x128xf32>,
    return
  }
  func.func @transform_0(%arg0: i32) -> (i32, i32, i32) {
    %c0_i32 = arith.constant 0 : i32
    %c0_i32_0 = arith.constant 0 : i32
    %c0_i32_1 = arith.constant 0 : i32
    return %arg0, %c0_i32, %c0_i32_0 : i32, i32, i32
  }
  func.func @transform_1(%arg0: i32) -> (i32, i32, i32) {
    %c0_i32 = arith.constant 0 : i32
    %c0_i32_0 = arith.constant 0 : i32
    %c0_i32_1 = arith.constant 0 : i32
    return %arg0, %c0_i32, %c0_i32_0 : i32, i32, i32
  }
  func.func @transform_2(%arg0: i32) -> (i32, i32, i32) {
    %c0_i32 = arith.constant 0 : i32
    %c0_i32_0 = arith.constant 0 : i32
    %c0_i32_1 = arith.constant 0 : i32
    return %arg0, %c0_i32, %c0_i32_0 : i32, i32, i32
  }
  func.func @transform_3(%arg0: i32) -> (i32, i32) {
    %c0_i32 = arith.constant 0 : i32
    %c0_i32_0 = arith.constant 0 : i32
    %c0_i32_1 = arith.constant 0 : i32
    return %c0_i32, %c0_i32_0 : i32, i32
  }
  func.func @transform_4(%arg0: i32) -> (i32, i32) {
    %c0_i32 = arith.constant 0 : i32
    %c0_i32_0 = arith.constant 0 : i32
    %c0_i32_1 = arith.constant 0 : i32
    return %c0_i32, %c0_i32_0 : i32, i32
  }
  func.func @transform_5(%arg0: i32) -> (i32, i32) {
    %c0_i32 = arith.constant 0 : i32
    %c0_i32_0 = arith.constant 0 : i32
    %c0_i32_1 = arith.constant 0 : i32
    return %c0_i32, %c0_i32_0 : i32, i32
  }
  func.func @transform_6(%arg0: i32) -> (i32, i32) {
    %c0_i32 = arith.constant 0 : i32
    %c0_i32_0 = arith.constant 0 : i32
    %c0_i32_1 = arith.constant 0 : i32
    return %c0_i32, %c0_i32_0 : i32, i32
  }
  func.func @transform_7(%arg0: i32) -> (i32, i32) {
    %c0_i32 = arith.constant 0 : i32
    %c0_i32_0 = arith.constant 0 : i32
    %c0_i32_1 = arith.constant 0 : i32
    return %c0_i32, %c0_i32_0 : i32, i32
  }
  func.func @transform_8(%arg0: i32) -> (i32, i32) {
    %c0_i32 = arith.constant 0 : i32
    %c0_i32_0 = arith.constant 0 : i32
    %c0_i32_1 = arith.constant 0 : i32
    return %c0_i32, %c0_i32_0 : i32, i32
  }
  func.func @transform_9(%arg0: i32) -> (i32, i32) {
    %c0_i32 = arith.constant 0 : i32
    %c0_i32_0 = arith.constant 0 : i32
    %c0_i32_1 = arith.constant 0 : i32
    return %c0_i32, %c0_i32_0 : i32, i32
  }
  func.func @transform_10(%arg0: i32) -> (i32, i32, i32) {
    %c0_i32 = arith.constant 0 : i32
    %c0_i32_0 = arith.constant 0 : i32
    %c0_i32_1 = arith.constant 0 : i32
    return %arg0, %c0_i32, %c0_i32_0 : i32, i32, i32
  }
  func.func @transform_11(%arg0: i32) -> (i32, i32, i32) {
    %c0_i32 = arith.constant 0 : i32
    %c0_i32_0 = arith.constant 0 : i32
    %c0_i32_1 = arith.constant 0 : i32
    return %arg0, %c0_i32, %c0_i32_0 : i32, i32, i32
  }
}

</mosaic_0001>

<bundles_post_ra>
// kernel: tpu_custom_call.1
= control target key start
LH: loop header
LB: loop body
LE: loop exit
PB: predicated region body
PF: predicated region fallthrough
CT: control target
= control target key end

     0   :  { %17 = vsyncpa [#allocation4], 0  ;;  %s10489_s0 = inlined_call_operand.hbm [shape: f32[4,8,128], index: 0, kind: input, shape index: {}]   ;;  %s10490_s1 = inlined_call_operand.hbm [shape: f32[4,16,128], index: 1, kind: input, shape index: {}]   ;;  %s10491_s2 = inlined_call_operand.hbm [shape: f32[4,8,16], index: 2, kind: input, shape index: {}]   ;;  %s10492_s3 = inlined_call_operand.hbm [shape: f32[7,128], index: 3, kind: input, shape index: {}]   ;;  %s10493_s4 = inlined_call_operand.hbm [shape: bf16[128,128], index: 4, kind: input, shape index: {}]   ;;  %s10494_s5 = inlined_call_operand.hbm [shape: bf16[128,256], index: 5, kind: input, shape index: {}]   ;;  %s10495_s6 = inlined_call_operand.hbm [shape: bf16[128,128], index: 6, kind: input, shape index: {}]   ;;  %s10496_s7 = inlined_call_operand.hbm [shape: bf16[128,512], index: 7, kind: input, shape index: {}]   ;;  %s10497_s8 = inlined_call_operand.vmem [shape: f32[1,512], index: 8, kind: input, shape index: {}]   ;;  %s10498_s9 = inlined_call_operand.hbm [shape: bf16[512,128], index: 9, kind: input, shape index: {}]   ;;  %s10499_s10 = inlined_call_operand.hbm [shape: f32[4,8,128], index: 10, kind: output, shape index: {0}]   ;;  %s10500_s11 = inlined_call_operand.hbm [shape: f32[4,8,128], index: 11, kind: output, shape index: {1}]  }
   0x1   :  { %18 = vsyncpa [#allocation7], 0 }
   0x2   :  { %19 = vsyncpa [#allocation10], 0 }
   0x3   :  { %20 = vsyncpa [#allocation13], 0 }
   0x4   :  { %21 = vsyncpa [#allocation16], 0 }
   0x5   :  { %22 = vsyncpa [#allocation5], 0 }
   0x6   :  { %23 = vsyncpa [#allocation20], 0  ;;  %s9026_s17 = smov [#allocation6]   ;;  %s9027_s19 = smov [#allocation9]  }
   0x7   :  { %s41_s18 = sshll.u32 %s9026_s17, 4  ;;  %s66_s20 = sshll.u32 %s9027_s19, 4  ;;  %s42_s18 = int_to_ptr.vmem [resolvable:$true] %s41_s18  ;;  %s67_s20 = int_to_ptr.vmem [resolvable:$true] %s66_s20 }
   0x8   :  { %s8800_s21 = scalar_lea.vmem %s42_s18, 1024  ;;  %p8805_p1 = scmp.lt.s32.totalorder %s42_s18, %s42_s18 }
   0x9   :  { %p8801_p0 = scmp.ne.s32.totalorder %s42_s18, %s8800_s21  ;;  %p8806_p2 = scmp.lt.s32.totalorder %s8800_s21, %s8800_s21 }
   0xb   :  { %p8807_p3 = por %p8806_p2, %p8805_p1 }
   0xd   :  { %p8808_p4 = pnand %p8807_p3, %p8801_p0 }
   0xf   :  { %8811 = shalt.err (!%p8808_p4)
}
  0x10   :  { %s9028_s22 = smov 128   ;;  %s9029_s23 = smov 8  }
  0x11   :  { %47 = dma.hbm_to_vmem [thread:$0]  %s10490_s1, 1024, %s42_s18, [#allocation7], %s9028_s22, %s9028_s22, %s9029_s23  }
  0x12   :  { %s8820_s26 = scalar_lea.vmem %s67_s20, 128  ;;  %p8825_p6 = scmp.lt.s32.totalorder %s67_s20, %s67_s20 }
  0x13   :  { %p8821_p5 = scmp.ne.s32.totalorder %s67_s20, %s8820_s26  ;;  %p8826_p7 = scmp.lt.s32.totalorder %s8820_s26, %s8820_s26 }
  0x15   :  { %p8827_p8 = por %p8826_p7, %p8825_p6 }
  0x17   :  { %p8828_p9 = pnand %p8827_p8, %p8821_p5 }
  0x19   :  { %8831 = shalt.err (!%p8828_p9)
}
  0x1a   :  { %69 = dma.hbm_to_vmem [thread:$0]  %s10492_s3, 128, %s67_s20, [#allocation10]  }
  0x1b   :  { %s9030_s29 = smov [#allocation12]   ;;  %s9031_s12 = smov [#allocation15]  }
  0x1c   :  { %s87_s30 = sshll.u32 %s9030_s29, 4  ;;  %s111_s13 = sshll.u32 %s9031_s12, 4  ;;  %s88_s30 = int_to_ptr.vmem [resolvable:$true] %s87_s30  ;;  %s112_s13 = int_to_ptr.vmem [resolvable:$true] %s111_s13 }
  0x1d   :  { %s8840_s14 = scalar_lea.vmem %s88_s30, 2048  ;;  %p8845_p11 = scmp.lt.s32.totalorder %s88_s30, %s88_s30 }
  0x1e   :  { %p8841_p10 = scmp.ne.s32.totalorder %s88_s30, %s8840_s14  ;;  %p8846_p12 = scmp.lt.s32.totalorder %s8840_s14, %s8840_s14 }
  0x20   :  { %p8847_p13 = por %p8846_p12, %p8845_p11 }
  0x22   :  { %p8848_p0 = pnand %p8847_p13, %p8841_p10 }
  0x24   :  { %8851 = shalt.err (!%p8848_p0)
}
  0x25   :  { %93 = dma.hbm_to_vmem [thread:$0]  %s10494_s5, 2048, %s88_s30, [#allocation13], %s9028_s22, %s9028_s22, %s9029_s23  }
  0x26   :  { %s8860_s3 = scalar_lea.vmem %s112_s13, 4096  ;;  %p8865_p2 = scmp.lt.s32.totalorder %s112_s13, %s112_s13 }
  0x27   :  { %p8861_p1 = scmp.ne.s32.totalorder %s112_s13, %s8860_s3  ;;  %p8866_p3 = scmp.lt.s32.totalorder %s8860_s3, %s8860_s3 }
  0x29   :  { %p8867_p4 = por %p8866_p3, %p8865_p2 }
  0x2b   :  { %p8868_p5 = pnand %p8867_p4, %p8861_p1 }
  0x2d   :  { %8871 = shalt.err (!%p8868_p5)
}
  0x2e   :  { %s9032_s16 = smov 256   ;;  %s9033_s17 = smov 16  }
  0x2f   :  { %117 = dma.hbm_to_vmem [thread:$0]  %s10496_s7, 4096, %s112_s13, [#allocation16], %s9032_s16, %s9032_s16, %s9033_s17  }
  0x30   :  { %s9034_s20 = smov [#allocation3]   ;;  %s9035_s24 = smov [#allocation8]  }
  0x31   :  { %s29_s21 = sshll.u32 %s9034_s20, 4  ;;  %s53_s25 = sshll.u32 %s9035_s24, 4  ;;  %s30_s21 = int_to_ptr.vmem [resolvable:$true] %s29_s21  ;;  %s54_s25 = int_to_ptr.vmem [resolvable:$true] %s53_s25 }
  0x32   :  { %s8880_s5 = scalar_lea.vmem %s30_s21, 512  ;;  %p8885_p7 = scmp.lt.s32.totalorder %s30_s21, %s30_s21 }
  0x33   :  { %p8881_p6 = scmp.ne.s32.totalorder %s30_s21, %s8880_s5  ;;  %p8886_p8 = scmp.lt.s32.totalorder %s8880_s5, %s8880_s5 }
  0x35   :  { %p8887_p9 = por %p8886_p8, %p8885_p7 }
  0x37   :  { %p8888_p10 = pnand %p8887_p9, %p8881_p6 }
  0x39   :  { %8891 = shalt.err (!%p8888_p10)
}
  0x3a   :  { %35 = dma.hbm_to_vmem [thread:$0]  %s10489_s0, 512, %s30_s21, [#allocation4], %s9028_s22, %s9028_s22, %s9029_s23  }
  0x3b   :  { %s8900_s7 = scalar_lea.vmem %s54_s25, 512  ;;  %p8905_p12 = scmp.lt.s32.totalorder %s54_s25, %s54_s25 }
  0x3c   :  { %p8901_p11 = scmp.ne.s32.totalorder %s54_s25, %s8900_s7  ;;  %p8906_p13 = scmp.lt.s32.totalorder %s8900_s7, %s8900_s7 }
  0x3e   :  { %p8907_p0 = por %p8906_p13, %p8905_p12 }
  0x40   :  { %p8908_p1 = pnand %p8907_p0, %p8901_p11 }
  0x42   :  { %8911 = shalt.err (!%p8908_p1)
}
  0x43   :  { %59 = dma.hbm_to_vmem [thread:$0]  %s10491_s2, 512, %s54_s25, [#allocation7], %s9028_s22, %s9028_s22, %s9029_s23  }
  0x44   :  { %s9036_s30 = smov [#allocation11]  }
  0x45   :  { %s75_s12 = sshll.u32 %s9036_s30, 4  ;;  %s76_s12 = int_to_ptr.vmem [resolvable:$true] %s75_s12 }
  0x46   :  { %s8920_s13 = scalar_lea.vmem %s76_s12, 1024  ;;  %p8925_p3 = scmp.lt.s32.totalorder %s76_s12, %s76_s12 }
  0x47   :  { %p8921_p2 = scmp.ne.s32.totalorder %s76_s12, %s8920_s13  ;;  %p8926_p4 = scmp.lt.s32.totalorder %s8920_s13, %s8920_s13 }
  0x49   :  { %p8927_p5 = por %p8926_p4, %p8925_p3 }
  0x4b   :  { %p8928_p6 = pnand %p8927_p5, %p8921_p2 }
  0x4d   :  { %8931 = shalt.err (!%p8928_p6)
}
  0x4e   :  { %s9037_s0 = smov 64   ;;  %s9038_s14 = smov 4  }
  0x4f   :  { %81 = dma.hbm_to_vmem [thread:$0]  %s10493_s4, 1024, %s76_s12, [#allocation10], %s9037_s0, %s9037_s0, %s9038_s14  }
  0x50   :  { %s9039_s3 = smov [#allocation14]   ;;  %s9040_s16 = smov [#allocation17]  }
  0x51   :  { %s99_s2 = sshll.u32 %s9039_s3, 4  ;;  %s125_s18 = sshll.u32 %s9040_s16, 4  ;;  %s100_s2 = int_to_ptr.vmem [resolvable:$true] %s99_s2  ;;  %s126_s18 = int_to_ptr.vmem [resolvable:$true] %s125_s18 }
  0x52   :  { %s8940_s19 = scalar_lea.vmem %s100_s2, 1024  ;;  %p8945_p8 = scmp.lt.s32.totalorder %s100_s2, %s100_s2 }
  0x53   :  { %p8941_p7 = scmp.ne.s32.totalorder %s100_s2, %s8940_s19  ;;  %p8946_p9 = scmp.lt.s32.totalorder %s8940_s19, %s8940_s19 }
  0x55   :  { %p8947_p10 = por %p8946_p9, %p8945_p8 }
  0x57   :  { %p8948_p11 = pnand %p8947_p10, %p8941_p7 }
  0x59   :  { %8951 = shalt.err (!%p8948_p11)
}
  0x5a   :  { %105 = dma.hbm_to_vmem [thread:$0]  %s10495_s6, 1024, %s100_s2, [#allocation13], %s9037_s0, %s9037_s0, %s9038_s14  }
  0x5b   :  { %s8960_s4 = scalar_lea.vmem %s126_s18, 4096  ;;  %p8965_p13 = scmp.lt.s32.totalorder %s126_s18, %s126_s18 }
  0x5c   :  { %p8961_p12 = scmp.ne.s32.totalorder %s126_s18, %s8960_s4  ;;  %p8966_p0 = scmp.lt.s32.totalorder %s8960_s4, %s8960_s4 }
  0x5e   :  { %p8967_p1 = por %p8966_p0, %p8965_p13 }
  0x60   :  { %p8968_p2 = pnand %p8967_p1, %p8961_p12 }
  0x62   :  { %8971 = shalt.err (!%p8968_p2)
}
  0x63   :  { %131 = dma.hbm_to_vmem [thread:$0]  %s10498_s9, 4096, %s126_s18, [#allocation16], %s9037_s0, %s9037_s0, %s9038_s14  }
  0x64   :  { %9012 = dma.done.wait [#allocation4], 512  }
  0x65   :  { %9013 = vsyncadd [#allocation4], 4294966784 }
  0x66   :  { %9014 = dma.done.wait [#allocation7], 1536  }
  0x67   :  { %9015 = vsyncadd [#allocation7], 4294965760 }
  0x68   :  { %9016 = dma.done.wait [#allocation10], 1152  }
  0x69   :  { %9017 = vsyncadd [#allocation10], 4294966144 }
  0x6a   :  { %9018 = dma.done.wait [#allocation13], 3072  }
  0x6b   :  { %9019 = vsyncadd [#allocation13], 4294964224 }
  0x6c   :  { %9020 = dma.done.wait [#allocation16], 8192  }
  0x6d   :  { %9021 = vsyncadd [#allocation16], 4294959104  ;;  %v164_v0 = vld [vmem:[#allocation6] sm:$0xff]  ;;  %v166_v1 = vld [vmem:[#allocation6 + $0x10] sm:$0xff]  ;;  %vm9043_vm0 = vmmov 0   ;;  %vm638_vm1 = vcmask 130048  }
  0x6e   :  { %234 = vadd.xlane.f32.xlu0 %v164_v0  ;;  %238 = vadd.xlane.f32.xlu1 %v166_v1  ;;  %v165_v2 = vld [vmem:[#allocation6 + $0x8] sm:$0xff]  ;;  %v167_v3 = vld [vmem:[#allocation6 + $0x18] sm:$0xff]  ;;  %v162_v4 = vld [vmem:[#allocation3 + $0x10] sm:$0xff]  ;;  %s9044_s6 = smov 112   ;;  %vm1311_vm2 = vcmask 125952   ;;  %s9045_s9 = smov 96  }
  0x6f   :  { %v163_v5 = vld [vmem:[#allocation3 + $0x18] sm:$0xff]  ;;  %v168_v6 = vld [vmem:[#allocation6 + $0x20] sm:$0xff]  ;;  %v169_v7 = vld [vmem:[#allocation6 + $0x28] sm:$0xff]  ;;  %s9046_s5 = smov 80   ;;  %s9047_s26 = smov 48   ;;  %vm2053_vm3 = vcmask 257152  }
  0x70   :  { %v170_v8 = vld [vmem:[#allocation6 + $0x30] sm:$0xff]  ;;  %v171_v9 = vld [vmem:[#allocation6 + $0x38] sm:$0xff]  ;;  %v8509_v53 = vld [vmem:[#allocation11 + $0x38] sm:$0xff]   ;;  %s9048_s27 = smov 32   ;;  %vm2787_vm4 = vcmask 388352   ;;  %vm3521_vm5 = vcmask 519552  }
  0x71   :  { %v8503_v10 = vld [vmem:[#allocation12 + $0x74] ss:$8 sps:$4 sm:$0xff]   ;;  %v8505_v11 = vld [vmem:[#allocation12 + $0x70] ss:$8 sps:$4 sm:$0xff]   ;;  %v8506_v47 = vld [vmem:[#allocation12 + $0x64] ss:$8 sps:$4 sm:$0xff]   ;;  %7990 = vmatprep.subr.bf16.mxu0 %v8509_v53 }
  0x72   :  { %236 = vadd.xlane.f32.xlu0 %v165_v2  ;;  %240 = vadd.xlane.f32.xlu1 %v167_v3  ;;  %v8508_v48 = vld [vmem:[#allocation12 + $0x60] ss:$8 sps:$4 sm:$0xff]   ;;  %v8510_v54 = vld [vmem:[#allocation12 + $0x54] ss:$8 sps:$4 sm:$0xff]   ;;  %v8512_v56 = vld [vmem:[#allocation12 + $0x50] ss:$8 sps:$4 sm:$0xff]  }
  0x73   :  { %561 = vmatprep.subr.bf16.mxu1 %v8503_v10  ;;  %7991 = vmatpush3.bf16.msra.mxu0 %v8509_v53  ;;  %v8513_v57 = vld [vmem:[#allocation11 + $0x30] sm:$0xff]   ;;  %v8514_v58 = vld [vmem:[#allocation12 + $0x44] ss:$8 sps:$4 sm:$0xff]   ;;  %v8516_v59 = vld [vmem:[#allocation12 + $0x40] ss:$8 sps:$4 sm:$0xff]   ;;  %vm4255_vm6 = vcmask 650752  }
  0x74   :  { %562 = vmatpush1.bf16.msra.mxu1 %v8505_v11  ;;  %7992 = vmatprep.subr.bf16.mxu0 %v8513_v57  ;;  %v8517_v60 = vld [vmem:[#allocation11 + $0x28] sm:$0xff]   ;;  %v8518_v61 = vld [vmem:[#allocation12 + $0x34] ss:$8 sps:$4 sm:$0xff]   ;;  %v8520_v62 = vld [vmem:[#allocation12 + $0x30] ss:$8 sps:$4 sm:$0xff]   ;;  %vm4989_vm7 = vcmask 781952  }
  0x75   :  { %563 = vmatprep.subr.bf16.mxu1 %v8506_v47  ;;  %v8521_v63 = vld [vmem:[#allocation11 + $0x20] sm:$0xff]   ;;  %vm5723_vm8 = vcmask 913152   ;;  %vm6457_vm9 = vcmask 1044352   ;;  %vm1704_vm10 = vcmask 261248   ;;  %vm2446_vm11 = vcmask 392448  }
  0x76   :  { %177 = vadd.xlane.f32.xlu0 %v162_v4  ;;  %179 = vadd.xlane.f32.xlu1 %v163_v5  ;;  %v8534_v10 = vld [vmem:[#allocation11] sm:$0xff]   ;;  %vm3180_vm12 = vcmask 523648   ;;  %vm3914_vm13 = vcmask 654848   ;;  %vm4648_vm14 = vcmask 786048   ;;  %vm5382_vm15 = vcmask 917248  }
  0x77   :  { %7993 = vmatpush3.bf16.msra.mxu0 %v8513_v57 }
  0x78   :  { %564 = vmatpush1.bf16.msra.mxu1 %v8508_v48  ;;  %7994 = vmatprep.subr.bf16.mxu0 %v8517_v60 }
  0x79   :  { %565 = vmatprep.subr.bf16.mxu1 %v8510_v54 }
  0x7a   :  { %242 = vadd.xlane.f32.xlu0 %v168_v6  ;;  %244 = vadd.xlane.f32.xlu1 %v169_v7 }
  0x7b   :  { %7995 = vmatpush3.bf16.msra.mxu0 %v8517_v60 }
  0x7c   :  { %566 = vmatpush1.bf16.msra.mxu1 %v8512_v56  ;;  %7996 = vmatprep.subr.bf16.mxu0 %v8521_v63 }
  0x7d   :  { %567 = vmatprep.subr.bf16.mxu1 %v8514_v58 }
  0x7e   :  { %246 = vadd.xlane.f32.xlu0 %v170_v8  ;;  %248 = vadd.xlane.f32.xlu1 %v171_v9 }
  0x7f   :  { %7997 = vmatpush3.bf16.msra.mxu0 %v8521_v63 }
  0x80   :  { %568 = vmatpush1.bf16.msra.mxu1 %v8516_v59 }
  0x81   :  { %569 = vmatprep.subr.bf16.mxu1 %v8518_v61 }
  0x84   :  { %570 = vmatpush1.bf16.msra.mxu1 %v8520_v62 }
  0xf7   :  { %v235_v12 = vpop.xlane.xlu0 %234  ;;  %v239_v13 = vpop.xlane.xlu1 %238 }
  0xf8   :  { %v250_v14 = vmul.f32 0.0078125, %v235_v12  ;;  %v252_v15 = vmul.f32 0.0078125, %v239_v13 }
  0xfa   :  { %v9157_v16 = vsub.f32 %v164_v0, %v250_v14  ;;  %v9159_v17 = vsub.f32 %v166_v1, %v252_v15  ;;  %v8522_v0 = vld [vmem:[#allocation12 + $0x24] ss:$8 sps:$4 sm:$0xff]   ;;  %v8524_v1 = vld [vmem:[#allocation12 + $0x20] ss:$8 sps:$4 sm:$0xff]  }
  0xfb   :  { %v237_v18 = vpop.xlane.xlu0 %236  ;;  %v241_v19 = vpop.xlane.xlu1 %240  ;;  %571 = vmatprep.subr.bf16.mxu1 %v8522_v0 }
  0xfc   :  { %v251_v20 = vmul.f32 0.0078125, %v237_v18  ;;  %v266_v21 = vmul.f32 %v9157_v16, %v9157_v16  ;;  %v253_v22 = vmul.f32 0.0078125, %v241_v19  ;;  %v268_v24 = vmul.f32 %v9159_v17, %v9159_v17  ;;  %572 = vmatpush1.bf16.msra.mxu1 %v8524_v1 }
  0xfe   :  { %274 = vadd.xlane.f32.xlu0 %v266_v21  ;;  %v9163_v23 = vsub.f32 %v165_v2, %v251_v20  ;;  %v9167_v25 = vsub.f32 %v167_v3, %v253_v22  ;;  %v8525_v2 = vld [vmem:[#allocation11 + $0x18] sm:$0xff]   ;;  %v218_v20 = vlaneseq }
  0xff   :  { %v178_v26 = vpop.xlane.xlu0 %177  ;;  %v180_v27 = vpop.xlane.xlu1 %179  ;;  %v8526_v3 = vld [vmem:[#allocation12 + $0x14] ss:$8 sps:$4 sm:$0xff]   ;;  %7998 = vmatprep.subr.bf16.mxu0 %v8525_v2 }
 0x100   :  { %v184_v28 = vmul.f32 0.0078125, %v178_v26  ;;  %v267_v29 = vmul.f32 %v9163_v23, %v9163_v23  ;;  %v185_v30 = vmul.f32 0.0078125, %v180_v27  ;;  %v269_v31 = vmul.f32 %v9167_v25, %v9167_v25  ;;  %573 = vmatprep.subr.bf16.mxu1 %v8526_v3  ;;  %7999 = vmatpush3.bf16.msra.mxu0 %v8525_v2 }
 0x102   :  { %276 = vadd.xlane.f32.xlu1 %v267_v29  ;;  %278 = vadd.xlane.f32.xlu0 %v268_v24  ;;  %v9173_v32 = vsub.f32 %v162_v4, %v184_v28  ;;  %v9175_v33 = vsub.f32 %v163_v5, %v185_v30  ;;  %v8528_v4 = vld [vmem:[#allocation12 + $0x10] ss:$8 sps:$4 sm:$0xff]   ;;  %v9198_v29 = vshrl.u32 %v218_v20, 7 }
 0x103   :  { %v243_v34 = vpop.xlane.xlu0 %242  ;;  %v245_v35 = vpop.xlane.xlu1 %244  ;;  %574 = vmatpush1.bf16.msra.mxu1 %v8528_v4  ;;  %v8529_v5 = vld [vmem:[#allocation11 + $0x10] sm:$0xff]  }
 0x104   :  { %v254_v36 = vmul.f32 0.0078125, %v243_v34  ;;  %v192_v37 = vmul.f32 %v9173_v32, %v9173_v32  ;;  %v255_v38 = vmul.f32 0.0078125, %v245_v35  ;;  %v193_v39 = vmul.f32 %v9175_v33, %v9175_v33  ;;  %8000 = vmatprep.subr.bf16.mxu0 %v8529_v5  ;;  %10528 = vst [vmem:[#allocation28_spill] sm:$0xff] %v9198_v29 }
 0x105   :  { %8001 = vmatpush3.bf16.msra.mxu0 %v8529_v5  ;;  %v10504_v59 = vsub.s32 0, %v9198_v29  ;;  %v10502_v3 = vsub.s32 1, %v9198_v29 }
 0x106   :  { %280 = vadd.xlane.f32.xlu1 %v269_v31  ;;  %198 = vadd.xlane.f32.xlu0 %v192_v37  ;;  %v9181_v40 = vsub.f32 %v168_v6, %v254_v36  ;;  %v9183_v41 = vsub.f32 %v169_v7, %v255_v38  ;;  %v8530_v6 = vld [vmem:[#allocation12 + $0x4] ss:$8 sps:$4 sm:$0xff]   ;;  %v8532_v7 = vld [vmem:[#allocation12] ss:$8 sps:$4 sm:$0xff]   ;;  %v10503_v38 = vsub.s32 2, %v9198_v29 }
 0x107   :  { %v247_v42 = vpop.xlane.xlu0 %246  ;;  %v249_v43 = vpop.xlane.xlu1 %248  ;;  %575 = vmatprep.subr.bf16.mxu1 %v8530_v6 }
 0x108   :  { %v256_v44 = vmul.f32 0.0078125, %v247_v42  ;;  %v270_v45 = vmul.f32 %v9181_v40, %v9181_v40  ;;  %v257_v46 = vmul.f32 0.0078125, %v249_v43  ;;  %v271_v49 = vmul.f32 %v9183_v41, %v9183_v41  ;;  %576 = vmatpush1.bf16.msra.mxu1 %v8532_v7  ;;  %v172_v43 = vld [vmem:[#allocation9] sm:$0x7f] }
 0x109   :  { %v9203_v48 = vrot.slane %v172_v43, %v10503_v38  ;;  %v9215_v2 = vrot.slane %v172_v43, %v10504_v59  ;;  %v9805_v59 = vld [vmem:[#allocation8 + $0x18] sm:$0xff] }
 0x10a   :  { %200 = vadd.xlane.f32.xlu1 %v193_v39  ;;  %282 = vadd.xlane.f32.xlu0 %v270_v45  ;;  %v9189_v50 = vsub.f32 %v170_v8, %v256_v44  ;;  %v9191_v51 = vsub.f32 %v171_v9, %v257_v46  ;;  %v10505_v8 = vmov 0   ;;  %v8533_v9 = vld [vmem:[#allocation11 + $0x8] sm:$0xff]  }
 0x10b   :  { %593 = vmatprep.mubr.bf16.mxu1 %v10505_v8  ;;  %8002 = vmatprep.subr.bf16.mxu0 %v8533_v9 }
 0x10c   :  { %v272_v52 = vmul.f32 %v9189_v50, %v9189_v50  ;;  %v273_v55 = vmul.f32 %v9191_v51, %v9191_v51  ;;  %8003 = vmatpush3.bf16.msra.mxu0 %v8533_v9 }
 0x10d   :  { %8004 = vmatprep.subr.bf16.mxu0 %v8534_v10 }
 0x10e   :  { %284 = vadd.xlane.f32.xlu1 %v271_v49  ;;  %286 = vadd.xlane.f32.xlu0 %v272_v52  ;;  %v10501_v49 = vsub.s32 3, %v9198_v29  ;;  %v10540_v29 = vmov 0.0  }
 0x110   :  { %8005 = vmatpush3.bf16.msra.mxu0 %v8534_v10  ;;  %v337_v58 = vrot.slane %v172_v43, %v10501_v49 }
 0x112   :  { %288 = vadd.xlane.f32.xlu1 %v273_v55 }
 0x187   :  { %v275_v11 = vpop.xlane.xlu0 %274 }
 0x188   :  { %v290_v12 = vmul.f32 0.0078125, %v275_v11 }
 0x18a   :  { %v298_v13 = vadd.f32 1e-05, %v290_v12 }
 0x18b   :  { %v277_v14 = vpop.xlane.xlu1 %276  ;;  %v279_v15 = vpop.xlane.xlu0 %278 }
 0x18c   :  { %8625 = vrsqrt.f32 %v298_v13  ;;  %v291_v18 = vmul.f32 0.0078125, %v277_v14  ;;  %v292_v19 = vmul.f32 0.0078125, %v279_v15 }
 0x18e   :  { %v299_v21 = vadd.f32 1e-05, %v291_v18  ;;  %v300_v22 = vadd.f32 1e-05, %v292_v19 }
 0x18f   :  { %v281_v24 = vpop.xlane.xlu1 %280  ;;  %v199_v26 = vpop.xlane.xlu0 %198 }
 0x190   :  { %8627 = vrsqrt.f32 %v299_v21  ;;  %v293_v27 = vmul.f32 0.0078125, %v281_v24  ;;  %v204_v28 = vmul.f32 0.0078125, %v199_v26 }
 0x191   :  { %8629 = vrsqrt.f32 %v300_v22 }
 0x192   :  { %v301_v30 = vadd.f32 1e-05, %v293_v27  ;;  %v208_v31 = vadd.f32 1e-05, %v204_v28 }
 0x193   :  { %v201_v34 = vpop.xlane.xlu1 %200  ;;  %v283_v35 = vpop.xlane.xlu0 %282 }
 0x194   :  { %8631 = vrsqrt.f32 %v301_v30  ;;  %v205_v36 = vmul.f32 0.0078125, %v201_v34  ;;  %v294_v37 = vmul.f32 0.0078125, %v283_v35 }
 0x195   :  { %8633 = vrsqrt.f32 %v208_v31 }
 0x196   :  { %v209_v39 = vadd.f32 1e-05, %v205_v36  ;;  %v302_v42 = vadd.f32 1e-05, %v294_v37 }
 0x197   :  { %v285_v44 = vpop.xlane.xlu1 %284  ;;  %v287_v45 = vpop.xlane.xlu0 %286 }
 0x198   :  { %8635 = vrsqrt.f32 %v209_v39  ;;  %v295_v46 = vmul.f32 0.0078125, %v285_v44  ;;  %v296_v53 = vmul.f32 0.0078125, %v287_v45 }
 0x199   :  { %v8626_v47 = vpop.eup %8625  ;;  %8637 = vrsqrt.f32 %v302_v42 }
 0x19a   :  { %v303_v52 = vadd.f32 1e-05, %v295_v46  ;;  %v314_v54 = vmul.f32 %v8626_v47, %v9157_v16  ;;  %v304_v61 = vadd.f32 1e-05, %v296_v53  ;;  %v10507_v46 = vmov 0.0  }
 0x19b   :  { %v289_v55 = vpop.xlane.xlu1 %288  ;;  %8010 = vmatprep.subr.mxu0 %v10507_v46  ;;  %8052 = vmatprep.subr.mxu1 %v10507_v46 }
 0x19c   :  { %8639 = vrsqrt.f32 %v303_v52  ;;  %v297_v56 = vmul.f32 0.0078125, %v289_v55  ;;  %v326_v0 = vmul.f32 %v9203_v48, %v314_v54 }
 0x19d   :  { %v8628_v57 = vpop.eup %8627 }
 0x19e   :  { %v8630_v60 = vpop.eup %8629  ;;  %v305_v62 = vadd.f32 1e-05, %v297_v56  ;;  %v315_v63 = vmul.f32 %v8628_v57, %v9163_v23  ;;  %v338_v6 = vadd.f32 %v337_v58, %v326_v0 }
 0x19f   :  { %v316_v4 = vmul.f32 %v8630_v60, %v9159_v17  ;;  %v9227_v17 = vrot.slane %v172_v43, %v10502_v3 }
 0x1a0   :  { %8641 = vrsqrt.f32 %v305_v62  ;;  %v327_v1 = vmul.f32 %v9203_v48, %v315_v63 }
 0x1a1   :  { %v8632_v16 = vpop.eup %8631  ;;  %8643 = vrsqrt.f32 %v304_v61  ;;  %v328_v13 = vmul.f32 %v9203_v48, %v316_v4 }
 0x1a2   :  { %v8634_v5 = vpop.eup %8633  ;;  %v339_v7 = vadd.f32 %v337_v58, %v327_v1  ;;  %v317_v23 = vmul.f32 %v8632_v16, %v9167_v25 }
 0x1a3   :  { %v216_v9 = vmul.f32 %v8634_v5, %v9173_v32  ;;  %v340_v20 = vadd.f32 %v337_v58, %v328_v13  ;;  %v9335_v5 = vld [vmem:[#allocation8] sm:$0xff] }
 0x1a4   :  { %v461_v10 = vpack.c.bf16 %v339_v7, %v338_v6  ;;  %v329_v11 = vmul.f32 %v9203_v48, %v317_v23 }
 0x1a5   :  { %v8636_v12 = vpop.eup %8635  ;;  %v224_v15 = vmul.f32 %v9215_v2, %v216_v9 }
 0x1a6   :  { %594 = vmatmul.mubr.bf16.vlgmr.msra.gmra.mxu1 %v461_v10  ;;  %v217_v14 = vmul.f32 %v8636_v12, %v9175_v33  ;;  %v8638_v18 = vpop.eup %8637  ;;  %v341_v32 = vadd.f32 %v337_v58, %v329_v11  ;;  %v9339_v10 = vld [vmem:[#allocation8 + $0x8] sm:$0xff] }
 0x1a7   :  { %603 = vmatprep.mubr.bf16.mxu1 %v10505_v8  ;;  %v232_v21 = vadd.f32 %v9227_v17, %v224_v15  ;;  %v318_v33 = vmul.f32 %v8638_v18, %v9181_v40  ;;  %v9343_v15 = vld [vmem:[#allocation8 + $0x10] sm:$0xff] }
 0x1a8   :  { %v225_v25 = vmul.f32 %v9215_v2, %v217_v14  ;;  %v462_v27 = vpack.c.bf16 %v341_v32, %v340_v20  ;;  %v9347_v20 = vld [vmem:[#allocation8 + $0x18] sm:$0xff] }
 0x1a9   :  { %v8640_v19 = vpop.eup %8639  ;;  %v330_v31 = vmul.f32 %v9203_v48, %v318_v33 }
 0x1aa   :  { %v233_v22 = vadd.f32 %v9227_v17, %v225_v25  ;;  %v319_v24 = vmul.f32 %v8640_v19, %v9183_v41 }
 0x1ab   :  { %v342_v37 = vadd.f32 %v337_v58, %v330_v31 }
 0x1ac   :  { %v347_v26 = vpack.c.bf16 %v233_v22, %v232_v21  ;;  %v331_v28 = vmul.f32 %v9203_v48, %v319_v24 }
 0x1ad   :  { %v8642_v30 = vpop.eup %8641 }
 0x1ae   :  { %8007 = vmatmul.mubr.bf16.vlgmr.msra.gmra.mxu0 %v347_v26  ;;  %604 = vmatmul.mubr.bf16.gmra.mxu1 %v462_v27  ;;  %v8644_v34 = vpop.eup %8643  ;;  %v343_v35 = vadd.f32 %v337_v58, %v331_v28  ;;  %v321_v36 = vmul.f32 %v8642_v30, %v9191_v51 }
 0x1af   :  { %613 = vmatprep.mubr.bf16.mxu1 %v10505_v8  ;;  %v320_v40 = vmul.f32 %v8644_v34, %v9189_v50  ;;  %8014 = vmatprep.mubr.msk.f32.mxu0 %vm9043_vm0, %v10507_v46 }
 0x1b0   :  { %v463_v39 = vpack.c.bf16 %v343_v35, %v342_v37  ;;  %v333_v41 = vmul.f32 %v9203_v48, %v321_v36 }
 0x1b1   :  { %v332_v42 = vmul.f32 %v9203_v48, %v320_v40 }
 0x1b2   :  { %v345_v43 = vadd.f32 %v337_v58, %v333_v41 }
 0x1b3   :  { %v344_v44 = vadd.f32 %v337_v58, %v332_v42 }
 0x1b5   :  { %v464_v45 = vpack.c.bf16 %v345_v43, %v344_v44 }
 0x1b6   :  { %614 = vmatmul.mubr.bf16.gmra.mxu1 %v463_v39 }
 0x1b7   :  { %623 = vmatprep.mubr.bf16.mxu1 %v10505_v8 }
 0x1be   :  { %624 = vmatmul.mubr.bf16.gmra.mxu1 %v464_v45 }
 0x1bf   :  { %8056 = vmatprep.mubr.msk.f32.mxu1 %vm9043_vm0, %v10507_v46 }
 0x266   :  { %v9249_v50 = vpop.f32.mrf.mxu1 }
 0x268   :  { %v9251_v51 = vpop.f32.mrf.mxu1 }
 0x26a   :  { %v9253_v47 = vpop.f32.mrf.mxu1 }
 0x26b   :  { %8011 = vmatpush3.xpose.msk.msra.mxu0 %vm638_vm1, %v9253_v47 }
 0x26c   :  { %v9257_v48 = vpop.f32.mrf.mxu1  ;;  %8012 = vmatprep.subr.mxu0 %v10507_v46 }
 0x26e   :  { %v9260_v52 = vpop.f32.mrf.mxu0  ;;  %v9262_v53 = vpop.f32.mrf.mxu1 }
 0x26f   :  { %8013 = vmatpush3.xpose.msk.msra.mxu0 %vm638_vm1, %v9249_v50 }
 0x270   :  { %v9266_v54 = vpop.f32.mrf.mxu0  ;;  %v9268_v55 = vpop.f32.mrf.mxu1  ;;  %8017 = vmatprep.subr.mxu0 %v10507_v46 }
 0x272   :  { %v9271_v56 = vpop.f32.mrf.mxu1  ;;  %8015 = vmatmul.mubr.msk.f32.vlgmr.msra.gmra.mxu0 %vm638_vm1, %v9266_v54  ;;  %v9282_v58 = vpop.f32.mrf.mxu0 }
 0x273   :  { %8018 = vmatpush3.xpose.msk.msra.mxu0 %vm638_vm1, %v9271_v56  ;;  %8021 = vmatprep.mubr.msk.f32.mxu0 %vm9043_vm0, %v10507_v46 }
 0x274   :  { %v9279_v57 = vpop.f32.mrf.mxu1  ;;  %8019 = vmatprep.subr.mxu0 %v10507_v46  ;;  %v9291_v62 = vpop.f32.mrf.mxu0 }
 0x276   :  { %v9284_v60 = vpop.f32.mrf.mxu1 }
 0x277   :  { %8020 = vmatpush3.xpose.msk.msra.mxu0 %vm638_vm1, %v9262_v53 }
 0x278   :  { %v9288_v61 = vpop.f32.mrf.mxu1  ;;  %8024 = vmatprep.subr.mxu0 %v10507_v46 }
 0x27a   :  { %v9293_v63 = vpop.f32.mrf.mxu1  ;;  %8022 = vmatmul.mubr.msk.f32.vlgmr.msra.gmra.mxu0 %vm638_vm1, %v9291_v62 }
 0x27b   :  { %8025 = vmatpush3.xpose.msk.msra.mxu0 %vm638_vm1, %v9293_v63  ;;  %8028 = vmatprep.mubr.msk.f32.mxu0 %vm9043_vm0, %v10507_v46 }
 0x27c   :  { %v9301_v0 = vpop.f32.mrf.mxu1  ;;  %8026 = vmatprep.subr.mxu0 %v10507_v46 }
 0x27d   :  { %8053 = vmatpush3.msra.mxu1 %v9301_v0 }
 0x27e   :  { %v9305_v1 = vpop.f32.mrf.mxu1  ;;  %8054 = vmatprep.subr.mxu1 %v10507_v46 }
 0x27f   :  { %8027 = vmatpush3.xpose.msk.msra.mxu0 %vm638_vm1, %v9284_v60  ;;  %8055 = vmatpush3.msra.mxu1 %v9288_v61 }
 0x280   :  { %v9311_v16 = vpop.f32.mrf.mxu1  ;;  %8031 = vmatprep.subr.mxu0 %v10507_v46  ;;  %8080 = vmatprep.subr.mxu1 %v10507_v46 }
 0x282   :  { %v9315_v4 = vpop.f32.mrf.mxu1  ;;  %8029 = vmatmul.mubr.msk.f32.vlgmr.msra.gmra.mxu0 %vm638_vm1, %v9260_v52 }
 0x283   :  { %8032 = vmatpush3.xpose.msk.msra.mxu0 %vm638_vm1, %v9315_v4  ;;  %8035 = vmatprep.mubr.msk.f32.mxu0 %vm9043_vm0, %v10507_v46 }
 0x284   :  { %8033 = vmatprep.subr.mxu0 %v10507_v46 }
 0x287   :  { %8034 = vmatpush3.xpose.msk.msra.mxu0 %vm638_vm1, %v9305_v1 }
 0x288   :  { %8038 = vmatprep.subr.mxu0 %v10507_v46 }
 0x28a   :  { %8036 = vmatmul.mubr.msk.f32.vlgmr.msra.gmra.mxu0 %vm638_vm1, %v9282_v58 }
 0x28b   :  { %8039 = vmatpush3.msra.mxu0 %v9257_v48  ;;  %8042 = vmatprep.mubr.msk.f32.mxu0 %vm9043_vm0, %v10507_v46 }
 0x28c   :  { %8040 = vmatprep.subr.mxu0 %v10507_v46 }
 0x28d   :  { %8041 = vmatpush3.msra.mxu0 %v9251_v51 }
 0x28e   :  { %8045 = vmatprep.subr.mxu0 %v10507_v46 }
 0x332   :  { %v714_v6 = vpop.f32.mrf.mxu0 }
 0x333   :  { %v715_v7 = vadd.f32 %v714_v6, %v9335_v5 }
 0x334   :  { %v8016_v23 = vpop.f32.mrf.mxu0 }
 0x335   :  { %v955_v9 = vsel %vm638_vm1, %v715_v7, -inf }
 0x336   :  { %956 = vmax.xlane.f32.xlu0 %v955_v9 }
 0x33a   :  { %v793_v11 = vpop.f32.mrf.mxu0 }
 0x33b   :  { %v794_v12 = vadd.f32 %v793_v11, %v9339_v10 }
 0x33c   :  { %v8023_v13 = vpop.f32.mrf.mxu0 }
 0x33d   :  { %v958_v14 = vsel %vm638_vm1, %v794_v12, -inf }
 0x33e   :  { %959 = vmax.xlane.f32.xlu1 %v958_v14 }
 0x342   :  { %v872_v18 = vpop.f32.mrf.mxu0 }
 0x343   :  { %v873_v25 = vadd.f32 %v872_v18, %v9343_v15 }
 0x344   :  { %v8030_v32 = vpop.f32.mrf.mxu0 }
 0x345   :  { %v961_v19 = vsel %vm638_vm1, %v873_v25, -inf }
 0x346   :  { %962 = vmax.xlane.f32.xlu1 %v961_v19 }
 0x34a   :  { %v951_v21 = vpop.f32.mrf.mxu0 }
 0x34b   :  { %v952_v22 = vadd.f32 %v951_v21, %v9347_v20  ;;  %v9387_v21 = vpop.f32.mrf.mxu1 }
 0x34c   :  { %v8037_v33 = vpop.f32.mrf.mxu0 }
 0x34d   :  { %v964_v24 = vsel %vm638_vm1, %v952_v22, -inf }
 0x34e   :  { %965 = vmax.xlane.f32.xlu0 %v964_v24 }
 0x3bf   :  { %v957_v26 = vpop.xlane.xlu0 %956 }
 0x3c0   :  { %v967_v27 = vsub.f32 %v715_v7, %v957_v26 }
 0x3c2   :  { %v971_v28 = vmul.f32 1.442695, %v967_v27 }
 0x3c4   :  { %8645 = vpow2.f32 %v971_v28 }
 0x3c7   :  { %v960_v30 = vpop.xlane.xlu1 %959 }
 0x3c8   :  { %v968_v31 = vsub.f32 %v794_v12, %v960_v30 }
 0x3ca   :  { %v973_v34 = vmul.f32 1.442695, %v968_v31 }
 0x3cc   :  { %8647 = vpow2.f32 %v973_v34 }
 0x3cf   :  { %v963_v35 = vpop.xlane.xlu1 %962 }
 0x3d0   :  { %v969_v36 = vsub.f32 %v873_v25, %v963_v35 }
 0x3d1   :  { %v8646_v37 = vpop.eup %8645 }
 0x3d2   :  { %v975_v40 = vmul.f32 1.442695, %v969_v36  ;;  %v979_v39 = vsel %vm638_vm1, %v8646_v37, 0.0 }
 0x3d3   :  { %980 = vadd.xlane.f32.xlu0 %v979_v39 }
 0x3d4   :  { %8649 = vpow2.f32 %v975_v40 }
 0x3d7   :  { %v966_v41 = vpop.xlane.xlu0 %965 }
 0x3d8   :  { %v970_v42 = vsub.f32 %v952_v22, %v966_v41 }
 0x3d9   :  { %v8648_v43 = vpop.eup %8647 }
 0x3da   :  { %v977_v44 = vmul.f32 1.442695, %v970_v42  ;;  %v982_v45 = vsel %vm638_vm1, %v8648_v43, 0.0 }
 0x3db   :  { %983 = vadd.xlane.f32.xlu1 %v982_v45 }
 0x3dc   :  { %8651 = vpow2.f32 %v977_v44 }
 0x3e1   :  { %v8650_v6 = vpop.eup %8649 }
 0x3e2   :  { %v985_v7 = vsel %vm638_vm1, %v8650_v6, 0.0 }
 0x3e3   :  { %986 = vadd.xlane.f32.xlu1 %v985_v7 }
 0x3e9   :  { %v8652_v23 = vpop.eup %8651 }
 0x3ea   :  { %v988_v9 = vsel %vm638_vm1, %v8652_v23, 0.0 }
 0x3eb   :  { %989 = vadd.xlane.f32.xlu0 %v988_v9 }
 0x3f4   :  { %1318 = vrot.lane.b32.xlu1 %v9249_v50, %s9044_s6 }
 0x3f8   :  { %1316 = vrot.lane.b32.xlu1 %v9266_v54, %s9044_s6 }
 0x3fc   :  { %1402 = vrot.lane.b32.xlu1 %v9271_v56, %s9044_s6 }
 0x400   :  { %1398 = vrot.lane.b32.xlu1 %v9291_v62, %s9044_s6 }
 0x401   :  { %1320 = vrot.lane.b32.xlu0 %v9253_v47, %s9044_s6 }
 0x404   :  { %1566 = vrot.lane.b32.xlu1 %v9315_v4, %s9044_s6 }
 0x405   :  { %1400 = vrot.lane.b32.xlu0 %v9262_v53, %s9044_s6 }
 0x408   :  { %1564 = vrot.lane.b32.xlu1 %v9305_v1, %s9044_s6 }
 0x409   :  { %1484 = vrot.lane.b32.xlu0 %v9293_v63, %s9044_s6 }
 0x40c   :  { %1562 = vrot.lane.b32.xlu1 %v9282_v58, %s9044_s6 }
 0x40d   :  { %1482 = vrot.lane.b32.xlu0 %v9284_v60, %s9044_s6 }
 0x411   :  { %1480 = vrot.lane.b32.xlu0 %v9260_v52, %s9044_s6 }
 0x45c   :  { %v981_v11 = vpop.xlane.xlu0 %980 }
 0x45d   :  { %8653 = vrcp.f32 %v981_v11 }
 0x464   :  { %v984_v12 = vpop.xlane.xlu1 %983 }
 0x465   :  { %8655 = vrcp.f32 %v984_v12 }
 0x46a   :  { %v8654_v13 = vpop.eup %8653 }
 0x46b   :  { %v992_v14 = vmul.f32 %v8654_v13, %v8646_v37 }
 0x46c   :  { %v987_v18 = vpop.xlane.xlu1 %986 }
 0x46d   :  { %8657 = vrcp.f32 %v987_v18  ;;  %8043 = vmatmul.mubr.msk.f32.vlgmr.msra.gmra.mxu0 %vm638_vm1, %v992_v14  ;;  %999 = vst.msk [vmem:[#allocation19] sm:$0xff] %vm638_vm1, %v992_v14 }
 0x46e   :  { %8046 = vmatpush3.msra.mxu0 %v9279_v57  ;;  %8049 = vmatprep.mubr.msk.f32.mxu0 %vm9043_vm0, %v10507_v46 }
 0x46f   :  { %8047 = vmatprep.subr.mxu0 %v10507_v46 }
 0x470   :  { %8048 = vmatpush3.msra.mxu0 %v9268_v55  ;;  %v1319_v22 = vpop.permute.xlu1 %1318 }
 0x471   :  { %8059 = vmatprep.subr.mxu0 %v10507_v46 }
 0x472   :  { %v8656_v25 = vpop.eup %8655 }
 0x473   :  { %v994_v32 = vmul.f32 %v8656_v25, %v8648_v43 }
 0x474   :  { %v990_v19 = vpop.xlane.xlu0 %989  ;;  %v1317_v28 = vpop.permute.xlu1 %1316 }
 0x475   :  { %8659 = vrcp.f32 %v990_v19  ;;  %8050 = vmatmul.mubr.msk.f32.vlgmr.msra.gmra.mxu0 %vm638_vm1, %v994_v32  ;;  %1000 = vst.msk [vmem:[#allocation19 + $0x8] sm:$0xff] %vm638_vm1, %v994_v32 }
 0x476   :  { %8060 = vmatpush3.msra.mxu0 %v9387_v21  ;;  %8063 = vmatprep.mubr.msk.f32.mxu0 %vm9043_vm0, %v10507_v46 }
 0x477   :  { %8061 = vmatprep.subr.mxu0 %v10507_v46 }
 0x478   :  { %8062 = vmatpush3.msra.mxu0 %v9311_v16  ;;  %v1321_v33 = vpop.permute.xlu0 %1320  ;;  %v1403_v35 = vpop.permute.xlu1 %1402 }
 0x479   :  { %8066 = vmatprep.subr.mxu0 %v10507_v46 }
 0x47a   :  { %v8658_v24 = vpop.eup %8657 }
 0x47b   :  { %v996_v26 = vmul.f32 %v8658_v24, %v8650_v6 }
 0x47c   :  { %v1401_v27 = vpop.permute.xlu0 %1400  ;;  %v1399_v40 = vpop.permute.xlu1 %1398 }
 0x47d   :  { %1001 = vst.msk [vmem:[#allocation19 + $0x10] sm:$0xff] %vm638_vm1, %v996_v26  ;;  %8057 = vmatmul.mubr.msk.f32.vlgmr.msra.gmra.mxu1 %vm638_vm1, %v996_v26 }
 0x47e   :  { %8084 = vmatprep.mubr.msk.f32.mxu1 %vm9043_vm0, %v10507_v46 }
 0x480   :  { %v1485_v30 = vpop.permute.xlu0 %1484  ;;  %v1567_v39 = vpop.permute.xlu1 %1566 }
 0x481   :  { %8081 = vmatpush3.xpose.msk.msra.mxu1 %vm638_vm1, %v1485_v30 }
 0x482   :  { %v8660_v31 = vpop.eup %8659  ;;  %8082 = vmatprep.subr.mxu1 %v10507_v46 }
 0x483   :  { %v998_v34 = vmul.f32 %v8660_v31, %v8652_v23 }
 0x484   :  { %v1483_v36 = vpop.permute.xlu0 %1482  ;;  %v1565_v41 = vpop.permute.xlu1 %1564 }
 0x485   :  { %8064 = vmatmul.mubr.msk.f32.vlgmr.msra.gmra.mxu0 %vm638_vm1, %v998_v34  ;;  %1002 = vst.msk [vmem:[#allocation19 + $0x18] sm:$0xff] %vm638_vm1, %v998_v34  ;;  %8083 = vmatpush3.xpose.msk.msra.mxu1 %vm638_vm1, %v1483_v36 }
 0x486   :  { %8067 = vmatpush3.xpose.msk.msra.mxu0 %vm638_vm1, %v1321_v33  ;;  %8070 = vmatprep.mubr.msk.f32.mxu0 %vm9043_vm0, %v10507_v46 }
 0x487   :  { %8068 = vmatprep.subr.mxu0 %v10507_v46  ;;  %8094 = vmatprep.subr.mxu1 %v10507_v46 }
 0x488   :  { %v1481_v37 = vpop.permute.xlu0 %1480  ;;  %v1563_v42 = vpop.permute.xlu1 %1562 }
 0x489   :  { %8085 = vmatmul.mubr.msk.f32.vlgmr.msra.gmra.mxu1 %vm638_vm1, %v1481_v37 }
 0x48a   :  { %8069 = vmatpush3.xpose.msk.msra.mxu0 %vm638_vm1, %v1319_v22  ;;  %8098 = vmatprep.mubr.msk.f32.mxu1 %vm9043_vm0, %v10507_v46 }
 0x48b   :  { %8073 = vmatprep.subr.mxu0 %v10507_v46 }
 0x48d   :  { %8071 = vmatmul.mubr.msk.f32.vlgmr.msra.gmra.mxu0 %vm638_vm1, %v1317_v28 }
 0x48e   :  { %8074 = vmatpush3.xpose.msk.msra.mxu0 %vm638_vm1, %v1403_v35  ;;  %8077 = vmatprep.mubr.msk.f32.mxu0 %vm9043_vm0, %v10507_v46 }
 0x48f   :  { %8075 = vmatprep.subr.mxu0 %v10507_v46 }
 0x492   :  { %8076 = vmatpush3.xpose.msk.msra.mxu0 %vm638_vm1, %v1401_v27 }
 0x493   :  { %8087 = vmatprep.subr.mxu0 %v10507_v46 }
 0x495   :  { %8078 = vmatmul.mubr.msk.f32.vlgmr.msra.gmra.mxu0 %vm638_vm1, %v1399_v40 }
 0x496   :  { %8088 = vmatpush3.xpose.msk.msra.mxu0 %vm638_vm1, %v1567_v39  ;;  %8091 = vmatprep.mubr.msk.f32.mxu0 %vm9043_vm0, %v10507_v46 }
 0x497   :  { %8089 = vmatprep.subr.mxu0 %v10507_v46 }
 0x49a   :  { %8090 = vmatpush3.xpose.msk.msra.mxu0 %vm638_vm1, %v1565_v41 }
 0x49b   :  { %8101 = vmatprep.subr.mxu0 %v10507_v46 }
 0x49d   :  { %8092 = vmatmul.mubr.msk.f32.vlgmr.msra.gmra.mxu0 %vm638_vm1, %v1563_v42 }
 0x49e   :  { %8105 = vmatprep.mubr.msk.f32.mxu0 %vm9043_vm0, %v10507_v46 }
 0x52d   :  { %v1072_v43 = vpop.f32.mrf.mxu0 }
 0x52e   :  { %v7690_v44 = vpack.c.bf16 %v1072_v43, %v1072_v43 }
 0x52f   :  { %v8044_v45 = vpop.f32.mrf.mxu0 }
 0x530   :  { %1312 = vst.msk [vmem:[#allocation2] sm:$0xf] %vm1311_vm2, %v7690_v44 }
 0x535   :  { %v1145_v6 = vpop.f32.mrf.mxu0 }
 0x536   :  { %v7691_v7 = vpack.c.bf16 %v1145_v6, %v1145_v6 }
 0x537   :  { %v8051_v23 = vpop.f32.mrf.mxu0 }
 0x538   :  { %1313 = vst.msk [vmem:[#allocation2 + $0x4] sm:$0xf] %vm1311_vm2, %v7691_v7 }
 0x53d   :  { %v1218_v9 = vpop.f32.mrf.mxu1 }
 0x53e   :  { %v7692_v11 = vpack.c.bf16 %v1218_v9, %v1218_v9 }
 0x53f   :  { %v8058_v12 = vpop.f32.mrf.mxu1 }
 0x540   :  { %1314 = vst.msk [vmem:[#allocation2 + $0x8] sm:$0xf] %vm1311_vm2, %v7692_v11 }
 0x545   :  { %v1291_v13 = vpop.f32.mrf.mxu0 }
 0x546   :  { %v7693_v14 = vpack.c.bf16 %v1291_v13, %v1291_v13 }
 0x547   :  { %v8065_v18 = vpop.f32.mrf.mxu0 }
 0x548   :  { %1315 = vst.msk [vmem:[#allocation2 + $0xc] sm:$0xf] %vm1311_vm2, %v7693_v14 }
 0x549   :  { %v1558_v25 = vpop.f32.mrf.mxu1 }
 0x54a   :  { %v1559_v24 = vadd.f32 %v1558_v25, %v9343_v15 }
 0x54b   :  { %v8086_v32 = vpop.f32.mrf.mxu1 }
 0x54c   :  { %v1650_v27 = vsel %vm638_vm1, %v1559_v24, -inf }
 0x54d   :  { %v1394_v19 = vpop.f32.mrf.mxu0 }
 0x54e   :  { %v1395_v22 = vadd.f32 %v1394_v19, %v9335_v5 }
 0x54f   :  { %v8072_v33 = vpop.f32.mrf.mxu0 }
 0x550   :  { %v1644_v26 = vsel %vm638_vm1, %v1395_v22, -inf }
 0x551   :  { %1645 = vmax.xlane.f32.xlu0 %v1644_v26 }
 0x555   :  { %v1476_v28 = vpop.f32.mrf.mxu0  ;;  %1651 = vmax.xlane.f32.xlu0 %v1650_v27 }
 0x556   :  { %v1477_v30 = vadd.f32 %v1476_v28, %v9339_v10 }
 0x557   :  { %v8079_v31 = vpop.f32.mrf.mxu0 }
 0x558   :  { %v1647_v34 = vsel %vm638_vm1, %v1477_v30, -inf }
 0x559   :  { %1648 = vmax.xlane.f32.xlu1 %v1647_v34 }
 0x55d   :  { %v1640_v35 = vpop.f32.mrf.mxu0 }
 0x55e   :  { %v1641_v36 = vadd.f32 %v1640_v35, %v9347_v20 }
 0x55f   :  { %v8093_v37 = vpop.f32.mrf.mxu0 }
 0x560   :  { %v1653_v40 = vsel %vm638_vm1, %v1641_v36, -inf }
 0x561   :  { %1654 = vmax.xlane.f32.xlu0 %v1653_v40 }
 0x56a   :  { %1793 = vrot.lane.b32.xlu1 %v9279_v57, %s9044_s6 }
 0x56e   :  { %1711 = vrot.lane.b32.xlu1 %v9251_v51, %s9044_s6 }
 0x572   :  { %1791 = vrot.lane.b32.xlu1 %v9268_v55, %s9044_s6 }
 0x576   :  { %1953 = vrot.lane.b32.xlu1 %v9387_v21, %s9044_s6 }
 0x577   :  { %1713 = vrot.lane.b32.xlu0 %v9257_v48, %s9044_s6 }
 0x57a   :  { %1951 = vrot.lane.b32.xlu1 %v9311_v16, %s9044_s6 }
 0x57b   :  { %1873 = vrot.lane.b32.xlu0 %v9301_v0, %s9044_s6 }
 0x57e   :  { %2144 = vrot.lane.b32.xlu1 %v9271_v56, %s9045_s9 }
 0x57f   :  { %1871 = vrot.lane.b32.xlu0 %v9288_v61, %s9044_s6 }
 0x582   :  { %2142 = vrot.lane.b32.xlu1 %v9262_v53, %s9045_s9 }
 0x583   :  { %2062 = vrot.lane.b32.xlu0 %v9253_v47, %s9045_s9 }
 0x586   :  { %2140 = vrot.lane.b32.xlu1 %v9291_v62, %s9045_s9 }
 0x5da   :  { %v1646_v39 = vpop.xlane.xlu0 %1645 }
 0x5db   :  { %v1656_v41 = vsub.f32 %v1395_v22, %v1646_v39 }
 0x5dd   :  { %v1660_v44 = vmul.f32 1.442695, %v1656_v41 }
 0x5de   :  { %v1652_v42 = vpop.xlane.xlu0 %1651 }
 0x5df   :  { %v1658_v43 = vsub.f32 %v1559_v24, %v1652_v42 }
 0x5e1   :  { %v1664_v45 = vmul.f32 1.442695, %v1658_v43 }
 0x5e2   :  { %v1649_v6 = vpop.xlane.xlu1 %1648 }
 0x5e3   :  { %8661 = vpow2.f32 %v1664_v45  ;;  %v1657_v7 = vsub.f32 %v1477_v30, %v1649_v6 }
 0x5e4   :  { %8663 = vpow2.f32 %v1660_v44 }
 0x5e5   :  { %v1662_v23 = vmul.f32 1.442695, %v1657_v7 }
 0x5e6   :  { %v1794_v9 = vpop.permute.xlu1 %1793 }
 0x5e7   :  { %8665 = vpow2.f32 %v1662_v23  ;;  %8102 = vmatpush3.msra.mxu0 %v1794_v9 }
 0x5e8   :  { %8103 = vmatprep.subr.mxu0 %v10507_v46 }
 0x5ea   :  { %v1712_v11 = vpop.permute.xlu1 %1711  ;;  %v1655_v12 = vpop.xlane.xlu0 %1654 }
 0x5eb   :  { %v1659_v13 = vsub.f32 %v1641_v36, %v1655_v12 }
 0x5ed   :  { %v1666_v14 = vmul.f32 1.442695, %v1659_v13 }
 0x5ee   :  { %v1792_v18 = vpop.permute.xlu1 %1791  ;;  %v1714_v25 = vpop.permute.xlu0 %1713 }
 0x5ef   :  { %8667 = vpow2.f32 %v1666_v14  ;;  %8095 = vmatpush3.msra.mxu1 %v1714_v25  ;;  %8104 = vmatpush3.msra.mxu0 %v1792_v18 }
 0x5f0   :  { %v8662_v32 = vpop.eup %8661  ;;  %8096 = vmatprep.subr.mxu1 %v10507_v46  ;;  %8115 = vmatprep.subr.mxu0 %v10507_v46 }
 0x5f1   :  { %8097 = vmatpush3.msra.mxu1 %v1712_v11  ;;  %v1674_v19 = vsel %vm638_vm1, %v8662_v32, 0.0  ;;  %v8664_v22 = vpop.eup %8663 }
 0x5f2   :  { %1675 = vadd.xlane.f32.xlu0 %v1674_v19  ;;  %8108 = vmatprep.subr.mxu1 %v10507_v46  ;;  %v1668_v26 = vsel %vm638_vm1, %v8664_v22, 0.0  ;;  %v1954_v30 = vpop.permute.xlu1 %1953  ;;  %v1874_v34 = vpop.permute.xlu0 %1873 }
 0x5f4   :  { %v8666_v33 = vpop.eup %8665 }
 0x5f5   :  { %v1671_v24 = vsel %vm638_vm1, %v8666_v33, 0.0 }
 0x5f6   :  { %1672 = vadd.xlane.f32.xlu1 %v1671_v24  ;;  %1669 = vadd.xlane.f32.xlu0 %v1668_v26  ;;  %v1952_v31 = vpop.permute.xlu1 %1951  ;;  %v1872_v36 = vpop.permute.xlu0 %1871 }
 0x5fa   :  { %v2145_v35 = vpop.permute.xlu1 %2144  ;;  %v2063_v40 = vpop.permute.xlu0 %2062 }
 0x5fc   :  { %v8668_v27 = vpop.eup %8667 }
 0x5fd   :  { %v1677_v28 = vsel %vm638_vm1, %v8668_v27, 0.0 }
 0x5fe   :  { %1678 = vadd.xlane.f32.xlu1 %v1677_v28  ;;  %v2143_v37 = vpop.permute.xlu1 %2142 }
 0x602   :  { %v2141_v39 = vpop.permute.xlu1 %2140 }
 0x60c   :  { %2060 = vrot.lane.b32.xlu0 %v9249_v50, %s9045_s9 }
 0x60f   :  { %2308 = vrot.lane.b32.xlu1 %v9315_v4, %s9045_s9 }
 0x610   :  { %2058 = vrot.lane.b32.xlu0 %v9266_v54, %s9045_s9 }
 0x613   :  { %2306 = vrot.lane.b32.xlu1 %v9305_v1, %s9045_s9 }
 0x614   :  { %2226 = vrot.lane.b32.xlu0 %v9293_v63, %s9045_s9 }
 0x617   :  { %2304 = vrot.lane.b32.xlu1 %v9282_v58, %s9045_s9 }
 0x618   :  { %2224 = vrot.lane.b32.xlu0 %v9284_v60, %s9045_s9 }
 0x61c   :  { %2222 = vrot.lane.b32.xlu0 %v9260_v52, %s9045_s9 }
 0x67b   :  { %v1676_v41 = vpop.xlane.xlu0 %1675 }
 0x67f   :  { %v1673_v42 = vpop.xlane.xlu1 %1672  ;;  %v1670_v43 = vpop.xlane.xlu0 %1669 }
 0x680   :  { %8669 = vrcp.f32 %v1673_v42 }
 0x681   :  { %8671 = vrcp.f32 %v1670_v43 }
 0x682   :  { %8673 = vrcp.f32 %v1676_v41 }
 0x683   :  { %v2061_v45 = vpop.permute.xlu0 %2060 }
 0x687   :  { %v1679_v44 = vpop.xlane.xlu1 %1678  ;;  %v2059_v12 = vpop.permute.xlu0 %2058 }
 0x688   :  { %8675 = vrcp.f32 %v1679_v44 }
 0x68b   :  { %v2227_v25 = vpop.permute.xlu0 %2226 }
 0x68d   :  { %v8670_v6 = vpop.eup %8669 }
 0x68e   :  { %v8672_v7 = vpop.eup %8671  ;;  %v9489_v23 = vmul.f32 %v8670_v6, %v8666_v33 }
 0x68f   :  { %v9491_v9 = vmul.f32 %v8672_v7, %v8664_v22  ;;  %v8674_v11 = vpop.eup %8673  ;;  %v2225_v19 = vpop.permute.xlu0 %2224 }
 0x690   :  { %8106 = vmatmul.mubr.msk.f32.vlgmr.msra.gmra.mxu0 %vm638_vm1, %v9489_v23  ;;  %v9499_v13 = vmul.f32 %v8674_v11, %v8662_v32  ;;  %v2309_v32 = vpop.permute.xlu1 %2308 }
 0x691   :  { %10529 = vst [vmem:[#allocation29_spill] sm:$0xff] %v9491_v9  ;;  %8099 = vmatmul.mubr.msk.f32.vlgmr.msra.gmra.mxu1 %vm638_vm1, %v9491_v9  ;;  %8116 = vmatpush3.msra.mxu0 %v1954_v30 }
 0x692   :  { %8109 = vmatpush3.msra.mxu1 %v1874_v34  ;;  %8117 = vmatprep.subr.mxu0 %v10507_v46  ;;  %10530 = vst [vmem:[#allocation30_spill] sm:$0xff] %v9499_v13 }
 0x693   :  { %8110 = vmatprep.subr.mxu1 %v10507_v46  ;;  %8118 = vmatpush3.msra.mxu0 %v1952_v31  ;;  %v2223_v33 = vpop.permute.xlu0 %2222 }
 0x694   :  { %8111 = vmatpush3.msra.mxu1 %v1872_v36  ;;  %8112 = vmatprep.mubr.msk.f32.mxu1 %vm9043_vm0, %v10507_v46  ;;  %v2307_v22 = vpop.permute.xlu1 %2306 }
 0x695   :  { %v8676_v14 = vpop.eup %8675  ;;  %8122 = vmatprep.subr.mxu1 %v10507_v46  ;;  %8113 = vmatmul.mubr.msk.f32.vlgmr.msra.gmra.mxu1 %vm638_vm1, %v9499_v13 }
 0x696   :  { %8123 = vmatpush3.xpose.msk.msra.mxu1 %vm638_vm1, %v2063_v40  ;;  %8119 = vmatprep.mubr.msk.f32.mxu0 %vm9043_vm0, %v10507_v46  ;;  %v9509_v18 = vmul.f32 %v8676_v14, %v8668_v27 }
 0x697   :  { %8124 = vmatprep.subr.mxu1 %v10507_v46  ;;  %8129 = vmatprep.subr.mxu0 %v10507_v46 }
 0x698   :  { %10531 = vst [vmem:[#allocation31_spill] sm:$0xff] %v9509_v18  ;;  %8120 = vmatmul.mubr.msk.f32.vlgmr.msra.gmra.mxu0 %vm638_vm1, %v9509_v18  ;;  %8126 = vmatprep.mubr.msk.f32.mxu1 %vm9043_vm0, %v10507_v46  ;;  %v2305_v24 = vpop.permute.xlu1 %2304 }
 0x699   :  { %8130 = vmatpush3.xpose.msk.msra.mxu0 %vm638_vm1, %v2145_v35  ;;  %8133 = vmatprep.mubr.msk.f32.mxu0 %vm9043_vm0, %v10507_v46 }
 0x69a   :  { %8125 = vmatpush3.xpose.msk.msra.mxu1 %vm638_vm1, %v2061_v45  ;;  %8131 = vmatprep.subr.mxu0 %v10507_v46 }
 0x69b   :  { %8136 = vmatprep.subr.mxu1 %v10507_v46 }
 0x69d   :  { %8127 = vmatmul.mubr.msk.f32.vlgmr.msra.gmra.mxu1 %vm638_vm1, %v2059_v12  ;;  %8132 = vmatpush3.xpose.msk.msra.mxu0 %vm638_vm1, %v2143_v37 }
 0x69e   :  { %8137 = vmatpush3.xpose.msk.msra.mxu1 %vm638_vm1, %v2227_v25  ;;  %8143 = vmatprep.subr.mxu0 %v10507_v46 }
 0x69f   :  { %8138 = vmatprep.subr.mxu1 %v10507_v46  ;;  %8140 = vmatprep.mubr.msk.f32.mxu1 %vm9043_vm0, %v10507_v46 }
 0x6a0   :  { %8134 = vmatmul.mubr.msk.f32.vlgmr.msra.gmra.mxu0 %vm638_vm1, %v2141_v39 }
 0x6a1   :  { %8144 = vmatpush3.xpose.msk.msra.mxu0 %vm638_vm1, %v2309_v32  ;;  %8147 = vmatprep.mubr.msk.f32.mxu0 %vm9043_vm0, %v10507_v46 }
 0x6a2   :  { %8139 = vmatpush3.xpose.msk.msra.mxu1 %vm638_vm1, %v2225_v19  ;;  %8145 = vmatprep.subr.mxu0 %v10507_v46 }
 0x6a3   :  { %8150 = vmatprep.subr.mxu1 %v10507_v46 }
 0x6a5   :  { %8141 = vmatmul.mubr.msk.f32.vlgmr.msra.gmra.mxu1 %vm638_vm1, %v2223_v33  ;;  %8146 = vmatpush3.xpose.msk.msra.mxu0 %vm638_vm1, %v2307_v22 }
 0x6a6   :  { %8157 = vmatprep.subr.mxu0 %v10507_v46  ;;  %8154 = vmatprep.mubr.msk.f32.mxu1 %vm9043_vm0, %v10507_v46 }
 0x6a8   :  { %8148 = vmatmul.mubr.msk.f32.vlgmr.msra.gmra.mxu0 %vm638_vm1, %v2305_v24 }
 0x6a9   :  { %8161 = vmatprep.mubr.msk.f32.mxu0 %vm9043_vm0, %v10507_v46 }
 0x750   :  { %v9545_v26 = vpop.f32.mrf.mxu0 }
 0x751   :  { %v9547_v27 = vpop.f32.mrf.mxu1 }
 0x752   :  { %v8107_v28 = vpop.f32.mrf.mxu0 }
 0x753   :  { %v8100_v30 = vpop.f32.mrf.mxu1 }
 0x755   :  { %v9549_v31 = vpop.f32.mrf.mxu1 }
 0x757   :  { %v8114_v34 = vpop.f32.mrf.mxu1 }
 0x758   :  { %v9551_v35 = vpop.f32.mrf.mxu0 }
 0x75a   :  { %v8121_v36 = vpop.f32.mrf.mxu0 }
 0x75d   :  { %v2136_v37 = vpop.f32.mrf.mxu1 }
 0x75e   :  { %v2137_v40 = vadd.f32 %v2136_v37, %v9335_v5 }
 0x75f   :  { %v8128_v39 = vpop.f32.mrf.mxu1 }
 0x760   :  { %v2218_v41 = vpop.f32.mrf.mxu0  ;;  %v2386_v42 = vsel %vm638_vm1, %v2137_v40, -inf }
 0x761   :  { %v2219_v43 = vadd.f32 %v2218_v41, %v9339_v10  ;;  %2387 = vmax.xlane.f32.xlu0 %v2386_v42 }
 0x762   :  { %v8135_v44 = vpop.f32.mrf.mxu0 }
 0x763   :  { %v2389_v45 = vsel %vm638_vm1, %v2219_v43, -inf }
 0x764   :  { %2390 = vmax.xlane.f32.xlu1 %v2389_v45 }
 0x765   :  { %v2300_v6 = vpop.f32.mrf.mxu1 }
 0x766   :  { %v2301_v7 = vadd.f32 %v2300_v6, %v9343_v15 }
 0x767   :  { %v8142_v11 = vpop.f32.mrf.mxu1 }
 0x768   :  { %v2382_v12 = vpop.f32.mrf.mxu0  ;;  %v2392_v14 = vsel %vm638_vm1, %v2301_v7, -inf }
 0x769   :  { %v2383_v25 = vadd.f32 %v2382_v12, %v9347_v20  ;;  %2393 = vmax.xlane.f32.xlu0 %v2392_v14 }
 0x76a   :  { %v8149_v32 = vpop.f32.mrf.mxu0 }
 0x76b   :  { %v2395_v19 = vsel %vm638_vm1, %v2383_v25, -inf }
 0x76d   :  { %2396 = vmax.xlane.f32.xlu0 %v2395_v19 }
 0x775   :  { %2531 = vrot.lane.b32.xlu1 %v9279_v57, %s9045_s9 }
 0x779   :  { %2451 = vrot.lane.b32.xlu1 %v9251_v51, %s9045_s9 }
 0x77d   :  { %2529 = vrot.lane.b32.xlu1 %v9268_v55, %s9045_s9 }
 0x781   :  { %2687 = vrot.lane.b32.xlu1 %v9387_v21, %s9045_s9 }
 0x783   :  { %2453 = vrot.lane.b32.xlu0 %v9257_v48, %s9045_s9 }
 0x785   :  { %2685 = vrot.lane.b32.xlu1 %v9311_v16, %s9045_s9 }
 0x787   :  { %2609 = vrot.lane.b32.xlu0 %v9301_v0, %s9045_s9 }
 0x789   :  { %2878 = vrot.lane.b32.xlu1 %v9271_v56, %s9046_s5 }
 0x78b   :  { %2607 = vrot.lane.b32.xlu0 %v9288_v61, %s9045_s9 }
 0x78d   :  { %2876 = vrot.lane.b32.xlu1 %v9262_v53, %s9046_s5 }
 0x78f   :  { %2796 = vrot.lane.b32.xlu0 %v9253_v47, %s9046_s5 }
 0x791   :  { %2874 = vrot.lane.b32.xlu1 %v9291_v62, %s9046_s5 }
 0x793   :  { %2794 = vrot.lane.b32.xlu0 %v9249_v50, %s9046_s5 }
 0x7ea   :  { %v2388_v22 = vpop.xlane.xlu0 %2387 }
 0x7eb   :  { %v2398_v33 = vsub.f32 %v2137_v40, %v2388_v22 }
 0x7ed   :  { %v2402_v24 = vmul.f32 1.442695, %v2398_v33  ;;  %v2391_v28 = vpop.xlane.xlu1 %2390 }
 0x7ee   :  { %v2399_v30 = vsub.f32 %v2219_v43, %v2391_v28 }
 0x7ef   :  { %8677 = vpow2.f32 %v2402_v24 }
 0x7f0   :  { %v2404_v34 = vmul.f32 1.442695, %v2399_v30 }
 0x7f1   :  { %v2532_v36 = vpop.permute.xlu1 %2531 }
 0x7f2   :  { %8679 = vpow2.f32 %v2404_v34  ;;  %v2394_v37 = vpop.xlane.xlu0 %2393  ;;  %8158 = vmatpush3.msra.mxu0 %v2532_v36 }
 0x7f3   :  { %v2400_v39 = vsub.f32 %v2301_v7, %v2394_v37  ;;  %8159 = vmatprep.subr.mxu0 %v10507_v46 }
 0x7f5   :  { %v2406_v41 = vmul.f32 1.442695, %v2400_v39  ;;  %v2452_v42 = vpop.permute.xlu1 %2451 }
 0x7f6   :  { %v2397_v44 = vpop.xlane.xlu0 %2396 }
 0x7f7   :  { %8681 = vpow2.f32 %v2406_v41  ;;  %v2401_v45 = vsub.f32 %v2383_v25, %v2397_v44 }
 0x7f9   :  { %v2408_v6 = vmul.f32 1.442695, %v2401_v45  ;;  %v2530_v11 = vpop.permute.xlu1 %2529 }
 0x7fa   :  { %v2454_v40 = vpop.permute.xlu0 %2453  ;;  %8160 = vmatpush3.msra.mxu0 %v2530_v11 }
 0x7fb   :  { %8683 = vpow2.f32 %v2408_v6  ;;  %8151 = vmatpush3.msra.mxu1 %v2454_v40  ;;  %8171 = vmatprep.subr.mxu0 %v10507_v46 }
 0x7fc   :  { %v8678_v43 = vpop.eup %8677  ;;  %8152 = vmatprep.subr.mxu1 %v10507_v46 }
 0x7fd   :  { %8153 = vmatpush3.msra.mxu1 %v2452_v42  ;;  %v2410_v7 = vsel %vm638_vm1, %v8678_v43, 0.0  ;;  %v2688_v33 = vpop.permute.xlu1 %2687 }
 0x7fe   :  { %2411 = vadd.xlane.f32.xlu0 %v2410_v7  ;;  %8164 = vmatprep.subr.mxu1 %v10507_v46  ;;  %v2610_v24 = vpop.permute.xlu0 %2609 }
 0x7ff   :  { %v8680_v12 = vpop.eup %8679 }
 0x800   :  { %v2413_v14 = vsel %vm638_vm1, %v8680_v12, 0.0 }
 0x801   :  { %2414 = vadd.xlane.f32.xlu1 %v2413_v14  ;;  %v2686_v28 = vpop.permute.xlu1 %2685 }
 0x802   :  { %v2608_v30 = vpop.permute.xlu0 %2607 }
 0x804   :  { %v8682_v25 = vpop.eup %8681 }
 0x805   :  { %v2416_v32 = vsel %vm638_vm1, %v8682_v25, 0.0  ;;  %v2879_v34 = vpop.permute.xlu1 %2878 }
 0x806   :  { %2417 = vadd.xlane.f32.xlu0 %v2416_v32  ;;  %v2797_v36 = vpop.permute.xlu0 %2796 }
 0x808   :  { %v8684_v19 = vpop.eup %8683 }
 0x809   :  { %v2419_v22 = vsel %vm638_vm1, %v8684_v19, 0.0  ;;  %v2877_v37 = vpop.permute.xlu1 %2876 }
 0x80a   :  { %2420 = vadd.xlane.f32.xlu1 %v2419_v22  ;;  %v2795_v39 = vpop.permute.xlu0 %2794 }
 0x80d   :  { %v2875_v41 = vpop.permute.xlu1 %2874 }
 0x81b   :  { %3042 = vrot.lane.b32.xlu1 %v9315_v4, %s9046_s5 }
 0x81c   :  { %2792 = vrot.lane.b32.xlu0 %v9266_v54, %s9046_s5 }
 0x81f   :  { %3040 = vrot.lane.b32.xlu1 %v9305_v1, %s9046_s5 }
 0x820   :  { %2960 = vrot.lane.b32.xlu0 %v9293_v63, %s9046_s5 }
 0x823   :  { %3038 = vrot.lane.b32.xlu1 %v9282_v58, %s9046_s5 }
 0x824   :  { %2958 = vrot.lane.b32.xlu0 %v9284_v60, %s9046_s5 }
 0x828   :  { %2956 = vrot.lane.b32.xlu0 %v9260_v52, %s9046_s5 }
 0x887   :  { %v2412_v42 = vpop.xlane.xlu0 %2411 }
 0x888   :  { %8685 = vrcp.f32 %v2412_v42 }
 0x88a   :  { %v2415_v44 = vpop.xlane.xlu1 %2414 }
 0x88b   :  { %8687 = vrcp.f32 %v2415_v44 }
 0x88f   :  { %v2418_v45 = vpop.xlane.xlu0 %2417 }
 0x890   :  { %8689 = vrcp.f32 %v2418_v45 }
 0x893   :  { %v2421_v6 = vpop.xlane.xlu1 %2420  ;;  %v2793_v32 = vpop.permute.xlu0 %2792 }
 0x894   :  { %8691 = vrcp.f32 %v2421_v6 }
 0x895   :  { %v8686_v11 = vpop.eup %8685 }
 0x896   :  { %v9609_v40 = vmul.f32 %v8686_v11, %v8678_v43 }
 0x898   :  { %10532 = vst [vmem:[#allocation32_spill] sm:$0xff] %v9609_v40  ;;  %v8688_v7 = vpop.eup %8687  ;;  %8155 = vmatmul.mubr.msk.f32.vlgmr.msra.gmra.mxu1 %vm638_vm1, %v9609_v40 }
 0x899   :  { %8165 = vmatpush3.msra.mxu1 %v2610_v24  ;;  %v9613_v14 = vmul.f32 %v8688_v7, %v8680_v12  ;;  %8168 = vmatprep.mubr.msk.f32.mxu1 %vm9043_vm0, %v10507_v46  ;;  %v2961_v24 = vpop.permute.xlu0 %2960 }
 0x89a   :  { %8166 = vmatprep.subr.mxu1 %v10507_v46 }
 0x89b   :  { %10533 = vst [vmem:[#allocation33_spill] sm:$0xff] %v9613_v14  ;;  %8167 = vmatpush3.msra.mxu1 %v2608_v30  ;;  %8162 = vmatmul.mubr.msk.f32.vlgmr.msra.gmra.mxu0 %vm638_vm1, %v9613_v14 }
 0x89c   :  { %8172 = vmatpush3.msra.mxu0 %v2688_v33  ;;  %8178 = vmatprep.subr.mxu1 %v10507_v46 }
 0x89d   :  { %v8690_v43 = vpop.eup %8689  ;;  %8173 = vmatprep.subr.mxu0 %v10507_v46  ;;  %8175 = vmatprep.mubr.msk.f32.mxu0 %vm9043_vm0, %v10507_v46 }
 0x89e   :  { %8174 = vmatpush3.msra.mxu0 %v2686_v28  ;;  %v9624_v12 = vmul.f32 %v8690_v43, %v8682_v25  ;;  %v3043_v25 = vpop.permute.xlu1 %3042 }
 0x89f   :  { %8185 = vmatprep.subr.mxu0 %v10507_v46 }
 0x8a0   :  { %10534 = vst [vmem:[#allocation34_spill] sm:$0xff] %v9624_v12  ;;  %8169 = vmatmul.mubr.msk.f32.vlgmr.msra.gmra.mxu1 %vm638_vm1, %v9624_v12 }
 0x8a1   :  { %v8692_v22 = vpop.eup %8691  ;;  %8179 = vmatpush3.xpose.msk.msra.mxu1 %vm638_vm1, %v2797_v36  ;;  %8182 = vmatprep.mubr.msk.f32.mxu1 %vm9043_vm0, %v10507_v46 }
 0x8a2   :  { %8180 = vmatprep.subr.mxu1 %v10507_v46  ;;  %v9633_v33 = vmul.f32 %v8692_v22, %v8684_v19  ;;  %v2959_v19 = vpop.permute.xlu0 %2958  ;;  %v3041_v28 = vpop.permute.xlu1 %3040 }
 0x8a4   :  { %10535 = vst [vmem:[#allocation35_spill] sm:$0xff] %v9633_v33  ;;  %8176 = vmatmul.mubr.msk.f32.vlgmr.msra.gmra.mxu0 %vm638_vm1, %v9633_v33 }
 0x8a5   :  { %8181 = vmatpush3.xpose.msk.msra.mxu1 %vm638_vm1, %v2795_v39  ;;  %8186 = vmatpush3.xpose.msk.msra.mxu0 %vm638_vm1, %v2879_v34 }
 0x8a6   :  { %8187 = vmatprep.subr.mxu0 %v10507_v46  ;;  %8192 = vmatprep.subr.mxu1 %v10507_v46  ;;  %v2957_v30 = vpop.permute.xlu0 %2956  ;;  %v3039_v34 = vpop.permute.xlu1 %3038 }
 0x8a7   :  { %8189 = vmatprep.mubr.msk.f32.mxu0 %vm9043_vm0, %v10507_v46 }
 0x8a8   :  { %8183 = vmatmul.mubr.msk.f32.vlgmr.msra.gmra.mxu1 %vm638_vm1, %v2793_v32 }
 0x8a9   :  { %8188 = vmatpush3.xpose.msk.msra.mxu0 %vm638_vm1, %v2877_v37  ;;  %8193 = vmatpush3.xpose.msk.msra.mxu1 %vm638_vm1, %v2961_v24 }
 0x8aa   :  { %8194 = vmatprep.subr.mxu1 %v10507_v46  ;;  %8199 = vmatprep.subr.mxu0 %v10507_v46 }
 0x8ab   :  { %8196 = vmatprep.mubr.msk.f32.mxu1 %vm9043_vm0, %v10507_v46 }
 0x8ac   :  { %8190 = vmatmul.mubr.msk.f32.vlgmr.msra.gmra.mxu0 %vm638_vm1, %v2875_v41 }
 0x8ad   :  { %8195 = vmatpush3.xpose.msk.msra.mxu1 %vm638_vm1, %v2959_v19  ;;  %8200 = vmatpush3.xpose.msk.msra.mxu0 %vm638_vm1, %v3043_v25 }
 0x8ae   :  { %8201 = vmatprep.subr.mxu0 %v10507_v46  ;;  %8203 = vmatprep.mubr.msk.f32.mxu0 %vm9043_vm0, %v10507_v46 }
 0x8af   :  { %8206 = vmatprep.subr.mxu1 %v10507_v46 }
 0x8b0   :  { %8197 = vmatmul.mubr.msk.f32.vlgmr.msra.gmra.mxu1 %vm638_vm1, %v2957_v30 }
 0x8b1   :  { %8202 = vmatpush3.xpose.msk.msra.mxu0 %vm638_vm1, %v3041_v28  ;;  %8210 = vmatprep.mubr.msk.f32.mxu1 %vm9043_vm0, %v10507_v46 }
 0x8b2   :  { %8213 = vmatprep.subr.mxu0 %v10507_v46 }
 0x8b4   :  { %8204 = vmatmul.mubr.msk.f32.vlgmr.msra.gmra.mxu0 %vm638_vm1, %v3039_v34 }
 0x8b5   :  { %8217 = vmatprep.mubr.msk.f32.mxu0 %vm9043_vm0, %v10507_v46 }
 0x958   :  { %v9665_v36 = vpop.f32.mrf.mxu1 }
 0x95a   :  { %v8156_v37 = vpop.f32.mrf.mxu1 }
 0x95b   :  { %v9667_v39 = vpop.f32.mrf.mxu0 }
 0x95d   :  { %v8163_v41 = vpop.f32.mrf.mxu0 }
 0x960   :  { %v9669_v42 = vpop.f32.mrf.mxu1 }
 0x962   :  { %v8170_v44 = vpop.f32.mrf.mxu1 }
 0x964   :  { %v9671_v45 = vpop.f32.mrf.mxu0 }
 0x966   :  { %v8177_v6 = vpop.f32.mrf.mxu0 }
 0x968   :  { %v2870_v11 = vpop.f32.mrf.mxu1 }
 0x969   :  { %v2871_v7 = vadd.f32 %v2870_v11, %v9335_v5 }
 0x96a   :  { %v8184_v43 = vpop.f32.mrf.mxu1 }
 0x96b   :  { %v3120_v32 = vsel %vm638_vm1, %v2871_v7, -inf }
 0x96c   :  { %v2952_v22 = vpop.f32.mrf.mxu0  ;;  %3121 = vmax.xlane.f32.xlu0 %v3120_v32 }
 0x96d   :  { %v2953_v24 = vadd.f32 %v2952_v22, %v9339_v10 }
 0x96e   :  { %v8191_v25 = vpop.f32.mrf.mxu0 }
 0x96f   :  { %v3123_v19 = vsel %vm638_vm1, %v2953_v24, -inf }
 0x970   :  { %3124 = vmax.xlane.f32.xlu1 %v3123_v19  ;;  %v3034_v28 = vpop.f32.mrf.mxu1 }
 0x971   :  { %v3035_v30 = vadd.f32 %v3034_v28, %v9343_v15 }
 0x972   :  { %v8198_v34 = vpop.f32.mrf.mxu1 }
 0x973   :  { %v3126_v37 = vsel %vm638_vm1, %v3035_v30, -inf }
 0x974   :  { %v3116_v41 = vpop.f32.mrf.mxu0  ;;  %3127 = vmax.xlane.f32.xlu0 %v3126_v37 }
 0x975   :  { %v3117_v5 = vadd.f32 %v3116_v41, %v9347_v20 }
 0x976   :  { %v8205_v44 = vpop.f32.mrf.mxu0 }
 0x977   :  { %v3129_v6 = vsel %vm638_vm1, %v3117_v5, -inf }
 0x978   :  { %3130 = vmax.xlane.f32.xlu0 %v3129_v6 }
 0x981   :  { %3265 = vrot.lane.b32.xlu1 %v9279_v57, %s9046_s5 }
 0x985   :  { %3185 = vrot.lane.b32.xlu1 %v9251_v51, %s9046_s5 }
 0x989   :  { %3263 = vrot.lane.b32.xlu1 %v9268_v55, %s9046_s5 }
 0x98d   :  { %3421 = vrot.lane.b32.xlu1 %v9387_v21, %s9046_s5 }
 0x98e   :  { %3187 = vrot.lane.b32.xlu0 %v9257_v48, %s9046_s5 }
 0x991   :  { %3419 = vrot.lane.b32.xlu1 %v9311_v16, %s9046_s5 }
 0x992   :  { %3343 = vrot.lane.b32.xlu0 %v9301_v0, %s9046_s5 }
 0x995   :  { %3612 = vrot.lane.b32.xlu1 %v9271_v56, %s9037_s0 }
 0x996   :  { %3341 = vrot.lane.b32.xlu0 %v9288_v61, %s9046_s5 }
 0x999   :  { %3610 = vrot.lane.b32.xlu1 %v9262_v53, %s9037_s0 }
 0x99a   :  { %3530 = vrot.lane.b32.xlu0 %v9253_v47, %s9037_s0 }
 0x99d   :  { %3608 = vrot.lane.b32.xlu1 %v9291_v62, %s9037_s0 }
 0x99e   :  { %3528 = vrot.lane.b32.xlu0 %v9249_v50, %s9037_s0 }
 0x9f5   :  { %v3122_v10 = vpop.xlane.xlu0 %3121 }
 0x9f6   :  { %v3132_v15 = vsub.f32 %v2871_v7, %v3122_v10 }
 0x9f8   :  { %v3136_v20 = vmul.f32 1.442695, %v3132_v15 }
 0x9f9   :  { %v3125_v11 = vpop.xlane.xlu1 %3124 }
 0x9fa   :  { %8693 = vpow2.f32 %v3136_v20  ;;  %v3133_v43 = vsub.f32 %v2953_v24, %v3125_v11 }
 0x9fc   :  { %v3138_v32 = vmul.f32 1.442695, %v3133_v43 }
 0x9fd   :  { %v3266_v22 = vpop.permute.xlu1 %3265  ;;  %v3128_v25 = vpop.xlane.xlu0 %3127 }
 0x9fe   :  { %8695 = vpow2.f32 %v3138_v32  ;;  %v3134_v19 = vsub.f32 %v3035_v30, %v3128_v25  ;;  %8214 = vmatpush3.msra.mxu0 %v3266_v22 }
 0x9ff   :  { %8215 = vmatprep.subr.mxu0 %v10507_v46 }
 0xa00   :  { %v3140_v28 = vmul.f32 1.442695, %v3134_v19 }
 0xa01   :  { %v3186_v34 = vpop.permute.xlu1 %3185  ;;  %v3131_v37 = vpop.xlane.xlu0 %3130 }
 0xa02   :  { %8697 = vpow2.f32 %v3140_v28  ;;  %v3135_v41 = vsub.f32 %v3117_v5, %v3131_v37 }
 0xa04   :  { %v3142_v44 = vmul.f32 1.442695, %v3135_v41 }
 0xa05   :  { %v3264_v6 = vpop.permute.xlu1 %3263  ;;  %v3188_v7 = vpop.permute.xlu0 %3187 }
 0xa06   :  { %8699 = vpow2.f32 %v3142_v44  ;;  %8207 = vmatpush3.msra.mxu1 %v3188_v7  ;;  %8216 = vmatpush3.msra.mxu0 %v3264_v6 }
 0xa07   :  { %v8694_v24 = vpop.eup %8693  ;;  %8208 = vmatprep.subr.mxu1 %v10507_v46  ;;  %8227 = vmatprep.subr.mxu0 %v10507_v46 }
 0xa08   :  { %8209 = vmatpush3.msra.mxu1 %v3186_v34  ;;  %v3144_v30 = vsel %vm638_vm1, %v8694_v24, 0.0 }
 0xa09   :  { %3145 = vadd.xlane.f32.xlu0 %v3144_v30  ;;  %8220 = vmatprep.subr.mxu1 %v10507_v46  ;;  %v3422_v32 = vpop.permute.xlu1 %3421  ;;  %v3344_v22 = vpop.permute.xlu0 %3343 }
 0xa0b   :  { %v8696_v10 = vpop.eup %8695 }
 0xa0c   :  { %v3147_v5 = vsel %vm638_vm1, %v8696_v10, 0.0 }
 0xa0d   :  { %3148 = vadd.xlane.f32.xlu1 %v3147_v5  ;;  %v3420_v25 = vpop.permute.xlu1 %3419  ;;  %v3342_v19 = vpop.permute.xlu0 %3341 }
 0xa0f   :  { %v8698_v15 = vpop.eup %8697 }
 0xa10   :  { %v3150_v20 = vsel %vm638_vm1, %v8698_v15, 0.0 }
 0xa11   :  { %3151 = vadd.xlane.f32.xlu0 %v3150_v20  ;;  %v3613_v28 = vpop.permute.xlu1 %3612  ;;  %v3531_v34 = vpop.permute.xlu0 %3530 }
 0xa13   :  { %v8700_v11 = vpop.eup %8699 }
 0xa14   :  { %v3153_v43 = vsel %vm638_vm1, %v8700_v11, 0.0 }
 0xa15   :  { %3154 = vadd.xlane.f32.xlu1 %v3153_v43  ;;  %v3611_v37 = vpop.permute.xlu1 %3610  ;;  %v3529_v41 = vpop.permute.xlu0 %3528 }
 0xa19   :  { %v3609_v44 = vpop.permute.xlu1 %3608 }
 0xa26   :  { %3776 = vrot.lane.b32.xlu1 %v9315_v4, %s9037_s0 }
 0xa27   :  { %3526 = vrot.lane.b32.xlu0 %v9266_v54, %s9037_s0 }
 0xa2a   :  { %3774 = vrot.lane.b32.xlu1 %v9305_v1, %s9037_s0 }
 0xa2b   :  { %3694 = vrot.lane.b32.xlu0 %v9293_v63, %s9037_s0 }
 0xa2e   :  { %3772 = vrot.lane.b32.xlu1 %v9282_v58, %s9037_s0 }
 0xa2f   :  { %3692 = vrot.lane.b32.xlu0 %v9284_v60, %s9037_s0 }
 0xa33   :  { %3690 = vrot.lane.b32.xlu0 %v9260_v52, %s9037_s0 }
 0xa92   :  { %v3146_v6 = vpop.xlane.xlu0 %3145 }
 0xa93   :  { %8701 = vrcp.f32 %v3146_v6 }
 0xa96   :  { %v3149_v7 = vpop.xlane.xlu1 %3148 }
 0xa97   :  { %8703 = vrcp.f32 %v3149_v7 }
 0xa9a   :  { %v3152_v30 = vpop.xlane.xlu0 %3151 }
 0xa9b   :  { %8705 = vrcp.f32 %v3152_v30 }
 0xa9e   :  { %v3155_v5 = vpop.xlane.xlu1 %3154  ;;  %v3527_v7 = vpop.permute.xlu0 %3526 }
 0xa9f   :  { %8707 = vrcp.f32 %v3155_v5 }
 0xaa0   :  { %v8702_v20 = vpop.eup %8701 }
 0xaa1   :  { %v9729_v43 = vmul.f32 %v8702_v20, %v8694_v24 }
 0xaa3   :  { %10536 = vst [vmem:[#allocation36_spill] sm:$0xff] %v9729_v43  ;;  %8211 = vmatmul.mubr.msk.f32.vlgmr.msra.gmra.mxu1 %vm638_vm1, %v9729_v43 }
 0xaa4   :  { %v8704_v49 = vpop.eup %8703  ;;  %8221 = vmatpush3.msra.mxu1 %v3344_v22  ;;  %8224 = vmatprep.mubr.msk.f32.mxu1 %vm9043_vm0, %v10507_v46 }
 0xaa5   :  { %8222 = vmatprep.subr.mxu1 %v10507_v46  ;;  %v9736_v6 = vmul.f32 %v8704_v49, %v8696_v10 }
 0xaa6   :  { %8223 = vmatpush3.msra.mxu1 %v3342_v19 }
 0xaa7   :  { %10537 = vst [vmem:[#allocation37_spill] sm:$0xff] %v9736_v6  ;;  %8218 = vmatmul.mubr.msk.f32.vlgmr.msra.gmra.mxu0 %vm638_vm1, %v9736_v6  ;;  %8234 = vmatprep.subr.mxu1 %v10507_v46 }
 0xaa8   :  { %v8706_v24 = vpop.eup %8705  ;;  %8228 = vmatpush3.msra.mxu0 %v3422_v32  ;;  %8231 = vmatprep.mubr.msk.f32.mxu0 %vm9043_vm0, %v10507_v46  ;;  %v3695_v32 = vpop.permute.xlu0 %3694 }
 0xaa9   :  { %8229 = vmatprep.subr.mxu0 %v10507_v46  ;;  %v9744_v22 = vmul.f32 %v8706_v24, %v8698_v15  ;;  %v3777_v15 = vpop.permute.xlu1 %3776 }
 0xaaa   :  { %8230 = vmatpush3.msra.mxu0 %v3420_v25 }
 0xaab   :  { %10538 = vst [vmem:[#allocation38_spill] sm:$0xff] %v9744_v22  ;;  %8225 = vmatmul.mubr.msk.f32.vlgmr.msra.gmra.mxu1 %vm638_vm1, %v9744_v22  ;;  %8241 = vmatprep.subr.mxu0 %v10507_v46 }
 0xaac   :  { %v8708_v49 = vpop.eup %8707  ;;  %8235 = vmatpush3.xpose.msk.msra.mxu1 %vm638_vm1, %v3531_v34  ;;  %8238 = vmatprep.mubr.msk.f32.mxu1 %vm9043_vm0, %v10507_v46 }
 0xaad   :  { %8236 = vmatprep.subr.mxu1 %v10507_v46  ;;  %v9753_v10 = vmul.f32 %v8708_v49, %v8700_v11  ;;  %v3693_v11 = vpop.permute.xlu0 %3692  ;;  %v3775_v25 = vpop.permute.xlu1 %3774  ;;  %v9793_v49 = vld [vmem:[#allocation8] sm:$0xff] }
 0xaaf   :  { %10539 = vst [vmem:[#allocation39_spill] sm:$0xff] %v9753_v10  ;;  %8232 = vmatmul.mubr.msk.f32.vlgmr.msra.gmra.mxu0 %vm638_vm1, %v9753_v10 }
 0xab0   :  { %8237 = vmatpush3.xpose.msk.msra.mxu1 %vm638_vm1, %v3529_v41  ;;  %8242 = vmatpush3.xpose.msk.msra.mxu0 %vm638_vm1, %v3613_v28 }
 0xab1   :  { %8243 = vmatprep.subr.mxu0 %v10507_v46  ;;  %8248 = vmatprep.subr.mxu1 %v10507_v46  ;;  %v3691_v19 = vpop.permute.xlu0 %3690  ;;  %v3773_v28 = vpop.permute.xlu1 %3772 }
 0xab2   :  { %8245 = vmatprep.mubr.msk.f32.mxu0 %vm9043_vm0, %v10507_v46 }
 0xab3   :  { %8239 = vmatmul.mubr.msk.f32.vlgmr.msra.gmra.mxu1 %vm638_vm1, %v3527_v7 }
 0xab4   :  { %8244 = vmatpush3.xpose.msk.msra.mxu0 %vm638_vm1, %v3611_v37  ;;  %8249 = vmatpush3.xpose.msk.msra.mxu1 %vm638_vm1, %v3695_v32 }
 0xab5   :  { %8250 = vmatprep.subr.mxu1 %v10507_v46  ;;  %8255 = vmatprep.subr.mxu0 %v10507_v46 }
 0xab6   :  { %8252 = vmatprep.mubr.msk.f32.mxu1 %vm9043_vm0, %v10507_v46 }
 0xab7   :  { %8246 = vmatmul.mubr.msk.f32.vlgmr.msra.gmra.mxu0 %vm638_vm1, %v3609_v44 }
 0xab8   :  { %8251 = vmatpush3.xpose.msk.msra.mxu1 %vm638_vm1, %v3693_v11  ;;  %8256 = vmatpush3.xpose.msk.msra.mxu0 %vm638_vm1, %v3777_v15 }
 0xab9   :  { %8257 = vmatprep.subr.mxu0 %v10507_v46  ;;  %8259 = vmatprep.mubr.msk.f32.mxu0 %vm9043_vm0, %v10507_v46 }
 0xaba   :  { %8262 = vmatprep.subr.mxu1 %v10507_v46 }
 0xabb   :  { %8253 = vmatmul.mubr.msk.f32.vlgmr.msra.gmra.mxu1 %vm638_vm1, %v3691_v19  ;;  %v9797_v19 = vld [vmem:[#allocation8 + $0x8] sm:$0xff] }
 0xabc   :  { %8258 = vmatpush3.xpose.msk.msra.mxu0 %vm638_vm1, %v3775_v25  ;;  %8266 = vmatprep.mubr.msk.f32.mxu1 %vm9043_vm0, %v10507_v46 }
 0xabd   :  { %8269 = vmatprep.subr.mxu0 %v10507_v46 }
 0xabf   :  { %8260 = vmatmul.mubr.msk.f32.vlgmr.msra.gmra.mxu0 %vm638_vm1, %v3773_v28 }
 0xac0   :  { %8273 = vmatprep.mubr.msk.f32.mxu0 %vm9043_vm0, %v10507_v46 }
 0xb63   :  { %v9785_v34 = vpop.f32.mrf.mxu1 }
 0xb65   :  { %v8212_v37 = vpop.f32.mrf.mxu1 }
 0xb67   :  { %v9787_v41 = vpop.f32.mrf.mxu0 }
 0xb69   :  { %v8219_v44 = vpop.f32.mrf.mxu0 }
 0xb6b   :  { %v9789_v30 = vpop.f32.mrf.mxu1 }
 0xb6d   :  { %v8226_v5 = vpop.f32.mrf.mxu1 }
 0xb6f   :  { %v9791_v20 = vpop.f32.mrf.mxu0 }
 0xb71   :  { %v8233_v24 = vpop.f32.mrf.mxu0 }
 0xb72   :  { %v9801_v24 = vld [vmem:[#allocation8 + $0x10] sm:$0xff] }
 0xb73   :  { %v3604_v7 = vpop.f32.mrf.mxu1 }
 0xb74   :  { %v3605_v32 = vadd.f32 %v9793_v49, %v3604_v7 }
 0xb75   :  { %v8240_v15 = vpop.f32.mrf.mxu1 }
 0xb76   :  { %v3854_v11 = vsel %vm638_vm1, %v3605_v32, -inf }
 0xb77   :  { %v3686_v25 = vpop.f32.mrf.mxu0  ;;  %3855 = vmax.xlane.f32.xlu0 %v3854_v11 }
 0xb78   :  { %v3687_v28 = vadd.f32 %v9797_v19, %v3686_v25 }
 0xb79   :  { %v8247_v37 = vpop.f32.mrf.mxu0 }
 0xb7a   :  { %v3857_v44 = vsel %vm638_vm1, %v3687_v28, -inf }
 0xb7b   :  { %3858 = vmax.xlane.f32.xlu1 %v3857_v44  ;;  %v3768_v5 = vpop.f32.mrf.mxu1 }
 0xb7c   :  { %v3769_v3 = vadd.f32 %v9801_v24, %v3768_v5 }
 0xb7d   :  { %v8254_v38 = vpop.f32.mrf.mxu1 }
 0xb7e   :  { %v3860_v7 = vsel %vm638_vm1, %v3769_v3, -inf }
 0xb7f   :  { %v3850_v15 = vpop.f32.mrf.mxu0  ;;  %3861 = vmax.xlane.f32.xlu0 %v3860_v7 }
 0xb80   :  { %v3851_v11 = vadd.f32 %v9805_v59, %v3850_v15 }
 0xb81   :  { %v8261_v8 = vpop.f32.mrf.mxu0 }
 0xb82   :  { %v3863_v25 = vsel %vm638_vm1, %v3851_v11, -inf }
 0xb83   :  { %3864 = vmax.xlane.f32.xlu0 %v3863_v25 }
 0xb8c   :  { %3999 = vrot.lane.b32.xlu1 %v9279_v57, %s9037_s0 }
 0xb90   :  { %3919 = vrot.lane.b32.xlu1 %v9251_v51, %s9037_s0 }
 0xb94   :  { %3997 = vrot.lane.b32.xlu1 %v9268_v55, %s9037_s0 }
 0xb98   :  { %4155 = vrot.lane.b32.xlu1 %v9387_v21, %s9037_s0 }
 0xb99   :  { %3921 = vrot.lane.b32.xlu0 %v9257_v48, %s9037_s0 }
 0xb9c   :  { %4153 = vrot.lane.b32.xlu1 %v9311_v16, %s9037_s0 }
 0xb9d   :  { %4077 = vrot.lane.b32.xlu0 %v9301_v0, %s9037_s0 }
 0xba0   :  { %4346 = vrot.lane.b32.xlu1 %v9271_v56, %s9047_s26 }
 0xba1   :  { %4075 = vrot.lane.b32.xlu0 %v9288_v61, %s9037_s0 }
 0xba4   :  { %4344 = vrot.lane.b32.xlu1 %v9262_v53, %s9047_s26 }
 0xba5   :  { %4264 = vrot.lane.b32.xlu0 %v9253_v47, %s9047_s26 }
 0xba8   :  { %4342 = vrot.lane.b32.xlu1 %v9291_v62, %s9047_s26 }
 0xba9   :  { %4262 = vrot.lane.b32.xlu0 %v9249_v50, %s9047_s26 }
 0xc00   :  { %v3856_v8 = vpop.xlane.xlu0 %3855 }
 0xc01   :  { %v3866_v38 = vsub.f32 %v3605_v32, %v3856_v8 }
 0xc03   :  { %v3870_v37 = vmul.f32 1.442695, %v3866_v38 }
 0xc04   :  { %v3859_v44 = vpop.xlane.xlu1 %3858 }
 0xc05   :  { %8709 = vpow2.f32 %v3870_v37  ;;  %v3867_v5 = vsub.f32 %v3687_v28, %v3859_v44 }
 0xc07   :  { %v3872_v7 = vmul.f32 1.442695, %v3867_v5 }
 0xc08   :  { %v4000_v15 = vpop.permute.xlu1 %3999  ;;  %v3862_v25 = vpop.xlane.xlu0 %3861 }
 0xc09   :  { %8711 = vpow2.f32 %v3872_v7  ;;  %v3868_v46 = vsub.f32 %v3769_v3, %v3862_v25  ;;  %8270 = vmatpush3.msra.mxu0 %v4000_v15 }
 0xc0a   :  { %8271 = vmatprep.subr.mxu0 %v10540_v29 }
 0xc0b   :  { %v3874_v10 = vmul.f32 1.442695, %v3868_v46 }
 0xc0c   :  { %v3920_v22 = vpop.permute.xlu1 %3919  ;;  %v3865_v6 = vpop.xlane.xlu0 %3864 }
 0xc0d   :  { %8713 = vpow2.f32 %v3874_v10  ;;  %v3869_v43 = vsub.f32 %v3851_v11, %v3865_v6 }
 0xc0f   :  { %v3876_v33 = vmul.f32 1.442695, %v3869_v43 }
 0xc10   :  { %v3998_v12 = vpop.permute.xlu1 %3997  ;;  %v3922_v32 = vpop.permute.xlu0 %3921 }
 0xc11   :  { %8715 = vpow2.f32 %v3876_v33  ;;  %8263 = vmatpush3.msra.mxu1 %v3922_v32  ;;  %8272 = vmatpush3.msra.mxu0 %v3998_v12 }
 0xc12   :  { %v8710_v28 = vpop.eup %8709  ;;  %8264 = vmatprep.subr.mxu1 %v10540_v29  ;;  %8283 = vmatprep.subr.mxu0 %v10540_v29 }
 0xc13   :  { %8265 = vmatpush3.msra.mxu1 %v3920_v22  ;;  %v3878_v3 = vsel %vm638_vm1, %v8710_v28, 0.0 }
 0xc14   :  { %3879 = vadd.xlane.f32.xlu0 %v3878_v3  ;;  %8276 = vmatprep.subr.mxu1 %v10540_v29  ;;  %v4156_v22 = vpop.permute.xlu1 %4155  ;;  %v4078_v11 = vpop.permute.xlu0 %4077 }
 0xc16   :  { %v8712_v46 = vpop.eup %8711 }
 0xc17   :  { %v3881_v6 = vsel %vm638_vm1, %v8712_v46, 0.0 }
 0xc18   :  { %3882 = vadd.xlane.f32.xlu1 %v3881_v6  ;;  %v4154_v8 = vpop.permute.xlu1 %4153  ;;  %v4076_v38 = vpop.permute.xlu0 %4075 }
 0xc1a   :  { %v8714_v43 = vpop.eup %8713 }
 0xc1b   :  { %v3884_v33 = vsel %vm638_vm1, %v8714_v43, 0.0 }
 0xc1c   :  { %3885 = vadd.xlane.f32.xlu0 %v3884_v33  ;;  %v4347_v37 = vpop.permute.xlu1 %4346  ;;  %v4265_v44 = vpop.permute.xlu0 %4264 }
 0xc1e   :  { %v8716_v12 = vpop.eup %8715 }
 0xc1f   :  { %v3887_v10 = vsel %vm638_vm1, %v8716_v12, 0.0 }
 0xc20   :  { %3888 = vadd.xlane.f32.xlu1 %v3887_v10  ;;  %v4345_v5 = vpop.permute.xlu1 %4344  ;;  %v4263_v7 = vpop.permute.xlu0 %4262 }
 0xc24   :  { %v4343_v15 = vpop.permute.xlu1 %4342 }
 0xc31   :  { %4510 = vrot.lane.b32.xlu1 %v9315_v4, %s9047_s26 }
 0xc32   :  { %4260 = vrot.lane.b32.xlu0 %v9266_v54, %s9047_s26 }
 0xc35   :  { %4508 = vrot.lane.b32.xlu1 %v9305_v1, %s9047_s26 }
 0xc36   :  { %4428 = vrot.lane.b32.xlu0 %v9293_v63, %s9047_s26 }
 0xc39   :  { %4506 = vrot.lane.b32.xlu1 %v9282_v58, %s9047_s26 }
 0xc3a   :  { %4426 = vrot.lane.b32.xlu0 %v9284_v60, %s9047_s26 }
 0xc3e   :  { %4424 = vrot.lane.b32.xlu0 %v9260_v52, %s9047_s26 }
 0xc9d   :  { %v3880_v25 = vpop.xlane.xlu0 %3879 }
 0xc9e   :  { %8717 = vrcp.f32 %v3880_v25 }
 0xca1   :  { %v3883_v32 = vpop.xlane.xlu1 %3882 }
 0xca2   :  { %8719 = vrcp.f32 %v3883_v32 }
 0xca5   :  { %v3886_v3 = vpop.xlane.xlu0 %3885 }
 0xca6   :  { %8721 = vrcp.f32 %v3886_v3 }
 0xca9   :  { %v3889_v6 = vpop.xlane.xlu1 %3888  ;;  %v4261_v32 = vpop.permute.xlu0 %4260 }
 0xcaa   :  { %8723 = vrcp.f32 %v3889_v6 }
 0xcab   :  { %v8718_v33 = vpop.eup %8717 }
 0xcac   :  { %v9857_v10 = vmul.f32 %v8718_v33, %v8710_v28 }
 0xcae   :  { %10541 = vst [vmem:[#allocation40_spill] sm:$0xff] %v9857_v10  ;;  %8267 = vmatmul.mubr.msk.f32.vlgmr.msra.gmra.mxu1 %vm638_vm1, %v9857_v10 }
 0xcaf   :  { %v8720_v14 = vpop.eup %8719  ;;  %8277 = vmatpush3.msra.mxu1 %v4078_v11  ;;  %8280 = vmatprep.mubr.msk.f32.mxu1 %vm9043_vm0, %v10540_v29 }
 0xcb0   :  { %8278 = vmatprep.subr.mxu1 %v10540_v29  ;;  %v9864_v25 = vmul.f32 %v8720_v14, %v8712_v46 }
 0xcb1   :  { %8279 = vmatpush3.msra.mxu1 %v4076_v38 }
 0xcb2   :  { %10542 = vst [vmem:[#allocation41_spill] sm:$0xff] %v9864_v25  ;;  %8274 = vmatmul.mubr.msk.f32.vlgmr.msra.gmra.mxu0 %vm638_vm1, %v9864_v25  ;;  %8290 = vmatprep.subr.mxu1 %v10540_v29 }
 0xcb3   :  { %v8722_v28 = vpop.eup %8721  ;;  %8284 = vmatpush3.msra.mxu0 %v4156_v22  ;;  %8287 = vmatprep.mubr.msk.f32.mxu0 %vm9043_vm0, %v10540_v29  ;;  %v4429_v22 = vpop.permute.xlu0 %4428 }
 0xcb4   :  { %8285 = vmatprep.subr.mxu0 %v10540_v29  ;;  %v9872_v11 = vmul.f32 %v8722_v28, %v8714_v43  ;;  %v4511_v43 = vpop.permute.xlu1 %4510 }
 0xcb5   :  { %8286 = vmatpush3.msra.mxu0 %v4154_v8 }
 0xcb6   :  { %10543 = vst [vmem:[#allocation42_spill] sm:$0xff] %v9872_v11  ;;  %8281 = vmatmul.mubr.msk.f32.vlgmr.msra.gmra.mxu1 %vm638_vm1, %v9872_v11  ;;  %8297 = vmatprep.subr.mxu0 %v10540_v29 }
 0xcb7   :  { %v8724_v14 = vpop.eup %8723  ;;  %8291 = vmatpush3.xpose.msk.msra.mxu1 %vm638_vm1, %v4265_v44  ;;  %8294 = vmatprep.mubr.msk.f32.mxu1 %vm9043_vm0, %v10540_v29 }
 0xcb8   :  { %8292 = vmatprep.subr.mxu1 %v10540_v29  ;;  %v9881_v46 = vmul.f32 %v8724_v14, %v8716_v12  ;;  %v4427_v12 = vpop.permute.xlu0 %4426  ;;  %v4509_v8 = vpop.permute.xlu1 %4508 }
 0xcba   :  { %10544 = vst [vmem:[#allocation43_spill] sm:$0xff] %v9881_v46  ;;  %8288 = vmatmul.mubr.msk.f32.vlgmr.msra.gmra.mxu0 %vm638_vm1, %v9881_v46 }
 0xcbb   :  { %8293 = vmatpush3.xpose.msk.msra.mxu1 %vm638_vm1, %v4263_v7  ;;  %8298 = vmatpush3.xpose.msk.msra.mxu0 %vm638_vm1, %v4347_v37 }
 0xcbc   :  { %8299 = vmatprep.subr.mxu0 %v10540_v29  ;;  %8304 = vmatprep.subr.mxu1 %v10540_v29  ;;  %v4425_v38 = vpop.permute.xlu0 %4424  ;;  %v4507_v37 = vpop.permute.xlu1 %4506 }
 0xcbd   :  { %8301 = vmatprep.mubr.msk.f32.mxu0 %vm9043_vm0, %v10540_v29 }
 0xcbe   :  { %8295 = vmatmul.mubr.msk.f32.vlgmr.msra.gmra.mxu1 %vm638_vm1, %v4261_v32 }
 0xcbf   :  { %8300 = vmatpush3.xpose.msk.msra.mxu0 %vm638_vm1, %v4345_v5  ;;  %8305 = vmatpush3.xpose.msk.msra.mxu1 %vm638_vm1, %v4429_v22 }
 0xcc0   :  { %8306 = vmatprep.subr.mxu1 %v10540_v29  ;;  %8311 = vmatprep.subr.mxu0 %v10540_v29 }
 0xcc1   :  { %8308 = vmatprep.mubr.msk.f32.mxu1 %vm9043_vm0, %v10540_v29 }
 0xcc2   :  { %8302 = vmatmul.mubr.msk.f32.vlgmr.msra.gmra.mxu0 %vm638_vm1, %v4343_v15 }
 0xcc3   :  { %8307 = vmatpush3.xpose.msk.msra.mxu1 %vm638_vm1, %v4427_v12  ;;  %8312 = vmatpush3.xpose.msk.msra.mxu0 %vm638_vm1, %v4511_v43 }
 0xcc4   :  { %8313 = vmatprep.subr.mxu0 %v10540_v29  ;;  %8315 = vmatprep.mubr.msk.f32.mxu0 %vm9043_vm0, %v10540_v29 }
 0xcc5   :  { %8318 = vmatprep.subr.mxu1 %v10540_v29 }
 0xcc6   :  { %8309 = vmatmul.mubr.msk.f32.vlgmr.msra.gmra.mxu1 %vm638_vm1, %v4425_v38 }
 0xcc7   :  { %8314 = vmatpush3.xpose.msk.msra.mxu0 %vm638_vm1, %v4509_v8  ;;  %8322 = vmatprep.mubr.msk.f32.mxu1 %vm9043_vm0, %v10540_v29 }
 0xcc8   :  { %8325 = vmatprep.subr.mxu0 %v10540_v29 }
 0xcca   :  { %8316 = vmatmul.mubr.msk.f32.vlgmr.msra.gmra.mxu0 %vm638_vm1, %v4507_v37 }
 0xccb   :  { %8329 = vmatprep.mubr.msk.f32.mxu0 %vm9043_vm0, %v10540_v29 }
 0xd6e   :  { %v9913_v44 = vpop.f32.mrf.mxu1 }
 0xd70   :  { %v8268_v5 = vpop.f32.mrf.mxu1 }
 0xd72   :  { %v9915_v7 = vpop.f32.mrf.mxu0 }
 0xd74   :  { %v8275_v15 = vpop.f32.mrf.mxu0 }
 0xd76   :  { %v9917_v3 = vpop.f32.mrf.mxu1 }
 0xd78   :  { %v8282_v6 = vpop.f32.mrf.mxu1 }
 0xd7a   :  { %v9919_v33 = vpop.f32.mrf.mxu0 }
 0xd7c   :  { %v8289_v28 = vpop.f32.mrf.mxu0 }
 0xd7e   :  { %v4338_v32 = vpop.f32.mrf.mxu1 }
 0xd7f   :  { %v4339_v14 = vadd.f32 %v9793_v49, %v4338_v32 }
 0xd80   :  { %v8296_v22 = vpop.f32.mrf.mxu1 }
 0xd81   :  { %v4588_v43 = vsel %vm638_vm1, %v4339_v14, -inf }
 0xd82   :  { %v4420_v12 = vpop.f32.mrf.mxu0  ;;  %4589 = vmax.xlane.f32.xlu0 %v4588_v43 }
 0xd83   :  { %v4421_v8 = vadd.f32 %v9797_v19, %v4420_v12 }
 0xd84   :  { %v8303_v38 = vpop.f32.mrf.mxu0 }
 0xd85   :  { %v4591_v37 = vsel %vm638_vm1, %v4421_v8, -inf }
 0xd86   :  { %4592 = vmax.xlane.f32.xlu1 %v4591_v37  ;;  %v4502_v5 = vpop.f32.mrf.mxu1 }
 0xd87   :  { %v4503_v15 = vadd.f32 %v9801_v24, %v4502_v5 }
 0xd88   :  { %v8310_v6 = vpop.f32.mrf.mxu1 }
 0xd89   :  { %v4594_v28 = vsel %vm638_vm1, %v4503_v15, -inf }
 0xd8a   :  { %v4584_v46 = vpop.f32.mrf.mxu0  ;;  %4595 = vmax.xlane.f32.xlu0 %v4594_v28 }
 0xd8b   :  { %v4585_v32 = vadd.f32 %v9805_v59, %v4584_v46 }
 0xd8c   :  { %v8317_v22 = vpop.f32.mrf.mxu0 }
 0xd8d   :  { %v4597_v11 = vsel %vm638_vm1, %v4585_v32, -inf }
 0xd8e   :  { %4598 = vmax.xlane.f32.xlu0 %v4597_v11 }
 0xd97   :  { %4733 = vrot.lane.b32.xlu1 %v9279_v57, %s9047_s26 }
 0xd9b   :  { %4653 = vrot.lane.b32.xlu1 %v9251_v51, %s9047_s26 }
 0xd9f   :  { %4731 = vrot.lane.b32.xlu1 %v9268_v55, %s9047_s26 }
 0xda3   :  { %4889 = vrot.lane.b32.xlu1 %v9387_v21, %s9047_s26 }
 0xda4   :  { %4655 = vrot.lane.b32.xlu0 %v9257_v48, %s9047_s26 }
 0xda7   :  { %4887 = vrot.lane.b32.xlu1 %v9311_v16, %s9047_s26 }
 0xda8   :  { %4811 = vrot.lane.b32.xlu0 %v9301_v0, %s9047_s26 }
 0xdab   :  { %5080 = vrot.lane.b32.xlu1 %v9271_v56, %s9048_s27 }
 0xdac   :  { %4809 = vrot.lane.b32.xlu0 %v9288_v61, %s9047_s26 }
 0xdaf   :  { %5078 = vrot.lane.b32.xlu1 %v9262_v53, %s9048_s27 }
 0xdb0   :  { %4998 = vrot.lane.b32.xlu0 %v9253_v47, %s9048_s27 }
 0xdb3   :  { %5076 = vrot.lane.b32.xlu1 %v9291_v62, %s9048_s27 }
 0xdb4   :  { %4996 = vrot.lane.b32.xlu0 %v9249_v50, %s9048_s27 }
 0xe0b   :  { %v4590_v11 = vpop.xlane.xlu0 %4589 }
 0xe0c   :  { %v4600_v46 = vsub.f32 %v4339_v14, %v4590_v11 }
 0xe0e   :  { %v4604_v43 = vmul.f32 1.442695, %v4600_v46 }
 0xe0f   :  { %v4593_v12 = vpop.xlane.xlu1 %4592 }
 0xe10   :  { %8725 = vpow2.f32 %v4604_v43  ;;  %v4601_v38 = vsub.f32 %v4421_v8, %v4593_v12 }
 0xe12   :  { %v4606_v37 = vmul.f32 1.442695, %v4601_v38 }
 0xe13   :  { %v4734_v5 = vpop.permute.xlu1 %4733  ;;  %v4596_v6 = vpop.xlane.xlu0 %4595 }
 0xe14   :  { %8727 = vpow2.f32 %v4606_v37  ;;  %v4602_v28 = vsub.f32 %v4503_v15, %v4596_v6  ;;  %8326 = vmatpush3.msra.mxu0 %v4734_v5 }
 0xe15   :  { %8327 = vmatprep.subr.mxu0 %v10540_v29 }
 0xe16   :  { %v4608_v22 = vmul.f32 1.442695, %v4602_v28 }
 0xe17   :  { %v4654_v25 = vpop.permute.xlu1 %4653  ;;  %v4599_v10 = vpop.xlane.xlu0 %4598 }
 0xe18   :  { %8729 = vpow2.f32 %v4608_v22  ;;  %v4603_v40 = vsub.f32 %v4585_v32, %v4599_v10 }
 0xe1a   :  { %v4610_v18 = vmul.f32 1.442695, %v4603_v40 }
 0xe1b   :  { %v4732_v9 = vpop.permute.xlu1 %4731  ;;  %v4656_v14 = vpop.permute.xlu0 %4655 }
 0xe1c   :  { %8731 = vpow2.f32 %v4610_v18  ;;  %8319 = vmatpush3.msra.mxu1 %v4656_v14  ;;  %8328 = vmatpush3.msra.mxu0 %v4732_v9 }
 0xe1d   :  { %v8726_v8 = vpop.eup %8725  ;;  %8320 = vmatprep.subr.mxu1 %v10540_v29  ;;  %8339 = vmatprep.subr.mxu0 %v10540_v29 }
 0xe1e   :  { %8321 = vmatpush3.msra.mxu1 %v4654_v25  ;;  %v4612_v15 = vsel %vm638_vm1, %v8726_v8, 0.0 }
 0xe1f   :  { %4613 = vadd.xlane.f32.xlu0 %v4612_v15  ;;  %8332 = vmatprep.subr.mxu1 %v10540_v29  ;;  %v4890_v25 = vpop.permute.xlu1 %4889  ;;  %v4812_v46 = vpop.permute.xlu0 %4811 }
 0xe21   :  { %v8728_v11 = vpop.eup %8727 }
 0xe22   :  { %v4615_v10 = vsel %vm638_vm1, %v8728_v11, 0.0 }
 0xe23   :  { %4616 = vadd.xlane.f32.xlu1 %v4615_v10  ;;  %v4888_v43 = vpop.permute.xlu1 %4887  ;;  %v4810_v12 = vpop.permute.xlu0 %4809 }
 0xe25   :  { %v8730_v40 = vpop.eup %8729 }
 0xe26   :  { %v4618_v18 = vsel %vm638_vm1, %v8730_v40, 0.0 }
 0xe27   :  { %4619 = vadd.xlane.f32.xlu0 %v4618_v18  ;;  %v5081_v38 = vpop.permute.xlu1 %5080  ;;  %v4999_v37 = vpop.permute.xlu0 %4998 }
 0xe29   :  { %v8732_v9 = vpop.eup %8731 }
 0xe2a   :  { %v4621_v32 = vsel %vm638_vm1, %v8732_v9, 0.0 }
 0xe2b   :  { %4622 = vadd.xlane.f32.xlu1 %v4621_v32  ;;  %v5079_v5 = vpop.permute.xlu1 %5078  ;;  %v4997_v6 = vpop.permute.xlu0 %4996 }
 0xe2f   :  { %v5077_v28 = vpop.permute.xlu1 %5076 }
 0xe3c   :  { %5244 = vrot.lane.b32.xlu1 %v9315_v4, %s9048_s27 }
 0xe3d   :  { %4994 = vrot.lane.b32.xlu0 %v9266_v54, %s9048_s27 }
 0xe40   :  { %5242 = vrot.lane.b32.xlu1 %v9305_v1, %s9048_s27 }
 0xe41   :  { %5162 = vrot.lane.b32.xlu0 %v9293_v63, %s9048_s27 }
 0xe44   :  { %5240 = vrot.lane.b32.xlu1 %v9282_v58, %s9048_s27 }
 0xe45   :  { %5160 = vrot.lane.b32.xlu0 %v9284_v60, %s9048_s27 }
 0xe49   :  { %5158 = vrot.lane.b32.xlu0 %v9260_v52, %s9048_s27 }
 0xea8   :  { %v4614_v22 = vpop.xlane.xlu0 %4613 }
 0xea9   :  { %8733 = vrcp.f32 %v4614_v22 }
 0xeac   :  { %v4617_v14 = vpop.xlane.xlu1 %4616 }
 0xead   :  { %8735 = vrcp.f32 %v4617_v14 }
 0xeb0   :  { %v4620_v15 = vpop.xlane.xlu0 %4619 }
 0xeb1   :  { %8737 = vrcp.f32 %v4620_v15 }
 0xeb4   :  { %v4623_v10 = vpop.xlane.xlu1 %4622  ;;  %v4995_v14 = vpop.permute.xlu0 %4994 }
 0xeb5   :  { %8739 = vrcp.f32 %v4623_v10 }
 0xeb6   :  { %v8734_v18 = vpop.eup %8733 }
 0xeb7   :  { %v9977_v32 = vmul.f32 %v8734_v18, %v8726_v8 }
 0xeb9   :  { %8323 = vmatmul.mubr.msk.f32.vlgmr.msra.gmra.mxu1 %vm638_vm1, %v9977_v32 }
 0xeba   :  { %v8736_v13 = vpop.eup %8735  ;;  %8333 = vmatpush3.msra.mxu1 %v4812_v46  ;;  %8336 = vmatprep.mubr.msk.f32.mxu1 %vm9043_vm0, %v10540_v29 }
 0xebb   :  { %8334 = vmatprep.subr.mxu1 %v10540_v29  ;;  %v9984_v22 = vmul.f32 %v8736_v13, %v8728_v11 }
 0xebc   :  { %8335 = vmatpush3.msra.mxu1 %v4810_v12 }
 0xebd   :  { %8330 = vmatmul.mubr.msk.f32.vlgmr.msra.gmra.mxu0 %vm638_vm1, %v9984_v22  ;;  %8346 = vmatprep.subr.mxu1 %v10540_v29 }
 0xebe   :  { %v8738_v8 = vpop.eup %8737  ;;  %8340 = vmatpush3.msra.mxu0 %v4890_v25  ;;  %8343 = vmatprep.mubr.msk.f32.mxu0 %vm9043_vm0, %v10540_v29  ;;  %v5163_v25 = vpop.permute.xlu0 %5162 }
 0xebf   :  { %8341 = vmatprep.subr.mxu0 %v10540_v29  ;;  %v9992_v46 = vmul.f32 %v8738_v8, %v8730_v40  ;;  %v5245_v40 = vpop.permute.xlu1 %5244 }
 0xec0   :  { %8342 = vmatpush3.msra.mxu0 %v4888_v43 }
 0xec1   :  { %10545 = vst [vmem:[#allocation44_spill] sm:$0xff] %v9992_v46  ;;  %8337 = vmatmul.mubr.msk.f32.vlgmr.msra.gmra.mxu1 %vm638_vm1, %v9992_v46  ;;  %8353 = vmatprep.subr.mxu0 %v10540_v29 }
 0xec2   :  { %v8740_v13 = vpop.eup %8739  ;;  %8347 = vmatpush3.xpose.msk.msra.mxu1 %vm638_vm1, %v4999_v37  ;;  %8350 = vmatprep.mubr.msk.f32.mxu1 %vm9043_vm0, %v10540_v29 }
 0xec3   :  { %8348 = vmatprep.subr.mxu1 %v10540_v29  ;;  %v10001_v11 = vmul.f32 %v8740_v13, %v8732_v9  ;;  %v5161_v9 = vpop.permute.xlu0 %5160  ;;  %v5243_v43 = vpop.permute.xlu1 %5242 }
 0xec5   :  { %10546 = vst [vmem:[#allocation45_spill] sm:$0xff] %v10001_v11  ;;  %8344 = vmatmul.mubr.msk.f32.vlgmr.msra.gmra.mxu0 %vm638_vm1, %v10001_v11 }
 0xec6   :  { %8349 = vmatpush3.xpose.msk.msra.mxu1 %vm638_vm1, %v4997_v6  ;;  %8354 = vmatpush3.xpose.msk.msra.mxu0 %vm638_vm1, %v5081_v38 }
 0xec7   :  { %8355 = vmatprep.subr.mxu0 %v10540_v29  ;;  %8360 = vmatprep.subr.mxu1 %v10540_v29  ;;  %v5159_v12 = vpop.permute.xlu0 %5158  ;;  %v5241_v38 = vpop.permute.xlu1 %5240 }
 0xec8   :  { %8357 = vmatprep.mubr.msk.f32.mxu0 %vm9043_vm0, %v10540_v29 }
 0xec9   :  { %8351 = vmatmul.mubr.msk.f32.vlgmr.msra.gmra.mxu1 %vm638_vm1, %v4995_v14 }
 0xeca   :  { %8356 = vmatpush3.xpose.msk.msra.mxu0 %vm638_vm1, %v5079_v5  ;;  %8361 = vmatpush3.xpose.msk.msra.mxu1 %vm638_vm1, %v5163_v25 }
 0xecb   :  { %8362 = vmatprep.subr.mxu1 %v10540_v29  ;;  %8367 = vmatprep.subr.mxu0 %v10540_v29 }
 0xecc   :  { %8364 = vmatprep.mubr.msk.f32.mxu1 %vm9043_vm0, %v10540_v29 }
 0xecd   :  { %8358 = vmatmul.mubr.msk.f32.vlgmr.msra.gmra.mxu0 %vm638_vm1, %v5077_v28 }
 0xece   :  { %8363 = vmatpush3.xpose.msk.msra.mxu1 %vm638_vm1, %v5161_v9  ;;  %8368 = vmatpush3.xpose.msk.msra.mxu0 %vm638_vm1, %v5245_v40 }
 0xecf   :  { %8369 = vmatprep.subr.mxu0 %v10540_v29  ;;  %8371 = vmatprep.mubr.msk.f32.mxu0 %vm9043_vm0, %v10540_v29 }
 0xed0   :  { %8374 = vmatprep.subr.mxu1 %v10540_v29 }
 0xed1   :  { %8365 = vmatmul.mubr.msk.f32.vlgmr.msra.gmra.mxu1 %vm638_vm1, %v5159_v12 }
 0xed2   :  { %8370 = vmatpush3.xpose.msk.msra.mxu0 %vm638_vm1, %v5243_v43  ;;  %8378 = vmatprep.mubr.msk.f32.mxu1 %vm9043_vm0, %v10540_v29 }
 0xed3   :  { %8381 = vmatprep.subr.mxu0 %v10540_v29 }
 0xed5   :  { %8372 = vmatmul.mubr.msk.f32.vlgmr.msra.gmra.mxu0 %vm638_vm1, %v5241_v38 }
 0xed6   :  { %8385 = vmatprep.mubr.msk.f32.mxu0 %vm9043_vm0, %v10540_v29 }
 0xf79   :  { %v10033_v37 = vpop.f32.mrf.mxu1 }
 0xf7b   :  { %v8324_v5 = vpop.f32.mrf.mxu1 }
 0xf7d   :  { %v10035_v6 = vpop.f32.mrf.mxu0 }
 0xf7f   :  { %v8331_v28 = vpop.f32.mrf.mxu0 }
 0xf81   :  { %v10037_v15 = vpop.f32.mrf.mxu1 }
 0xf83   :  { %v8338_v10 = vpop.f32.mrf.mxu1 }
 0xf85   :  { %v10039_v18 = vpop.f32.mrf.mxu0 }
 0xf87   :  { %v8345_v8 = vpop.f32.mrf.mxu0 }
 0xf89   :  { %v5072_v14 = vpop.f32.mrf.mxu1 }
 0xf8a   :  { %v5073_v13 = vadd.f32 %v9793_v49, %v5072_v14 }
 0xf8b   :  { %v8352_v25 = vpop.f32.mrf.mxu1 }
 0xf8c   :  { %v5322_v40 = vsel %vm638_vm1, %v5073_v13, -inf }
 0xf8d   :  { %v5154_v9 = vpop.f32.mrf.mxu0  ;;  %5323 = vmax.xlane.f32.xlu0 %v5322_v40 }
 0xf8e   :  { %v5155_v43 = vadd.f32 %v9797_v19, %v5154_v9 }
 0xf8f   :  { %v8359_v12 = vpop.f32.mrf.mxu0 }
 0xf90   :  { %v5325_v38 = vsel %vm638_vm1, %v5155_v43, -inf }
 0xf91   :  { %5326 = vmax.xlane.f32.xlu1 %v5325_v38  ;;  %v5236_v5 = vpop.f32.mrf.mxu1 }
 0xf92   :  { %v5237_v28 = vadd.f32 %v9801_v24, %v5236_v5 }
 0xf93   :  { %v8366_v10 = vpop.f32.mrf.mxu1 }
 0xf94   :  { %v5328_v8 = vsel %vm638_vm1, %v5237_v28, -inf }
 0xf95   :  { %v5318_v11 = vpop.f32.mrf.mxu0  ;;  %5329 = vmax.xlane.f32.xlu0 %v5328_v8 }
 0xf96   :  { %v5319_v14 = vadd.f32 %v9805_v59, %v5318_v11 }
 0xf97   :  { %v8373_v25 = vpop.f32.mrf.mxu0 }
 0xf98   :  { %v5331_v46 = vsel %vm638_vm1, %v5319_v14, -inf }
 0xf99   :  { %5332 = vmax.xlane.f32.xlu0 %v5331_v46 }
 0xfa2   :  { %5467 = vrot.lane.b32.xlu1 %v9279_v57, %s9048_s27 }
 0xfa6   :  { %5387 = vrot.lane.b32.xlu1 %v9251_v51, %s9048_s27 }
 0xfaa   :  { %5465 = vrot.lane.b32.xlu1 %v9268_v55, %s9048_s27 }
 0xfae   :  { %5623 = vrot.lane.b32.xlu1 %v9387_v21, %s9048_s27 }
 0xfaf   :  { %5389 = vrot.lane.b32.xlu0 %v9257_v48, %s9048_s27 }
 0xfb2   :  { %5621 = vrot.lane.b32.xlu1 %v9311_v16, %s9048_s27 }
 0xfb3   :  { %5545 = vrot.lane.b32.xlu0 %v9301_v0, %s9048_s27 }
 0xfb6   :  { %5814 = vrot.lane.b32.xlu1 %v9271_v56, %s9033_s17 }
 0xfb7   :  { %5543 = vrot.lane.b32.xlu0 %v9288_v61, %s9048_s27 }
 0xfba   :  { %5812 = vrot.lane.b32.xlu1 %v9262_v53, %s9033_s17 }
 0xfbb   :  { %5732 = vrot.lane.b32.xlu0 %v9253_v47, %s9033_s17 }
 0xfbe   :  { %5810 = vrot.lane.b32.xlu1 %v9291_v62, %s9033_s17 }
 0xfbf   :  { %5730 = vrot.lane.b32.xlu0 %v9249_v50, %s9033_s17 }
0x1016   :  { %v5324_v46 = vpop.xlane.xlu0 %5323 }
0x1017   :  { %v5334_v11 = vsub.f32 %v5073_v13, %v5324_v46 }
0x1019   :  { %v5338_v40 = vmul.f32 1.442695, %v5334_v11 }
0x101a   :  { %v5327_v9 = vpop.xlane.xlu1 %5326 }
0x101b   :  { %8741 = vpow2.f32 %v5338_v40  ;;  %v5335_v56 = vsub.f32 %v5155_v43, %v5327_v9 }
0x101d   :  { %v5340_v12 = vmul.f32 1.442695, %v5335_v56 }
0x101e   :  { %v5468_v38 = vpop.permute.xlu1 %5467  ;;  %v5330_v5 = vpop.xlane.xlu0 %5329 }
0x101f   :  { %8743 = vpow2.f32 %v5340_v12  ;;  %v5336_v53 = vsub.f32 %v5237_v28, %v5330_v5  ;;  %8382 = vmatpush3.msra.mxu0 %v5468_v38 }
0x1020   :  { %8383 = vmatprep.subr.mxu0 %v10540_v29 }
0x1021   :  { %v5342_v47 = vmul.f32 1.442695, %v5336_v53 }
0x1022   :  { %v5388_v10 = vpop.permute.xlu1 %5387  ;;  %v5333_v62 = vpop.xlane.xlu0 %5332 }
0x1023   :  { %8745 = vpow2.f32 %v5342_v47  ;;  %v5337_v8 = vsub.f32 %v5319_v14, %v5333_v62 }
0x1025   :  { %v5344_v50 = vmul.f32 1.442695, %v5337_v8 }
0x1026   :  { %v5466_v25 = vpop.permute.xlu1 %5465  ;;  %v5390_v13 = vpop.permute.xlu0 %5389 }
0x1027   :  { %8747 = vpow2.f32 %v5344_v50  ;;  %8375 = vmatpush3.msra.mxu1 %v5390_v13  ;;  %8384 = vmatpush3.msra.mxu0 %v5466_v25 }
0x1028   :  { %v8742_v43 = vpop.eup %8741  ;;  %8376 = vmatprep.subr.mxu1 %v10540_v29  ;;  %8395 = vmatprep.subr.mxu0 %v10540_v29 }
0x1029   :  { %8377 = vmatpush3.msra.mxu1 %v5388_v10  ;;  %v5346_v28 = vsel %vm638_vm1, %v8742_v43, 0.0 }
0x102a   :  { %5347 = vadd.xlane.f32.xlu0 %v5346_v28  ;;  %8388 = vmatprep.subr.mxu1 %v10540_v29  ;;  %v5624_v12 = vpop.permute.xlu1 %5623 }
0x102c   :  { %v8744_v46 = vpop.eup %8743 }
0x102d   :  { %v5349_v14 = vsel %vm638_vm1, %v8744_v46, 0.0 }
0x102e   :  { %5350 = vadd.xlane.f32.xlu1 %v5349_v14  ;;  %v5622_v38 = vpop.permute.xlu1 %5621 }
0x1030   :  { %v8746_v11 = vpop.eup %8745 }
0x1031   :  { %v5352_v40 = vsel %vm638_vm1, %v8746_v11, 0.0 }
0x1032   :  { %5353 = vadd.xlane.f32.xlu0 %v5352_v40 }
0x1034   :  { %v8748_v9 = vpop.eup %8747 }
0x1035   :  { %v5355_v56 = vsel %vm638_vm1, %v8748_v9, 0.0 }
0x1036   :  { %5356 = vadd.xlane.f32.xlu1 %v5355_v56 }
0x1047   :  { %5978 = vrot.lane.b32.xlu1 %v9315_v4, %s9033_s17  ;;  %v5546_v4 = vpop.permute.xlu0 %5545 }
0x1048   :  { %5728 = vrot.lane.b32.xlu0 %v9266_v54, %s9033_s17  ;;  %v5815_v54 = vpop.permute.xlu1 %5814 }
0x104b   :  { %5976 = vrot.lane.b32.xlu1 %v9305_v1, %s9033_s17  ;;  %v5544_v5 = vpop.permute.xlu0 %5543 }
0x104c   :  { %5896 = vrot.lane.b32.xlu0 %v9293_v63, %s9033_s17  ;;  %v5813_v47 = vpop.permute.xlu1 %5812 }
0x104f   :  { %5974 = vrot.lane.b32.xlu1 %v9282_v58, %s9033_s17  ;;  %v5733_v53 = vpop.permute.xlu0 %5732 }
0x1050   :  { %5894 = vrot.lane.b32.xlu0 %v9284_v60, %s9033_s17  ;;  %v5811_v10 = vpop.permute.xlu1 %5810 }
0x1053   :  { %v5731_v1 = vpop.permute.xlu0 %5730 }
0x1054   :  { %5892 = vrot.lane.b32.xlu0 %v9260_v52, %s9033_s17 }
0x10b3   :  { %v5348_v62 = vpop.xlane.xlu0 %5347 }
0x10b4   :  { %8749 = vrcp.f32 %v5348_v62 }
0x10b7   :  { %v5351_v63 = vpop.xlane.xlu1 %5350 }
0x10b8   :  { %8751 = vrcp.f32 %v5351_v63 }
0x10bb   :  { %v5354_v58 = vpop.xlane.xlu0 %5353 }
0x10bc   :  { %8753 = vrcp.f32 %v5354_v58 }
0x10bf   :  { %v5357_v8 = vpop.xlane.xlu1 %5356 }
0x10c0   :  { %8755 = vrcp.f32 %v5357_v8 }
0x10c1   :  { %v8750_v60 = vpop.eup %8749 }
0x10c2   :  { %v10097_v50 = vmul.f32 %v8750_v60, %v8742_v43  ;;  %v5729_v43 = vpop.permute.xlu0 %5728 }
0x10c4   :  { %8379 = vmatmul.mubr.msk.f32.vlgmr.msra.gmra.mxu1 %vm638_vm1, %v10097_v50 }
0x10c5   :  { %v8752_v52 = vpop.eup %8751  ;;  %8389 = vmatpush3.msra.mxu1 %v5546_v4  ;;  %8392 = vmatprep.mubr.msk.f32.mxu1 %vm9043_vm0, %v10540_v29 }
0x10c6   :  { %8390 = vmatprep.subr.mxu1 %v10540_v29  ;;  %v10104_v25 = vmul.f32 %v8752_v52, %v8744_v46  ;;  %v5897_v40 = vpop.permute.xlu0 %5896 }
0x10c7   :  { %8391 = vmatpush3.msra.mxu1 %v5544_v5 }
0x10c8   :  { %8386 = vmatmul.mubr.msk.f32.vlgmr.msra.gmra.mxu0 %vm638_vm1, %v10104_v25  ;;  %8402 = vmatprep.subr.mxu1 %v10540_v29 }
0x10c9   :  { %v8754_v13 = vpop.eup %8753  ;;  %8396 = vmatpush3.msra.mxu0 %v5624_v12  ;;  %8399 = vmatprep.mubr.msk.f32.mxu0 %vm9043_vm0, %v10540_v29 }
0x10ca   :  { %8397 = vmatprep.subr.mxu0 %v10540_v29  ;;  %v10112_v28 = vmul.f32 %v8754_v13, %v8746_v11  ;;  %v5979_v11 = vpop.permute.xlu1 %5978 }
0x10cb   :  { %8398 = vmatpush3.msra.mxu0 %v5622_v38 }
0x10cc   :  { %8393 = vmatmul.mubr.msk.f32.vlgmr.msra.gmra.mxu1 %vm638_vm1, %v10112_v28  ;;  %8409 = vmatprep.subr.mxu0 %v10540_v29 }
0x10cd   :  { %v8756_v46 = vpop.eup %8755  ;;  %8403 = vmatpush3.xpose.msk.msra.mxu1 %vm638_vm1, %v5733_v53  ;;  %8406 = vmatprep.mubr.msk.f32.mxu1 %vm9043_vm0, %v10540_v29 }
0x10ce   :  { %8404 = vmatprep.subr.mxu1 %v10540_v29  ;;  %v10121_v14 = vmul.f32 %v8756_v46, %v8748_v9  ;;  %v5895_v9 = vpop.permute.xlu0 %5894  ;;  %v5977_v56 = vpop.permute.xlu1 %5976 }
0x10d0   :  { %8400 = vmatmul.mubr.msk.f32.vlgmr.msra.gmra.mxu0 %vm638_vm1, %v10121_v14 }
0x10d1   :  { %8405 = vmatpush3.xpose.msk.msra.mxu1 %vm638_vm1, %v5731_v1  ;;  %8410 = vmatpush3.xpose.msk.msra.mxu0 %vm638_vm1, %v5815_v54 }
0x10d2   :  { %8411 = vmatprep.subr.mxu0 %v10540_v29  ;;  %8416 = vmatprep.subr.mxu1 %v10540_v29  ;;  %v5893_v12 = vpop.permute.xlu0 %5892  ;;  %v5975_v4 = vpop.permute.xlu1 %5974 }
0x10d3   :  { %8413 = vmatprep.mubr.msk.f32.mxu0 %vm9043_vm0, %v10540_v29 }
0x10d4   :  { %8407 = vmatmul.mubr.msk.f32.vlgmr.msra.gmra.mxu1 %vm638_vm1, %v5729_v43 }
0x10d5   :  { %8412 = vmatpush3.xpose.msk.msra.mxu0 %vm638_vm1, %v5813_v47  ;;  %8417 = vmatpush3.xpose.msk.msra.mxu1 %vm638_vm1, %v5897_v40 }
0x10d6   :  { %8418 = vmatprep.subr.mxu1 %v10540_v29  ;;  %8423 = vmatprep.subr.mxu0 %v10540_v29 }
0x10d7   :  { %8420 = vmatprep.mubr.msk.f32.mxu1 %vm9043_vm0, %v10540_v29 }
0x10d8   :  { %8414 = vmatmul.mubr.msk.f32.vlgmr.msra.gmra.mxu0 %vm638_vm1, %v5811_v10 }
0x10d9   :  { %8419 = vmatpush3.xpose.msk.msra.mxu1 %vm638_vm1, %v5895_v9  ;;  %8424 = vmatpush3.xpose.msk.msra.mxu0 %vm638_vm1, %v5979_v11 }
0x10da   :  { %8425 = vmatprep.subr.mxu0 %v10540_v29  ;;  %8427 = vmatprep.mubr.msk.f32.mxu0 %vm9043_vm0, %v10540_v29 }
0x10db   :  { %8430 = vmatprep.subr.mxu1 %v10540_v29 }
0x10dc   :  { %8421 = vmatmul.mubr.msk.f32.vlgmr.msra.gmra.mxu1 %vm638_vm1, %v5893_v12 }
0x10dd   :  { %8426 = vmatpush3.xpose.msk.msra.mxu0 %vm638_vm1, %v5977_v56  ;;  %8434 = vmatprep.mubr.msk.f32.mxu1 %vm9043_vm0, %v10540_v29 }
0x10de   :  { %8437 = vmatprep.subr.mxu0 %v10540_v29 }
0x10e0   :  { %8428 = vmatmul.mubr.msk.f32.vlgmr.msra.gmra.mxu0 %vm638_vm1, %v5975_v4 }
0x10e1   :  { %8441 = vmatprep.mubr.msk.f32.mxu0 %vm9043_vm0, %v10540_v29 }
0x1184   :  { %v10153_v38 = vpop.f32.mrf.mxu1 }
0x1186   :  { %v8380_v5 = vpop.f32.mrf.mxu1 }
0x1188   :  { %v10155_v54 = vpop.f32.mrf.mxu0 }
0x118a   :  { %v8387_v53 = vpop.f32.mrf.mxu0 }
0x118c   :  { %v10157_v47 = vpop.f32.mrf.mxu1 }
0x118e   :  { %v8394_v1 = vpop.f32.mrf.mxu1 }
0x1190   :  { %v10159_v10 = vpop.f32.mrf.mxu0 }
0x1192   :  { %v8401_v62 = vpop.f32.mrf.mxu0 }
0x1194   :  { %v5806_v63 = vpop.f32.mrf.mxu1 }
0x1195   :  { %v5807_v58 = vadd.f32 %v9793_v49, %v5806_v63 }
0x1196   :  { %v8408_v8 = vpop.f32.mrf.mxu1 }
0x1197   :  { %v6056_v60 = vsel %vm638_vm1, %v5807_v58, -inf }
0x1198   :  { %v5888_v52 = vpop.f32.mrf.mxu0  ;;  %6057 = vmax.xlane.f32.xlu0 %v6056_v60 }
0x1199   :  { %v5889_v13 = vadd.f32 %v9797_v19, %v5888_v52 }
0x119a   :  { %v8415_v43 = vpop.f32.mrf.mxu0 }
0x119b   :  { %v6059_v46 = vsel %vm638_vm1, %v5889_v13, -inf }
0x119c   :  { %6060 = vmax.xlane.f32.xlu1 %v6059_v46  ;;  %v5970_v40 = vpop.f32.mrf.mxu1 }
0x119d   :  { %v5971_v11 = vadd.f32 %v9801_v24, %v5970_v40 }
0x119e   :  { %v8422_v9 = vpop.f32.mrf.mxu1 }
0x119f   :  { %v6062_v56 = vsel %vm638_vm1, %v5971_v11, -inf }
0x11a0   :  { %v6052_v12 = vpop.f32.mrf.mxu0  ;;  %6063 = vmax.xlane.f32.xlu0 %v6062_v56 }
0x11a1   :  { %v6053_v49 = vadd.f32 %v9805_v59, %v6052_v12  ;;  %v7695_v12 = vpack.c.bf16 %v9545_v26, %v9545_v26  ;;  %v7701_v26 = vpack.c.bf16 %v9671_v45, %v9671_v45  ;;  %v7706_v45 = vpack.c.bf16 %v9913_v44, %v9913_v44 }
0x11a2   :  { %v8429_v4 = vpop.f32.mrf.mxu0  ;;  %v7713_v44 = vpack.c.bf16 %v10039_v18, %v10039_v18 }
0x11a3   :  { %v6065_v5 = vsel %vm638_vm1, %v6053_v49, -inf  ;;  %v7697_v4 = vpack.c.bf16 %v9551_v35, %v9551_v35  ;;  %v7702_v35 = vpack.c.bf16 %v9785_v34, %v9785_v34  ;;  %v7709_v34 = vpack.c.bf16 %v9919_v33, %v9919_v33 }
0x11a4   :  { %6066 = vmax.xlane.f32.xlu0 %v6065_v5  ;;  %v7696_v5 = vpack.c.bf16 %v9549_v31, %v9549_v31  ;;  %v7703_v31 = vpack.c.bf16 %v9787_v41, %v9787_v41  ;;  %v7708_v41 = vpack.c.bf16 %v9917_v3, %v9917_v3  ;;  %v7715_v3 = vpack.c.bf16 %v10155_v54, %v10155_v54 }
0x11a5   :  { %v7714_v33 = vpack.c.bf16 %v10153_v38, %v10153_v38 }
0x11ad   :  { %6201 = vrot.lane.b32.xlu1 %v9279_v57, %s9033_s17 }
0x11b1   :  { %6121 = vrot.lane.b32.xlu1 %v9251_v51, %s9033_s17 }
0x11b5   :  { %6199 = vrot.lane.b32.xlu1 %v9268_v55, %s9033_s17 }
0x11b9   :  { %6357 = vrot.lane.b32.xlu1 %v9387_v21, %s9033_s17 }
0x11ba   :  { %6123 = vrot.lane.b32.xlu0 %v9257_v48, %s9033_s17 }
0x11be   :  { %6279 = vrot.lane.b32.xlu0 %v9301_v0, %s9033_s17 }
0x1221   :  { %v6058_v59 = vpop.xlane.xlu0 %6057 }
0x1222   :  { %v6068_v19 = vsub.f32 %v5807_v58, %v6058_v59 }
0x1224   :  { %v6072_v24 = vmul.f32 1.442695, %v6068_v19 }
0x1225   :  { %v6061_v53 = vpop.xlane.xlu1 %6060 }
0x1226   :  { %8757 = vpow2.f32 %v6072_v24  ;;  %v6069_v57 = vsub.f32 %v5889_v13, %v6061_v53 }
0x1228   :  { %v6074_v1 = vmul.f32 1.442695, %v6069_v57 }
0x1229   :  { %v6202_v51 = vpop.permute.xlu1 %6201  ;;  %v6064_v62 = vpop.xlane.xlu0 %6063 }
0x122a   :  { %8759 = vpow2.f32 %v6074_v1  ;;  %v6070_v55 = vsub.f32 %v5971_v11, %v6064_v62  ;;  %8438 = vmatpush3.msra.mxu0 %v6202_v51 }
0x122b   :  { %8439 = vmatprep.subr.mxu0 %v10540_v29 }
0x122c   :  { %v6076_v21 = vmul.f32 1.442695, %v6070_v55 }
0x122d   :  { %v6122_v63 = vpop.permute.xlu1 %6121  ;;  %v6067_v48 = vpop.xlane.xlu0 %6066 }
0x122e   :  { %8761 = vpow2.f32 %v6076_v21  ;;  %v6071_v8 = vsub.f32 %v6053_v49, %v6067_v48  ;;  %v7694_v49 = vpack.c.bf16 %v9547_v27, %v9547_v27  ;;  %v7700_v27 = vpack.c.bf16 %v9669_v42, %v9669_v42 }
0x122f   :  { %v7707_v42 = vpack.c.bf16 %v9915_v7, %v9915_v7  ;;  %v7712_v7 = vpack.c.bf16 %v10037_v15, %v10037_v15 }
0x1230   :  { %v6078_v0 = vmul.f32 1.442695, %v6071_v8 }
0x1231   :  { %v6200_v60 = vpop.permute.xlu1 %6199  ;;  %v6124_v58 = vpop.permute.xlu0 %6123 }
0x1232   :  { %8763 = vpow2.f32 %v6078_v0  ;;  %8431 = vmatpush3.msra.mxu1 %v6124_v58  ;;  %8440 = vmatpush3.msra.mxu0 %v6200_v60 }
0x1233   :  { %v10182_v52 = vpop.eup %8757  ;;  %8432 = vmatprep.subr.mxu1 %v10540_v29  ;;  %8451 = vmatprep.subr.mxu0 %v10540_v29 }
0x1234   :  { %8433 = vmatpush3.msra.mxu1 %v6122_v63  ;;  %v6080_v13 = vsel %vm638_vm1, %v10182_v52, 0.0 }
0x1235   :  { %6081 = vadd.xlane.f32.xlu0 %v6080_v13  ;;  %8444 = vmatprep.subr.mxu1 %v10540_v29  ;;  %v6280_v15 = vpop.permute.xlu0 %6279  ;;  %v6358_v18 = vpop.permute.xlu1 %6357 }
0x1237   :  { %v10189_v43 = vpop.eup %8759 }
0x1238   :  { %v6083_v46 = vsel %vm638_vm1, %v10189_v43, 0.0 }
0x1239   :  { %6084 = vadd.xlane.f32.xlu1 %v6083_v46 }
0x123b   :  { %v10193_v40 = vpop.eup %8761 }
0x123c   :  { %v6086_v11 = vsel %vm638_vm1, %v10193_v40, 0.0 }
0x123d   :  { %6087 = vadd.xlane.f32.xlu0 %v6086_v11 }
0x123f   :  { %v10197_v9 = vpop.eup %8763 }
0x1240   :  { %v6089_v56 = vsel %vm638_vm1, %v10197_v9, 0.0 }
0x1241   :  { %6090 = vadd.xlane.f32.xlu1 %v6089_v56 }
0x1252   :  { %6355 = vrot.lane.b32.xlu1 %v9311_v16, %s9033_s17  ;;  %v7698_v16 = vpack.c.bf16 %v9665_v36, %v9665_v36  ;;  %v7705_v36 = vpack.c.bf16 %v9791_v20, %v9791_v20  ;;  %v7710_v20 = vpack.c.bf16 %v10033_v37, %v10033_v37  ;;  %v7717_v37 = vpack.c.bf16 %v10159_v10, %v10159_v10 }
0x1253   :  { %6277 = vrot.lane.b32.xlu0 %v9288_v61, %s9033_s17  ;;  %v7699_v61 = vpack.c.bf16 %v9667_v39, %v9667_v39  ;;  %v7704_v39 = vpack.c.bf16 %v9789_v30, %v9789_v30  ;;  %v7711_v30 = vpack.c.bf16 %v10035_v6, %v10035_v6  ;;  %v7716_v6 = vpack.c.bf16 %v10157_v47, %v10157_v47 }
0x1256   :  { %2043 = vrot.lane.b32.xlu1 %v7695_v12, %s9033_s17 }
0x1257   :  { %2041 = vrot.lane.b32.xlu0 %v7694_v49, %s9033_s17 }
0x125a   :  { %2047 = vrot.lane.b32.xlu1 %v7697_v4, %s9033_s17 }
0x125b   :  { %2045 = vrot.lane.b32.xlu0 %v7696_v5, %s9033_s17 }
0x125e   :  { %2777 = vrot.lane.b32.xlu1 %v7699_v61, %s9048_s27 }
0x125f   :  { %2775 = vrot.lane.b32.xlu0 %v7698_v16, %s9048_s27 }
0x1262   :  { %2781 = vrot.lane.b32.xlu1 %v7701_v26, %s9048_s27 }
0x1263   :  { %2779 = vrot.lane.b32.xlu0 %v7700_v27, %s9048_s27 }
0x1266   :  { %3511 = vrot.lane.b32.xlu1 %v7703_v31, %s9047_s26 }
0x1267   :  { %3509 = vrot.lane.b32.xlu0 %v7702_v35, %s9047_s26  ;;  %v8535_v35 = vld [vmem:[#allocation14 + $0x38] sm:$0xff]  }
0x126a   :  { %3515 = vrot.lane.b32.xlu1 %v7705_v36, %s9047_s26  ;;  %v8536_v36 = vld [vmem:[#allocation14 + $0x30] sm:$0xff]  }
0x126b   :  { %3513 = vrot.lane.b32.xlu0 %v7704_v39, %s9047_s26  ;;  %v8537_v39 = vld [vmem:[#allocation14 + $0x28] sm:$0xff]  }
0x126e   :  { %4245 = vrot.lane.b32.xlu1 %v7707_v42, %s9037_s0  ;;  %v8538_v42 = vld [vmem:[#allocation14 + $0x20] sm:$0xff]  }
0x126f   :  { %4243 = vrot.lane.b32.xlu0 %v7706_v45, %s9037_s0  ;;  %v8539_v45 = vld [vmem:[#allocation14 + $0x18] sm:$0xff]  }
0x1272   :  { %4249 = vrot.lane.b32.xlu1 %v7709_v34, %s9037_s0  ;;  %v8540_v34 = vld [vmem:[#allocation14 + $0x10] sm:$0xff]  }
0x1273   :  { %4247 = vrot.lane.b32.xlu0 %v7708_v41, %s9037_s0 }
0x1276   :  { %4979 = vrot.lane.b32.xlu1 %v7711_v30, %s9046_s5 }
0x1277   :  { %4977 = vrot.lane.b32.xlu0 %v7710_v20, %s9046_s5 }
0x127a   :  { %4983 = vrot.lane.b32.xlu1 %v7713_v44, %s9046_s5  ;;  %v8541_v44 = vld [vmem:[#allocation14 + $0x8] sm:$0xff]  }
0x127b   :  { %4981 = vrot.lane.b32.xlu0 %v7712_v7, %s9046_s5  ;;  %v8543_v7 = vld [vmem:[#allocation14] sm:$0xff]  }
0x127e   :  { %5713 = vrot.lane.b32.xlu1 %v7715_v3, %s9045_s9 }
0x127f   :  { %5711 = vrot.lane.b32.xlu0 %v7714_v33, %s9045_s9 }
0x1282   :  { %5717 = vrot.lane.b32.xlu1 %v7717_v37, %s9045_s9 }
0x1283   :  { %5715 = vrot.lane.b32.xlu0 %v7716_v6, %s9045_s9 }
0x12be   :  { %v6082_v54 = vpop.xlane.xlu0 %6081 }
0x12bf   :  { %8765 = vrcp.f32 %v6082_v54 }
0x12c2   :  { %v6085_v59 = vpop.xlane.xlu1 %6084 }
0x12c3   :  { %8767 = vrcp.f32 %v6085_v59 }
0x12c6   :  { %v6088_v38 = vpop.xlane.xlu0 %6087 }
0x12c7   :  { %8769 = vrcp.f32 %v6088_v38 }
0x12ca   :  { %v6091_v19 = vpop.xlane.xlu1 %6090  ;;  %v6278_v24 = vpop.permute.xlu0 %6277 }
0x12cb   :  { %8771 = vrcp.f32 %v6091_v19  ;;  %v160_v19 = vld [vmem:[#allocation3] sm:$0xff] }
0x12cc   :  { %v8766_v53 = vpop.eup %8765 }
0x12cd   :  { %v10278_v10 = vmul.f32 %v8766_v53, %v10182_v52 }
0x12ce   :  { %v6356_v47 = vpop.permute.xlu1 %6355  ;;  %v2042_v57 = vpop.permute.xlu0 %2041 }
0x12cf   :  { %2054 = vst.msk [vmem:[#allocation2] sm:$0xf] %vm2053_vm3, %v2042_v57  ;;  %8435 = vmatmul.mubr.msk.f32.vlgmr.msra.gmra.mxu1 %vm638_vm1, %v10278_v10 }
0x12d0   :  { %v8768_v1 = vpop.eup %8767  ;;  %8445 = vmatpush3.msra.mxu1 %v6280_v15  ;;  %8448 = vmatprep.mubr.msk.f32.mxu1 %vm9043_vm0, %v10540_v29 }
0x12d1   :  { %8446 = vmatprep.subr.mxu1 %v10540_v29  ;;  %v10287_v51 = vmul.f32 %v8768_v1, %v10189_v43 }
0x12d2   :  { %8447 = vmatpush3.msra.mxu1 %v6278_v24  ;;  %v2044_v62 = vpop.permute.xlu1 %2043  ;;  %v2046_v55 = vpop.permute.xlu0 %2045  ;;  %v161_v24 = vld [vmem:[#allocation3 + $0x8] sm:$0xff] }
0x12d3   :  { %2055 = vst.msk [vmem:[#allocation2 + $0x4] sm:$0xf] %vm2053_vm3, %v2044_v62  ;;  %2056 = vst.msk [vmem:[#allocation2 + $0x8] sm:$0xf] %vm2053_vm3, %v2046_v55  ;;  %8442 = vmatmul.mubr.msk.f32.vlgmr.msra.gmra.mxu0 %vm638_vm1, %v10287_v51  ;;  %8458 = vmatprep.subr.bf16.mxu1 %v8535_v35 }
0x12d4   :  { %v8770_v21 = vpop.eup %8769  ;;  %8452 = vmatpush3.msra.mxu0 %v6358_v18  ;;  %8455 = vmatprep.mubr.msk.f32.mxu0 %vm9043_vm0, %v10540_v29  ;;  %vm6116_vm0 = vcmask 1048448  }
0x12d5   :  { %8453 = vmatprep.subr.mxu0 %v10540_v29  ;;  %v10297_v63 = vmul.f32 %v8770_v21, %v10193_v40  ;;  %v10547_v21 = vmov 0  }
0x12d6   :  { %8454 = vmatpush3.msra.mxu0 %v6356_v47  ;;  %v2048_v48 = vpop.permute.xlu1 %2047  ;;  %v2776_v8 = vpop.permute.xlu0 %2775 }
0x12d7   :  { %2057 = vst.msk [vmem:[#allocation2 + $0xc] sm:$0xf] %vm2053_vm3, %v2048_v48  ;;  %8449 = vmatmul.mubr.msk.f32.vlgmr.msra.gmra.mxu1 %vm638_vm1, %v10297_v63 }
0x12d8   :  { %2788 = vst.msk [vmem:[#allocation2] sm:$0xf] %vm2787_vm4, %v2776_v8  ;;  %v8772_v0 = vpop.eup %8771  ;;  %8459 = vmatpush3.bf16.msra.mxu1 %v8535_v35 }
0x12d9   :  { %v10304_v60 = vmul.f32 %v8772_v0, %v10197_v9  ;;  %8460 = vmatprep.subr.bf16.mxu1 %v8536_v36 }
0x12da   :  { %v2778_v58 = vpop.permute.xlu1 %2777  ;;  %v2780_v52 = vpop.permute.xlu0 %2779 }
0x12db   :  { %2789 = vst.msk [vmem:[#allocation2 + $0x4] sm:$0xf] %vm2787_vm4, %v2778_v58  ;;  %2790 = vst.msk [vmem:[#allocation2 + $0x8] sm:$0xf] %vm2787_vm4, %v2780_v52  ;;  %8456 = vmatmul.mubr.msk.f32.vlgmr.msra.gmra.mxu0 %vm638_vm1, %v10304_v60 }
0x12dc   :  { %8461 = vmatpush3.bf16.msra.mxu1 %v8536_v36 }
0x12dd   :  { %8462 = vmatprep.subr.bf16.mxu1 %v8537_v39 }
0x12de   :  { %v2782_v29 = vpop.permute.xlu1 %2781  ;;  %v3510_v13 = vpop.permute.xlu0 %3509 }
0x12df   :  { %2791 = vst.msk [vmem:[#allocation2 + $0xc] sm:$0xf] %vm2787_vm4, %v2782_v29 }
0x12e0   :  { %3522 = vst.msk [vmem:[#allocation2] sm:$0xf] %vm3521_vm5, %v3510_v13  ;;  %8463 = vmatpush3.bf16.msra.mxu1 %v8537_v39 }
0x12e1   :  { %8464 = vmatprep.subr.bf16.mxu1 %v8538_v42 }
0x12e2   :  { %v3512_v43 = vpop.permute.xlu1 %3511  ;;  %v3514_v46 = vpop.permute.xlu0 %3513 }
0x12e3   :  { %3523 = vst.msk [vmem:[#allocation2 + $0x4] sm:$0xf] %vm3521_vm5, %v3512_v43  ;;  %3524 = vst.msk [vmem:[#allocation2 + $0x8] sm:$0xf] %vm3521_vm5, %v3514_v46  ;;  %v8789_v46 = vld [vmem:[#allocation3 + $0x18] sm:$0xff] }
0x12e4   :  { %8465 = vmatpush3.bf16.msra.mxu1 %v8538_v42 }
0x12e5   :  { %8466 = vmatprep.subr.bf16.mxu1 %v8539_v45 }
0x12e6   :  { %v3516_v40 = vpop.permute.xlu1 %3515  ;;  %v4244_v11 = vpop.permute.xlu0 %4243 }
0x12e7   :  { %3525 = vst.msk [vmem:[#allocation2 + $0xc] sm:$0xf] %vm3521_vm5, %v3516_v40 }
0x12e8   :  { %4256 = vst.msk [vmem:[#allocation2] sm:$0xf] %vm4255_vm6, %v4244_v11  ;;  %8467 = vmatpush3.bf16.msra.mxu1 %v8539_v45 }
0x12e9   :  { %8468 = vmatprep.subr.bf16.mxu1 %v8540_v34 }
0x12ea   :  { %v4246_v9 = vpop.permute.xlu1 %4245  ;;  %v4248_v56 = vpop.permute.xlu0 %4247 }
0x12eb   :  { %4257 = vst.msk [vmem:[#allocation2 + $0x4] sm:$0xf] %vm4255_vm6, %v4246_v9  ;;  %4258 = vst.msk [vmem:[#allocation2 + $0x8] sm:$0xf] %vm4255_vm6, %v4248_v56 }
0x12ec   :  { %8469 = vmatpush3.bf16.msra.mxu1 %v8540_v34 }
0x12ed   :  { %8470 = vmatprep.subr.bf16.mxu1 %v8541_v44 }
0x12ee   :  { %v4250_v12 = vpop.permute.xlu1 %4249  ;;  %v4978_v49 = vpop.permute.xlu0 %4977 }
0x12ef   :  { %4259 = vst.msk [vmem:[#allocation2 + $0xc] sm:$0xf] %vm4255_vm6, %v4250_v12 }
0x12f0   :  { %4990 = vst.msk [vmem:[#allocation2] sm:$0xf] %vm4989_vm7, %v4978_v49  ;;  %8471 = vmatpush3.bf16.msra.mxu1 %v8541_v44 }
0x12f1   :  { %8472 = vmatprep.subr.bf16.mxu1 %v8543_v7 }
0x12f2   :  { %v4980_v4 = vpop.permute.xlu1 %4979  ;;  %v4982_v5 = vpop.permute.xlu0 %4981 }
0x12f3   :  { %4991 = vst.msk [vmem:[#allocation2 + $0x4] sm:$0xf] %vm4989_vm7, %v4980_v4  ;;  %4992 = vst.msk [vmem:[#allocation2 + $0x8] sm:$0xf] %vm4989_vm7, %v4982_v5  ;;  %v8790_v4 = vld [vmem:[#allocation3 + $0x10] sm:$0xff] }
0x12f4   :  { %8473 = vmatpush3.bf16.msra.mxu1 %v8543_v7 }
0x12f6   :  { %v4984_v61 = vpop.permute.xlu1 %4983  ;;  %v5712_v16 = vpop.permute.xlu0 %5711 }
0x12f7   :  { %4993 = vst.msk [vmem:[#allocation2 + $0xc] sm:$0xf] %vm4989_vm7, %v4984_v61 }
0x12f8   :  { %5724 = vst.msk [vmem:[#allocation2] sm:$0xf] %vm5723_vm8, %v5712_v16  ;;  %v8545_v16 = vld [vmem:[#allocation15 + $0xe0] ss:$16 sps:$4 sm:$0xff]  }
0x12fa   :  { %v5714_v26 = vpop.permute.xlu1 %5713  ;;  %v5716_v27 = vpop.permute.xlu0 %5715 }
0x12fb   :  { %5725 = vst.msk [vmem:[#allocation2 + $0x4] sm:$0xf] %vm5723_vm8, %v5714_v26  ;;  %5726 = vst.msk [vmem:[#allocation2 + $0x8] sm:$0xf] %vm5723_vm8, %v5716_v27  ;;  %v8547_v26 = vld [vmem:[#allocation15 + $0xe4] ss:$16 sps:$4 sm:$0xff]  }
0x12fc   :  { %v8548_v27 = vld [vmem:[#allocation15 + $0xe8] ss:$16 sps:$4 sm:$0xff]   ;;  %6867 = vmatprep.subr.bf16.mxu0 %v8547_v26 }
0x12fd   :  { %6868 = vmatpush1.bf16.msra.mxu0 %v8545_v16 }
0x12fe   :  { %v5718_v31 = vpop.permute.xlu1 %5717 }
0x12ff   :  { %5727 = vst.msk [vmem:[#allocation2 + $0xc] sm:$0xf] %vm5723_vm8, %v5718_v31  ;;  %v8550_v31 = vld [vmem:[#allocation15 + $0xec] ss:$16 sps:$4 sm:$0xff]  }
0x1300   :  { %6920 = vmatprep.subr.bf16.mxu1 %v8550_v31  ;;  %v8575_v31 = vld [vmem:[#allocation15 + $0x40] ss:$16 sps:$4 sm:$0xff]  }
0x138f   :  { %v6195_v41 = vpop.f32.mrf.mxu1 }
0x1390   :  { %v7718_v30 = vpack.c.bf16 %v6195_v41, %v6195_v41 }
0x1391   :  { %v8436_v20 = vpop.f32.mrf.mxu1 }
0x1392   :  { %6445 = vrot.lane.b32.xlu0 %v7718_v30, %s9044_s6 }
0x1393   :  { %v6273_v3 = vpop.f32.mrf.mxu0 }
0x1394   :  { %v7719_v33 = vpack.c.bf16 %v6273_v3, %v6273_v3 }
0x1395   :  { %v8443_v37 = vpop.f32.mrf.mxu0 }
0x1396   :  { %6447 = vrot.lane.b32.xlu1 %v7719_v33, %s9044_s6 }
0x1397   :  { %v6351_v6 = vpop.f32.mrf.mxu1 }
0x1398   :  { %v7720_v15 = vpack.c.bf16 %v6351_v6, %v6351_v6 }
0x1399   :  { %v8450_v18 = vpop.f32.mrf.mxu1 }
0x139a   :  { %6449 = vrot.lane.b32.xlu0 %v7720_v15, %s9044_s6 }
0x139b   :  { %v6429_v54 = vpop.f32.mrf.mxu0 }
0x139c   :  { %v7721_v59 = vpack.c.bf16 %v6429_v54, %v6429_v54 }
0x139d   :  { %v8457_v38 = vpop.f32.mrf.mxu0 }
0x139e   :  { %6451 = vrot.lane.b32.xlu1 %v7721_v59, %s9044_s6 }
0x13b9   :  { %173 = vadd.xlane.f32.xlu0 %v160_v19 }
0x13c2   :  { %175 = vadd.xlane.f32.xlu1 %v161_v24 }
0x1404   :  { %v6446_v53 = vpop.permute.xlu0 %6445 }
0x1405   :  { %6458 = vst.msk [vmem:[#allocation2] sm:$0xf] %vm6457_vm9, %v6446_v53  ;;  %v8553_v53 = vld [vmem:[#allocation15 + $0xc4] ss:$16 sps:$4 sm:$0xff]  }
0x1406   :  { %6869 = vmatprep.subr.bf16.mxu0 %v8553_v53  ;;  %v10556_v53 = vld [vmem:[#allocation37_spill] sm:$0xff] }
0x1408   :  { %v6448_v47 = vpop.permute.xlu1 %6447 }
0x1409   :  { %6459 = vst.msk [vmem:[#allocation2 + $0x4] sm:$0xf] %vm6457_vm9, %v6448_v47  ;;  %v8556_v47 = vld [vmem:[#allocation15 + $0xcc] ss:$16 sps:$4 sm:$0xff]  }
0x140c   :  { %v6450_v57 = vpop.permute.xlu0 %6449 }
0x140d   :  { %6460 = vst.msk [vmem:[#allocation2 + $0x8] sm:$0xf] %vm6457_vm9, %v6450_v57  ;;  %v8551_v57 = vld [vmem:[#allocation15 + $0xc0] ss:$16 sps:$4 sm:$0xff]  }
0x140e   :  { %6870 = vmatpush1.bf16.msra.mxu0 %v8551_v57  ;;  %v10558_v57 = vld [vmem:[#allocation39_spill] sm:$0xff] }
0x1410   :  { %v6452_v1 = vpop.permute.xlu1 %6451  ;;  %v8542_v62 = vld [vmem:[#allocation2] sm:$0xff]  }
0x1411   :  { %6461 = vst.msk [vmem:[#allocation2 + $0xc] sm:$0xf] %vm6457_vm9, %v6452_v1  ;;  %8474 = vmatprep.mubr.bf16.mxu1 %v8542_v62  ;;  %v8554_v1 = vld [vmem:[#allocation15 + $0xc8] ss:$16 sps:$4 sm:$0xff]   ;;  %v8559_v62 = vld [vmem:[#allocation15 + $0xa4] ss:$16 sps:$4 sm:$0xff]  }
0x1412   :  { %6871 = vmatprep.subr.bf16.mxu0 %v8559_v62  ;;  %v10560_v62 = vld [vmem:[#allocation41_spill] sm:$0xff] }
0x1418   :  { %v8544_v55 = vld [vmem:[#allocation2 + $0x8] sm:$0xff]  }
0x1419   :  { %8475 = vmatmul.mubr.bf16.vlgmr.msra.gmra.mxu1 %v8544_v55  ;;  %v8562_v55 = vld [vmem:[#allocation15 + $0xac] ss:$16 sps:$4 sm:$0xff]  }
0x141a   :  { %6952 = vmatprep.mubr.bf16.mxu1 %v10547_v21  ;;  %6921 = vmatpush1.bf16.msra.mxu1 %v8548_v27  ;;  %v8574_v27 = vld [vmem:[#allocation15 + $0x6c] ss:$16 sps:$4 sm:$0xff]  }
0x141b   :  { %6922 = vmatprep.subr.bf16.mxu1 %v8556_v47  ;;  %v10557_v47 = vld [vmem:[#allocation38_spill] sm:$0xff] }
0x141e   :  { %6923 = vmatpush1.bf16.msra.mxu1 %v8554_v1  ;;  %v10559_v1 = vld [vmem:[#allocation40_spill] sm:$0xff] }
0x141f   :  { %6924 = vmatprep.subr.bf16.mxu1 %v8562_v55  ;;  %v10561_v55 = vld [vmem:[#allocation42_spill] sm:$0xff] }
0x1442   :  { %v174_v52 = vpop.xlane.xlu0 %173 }
0x1443   :  { %v182_v11 = vmul.f32 0.0078125, %v174_v52  ;;  %v8568_v52 = vld [vmem:[#allocation15 + $0x8c] ss:$16 sps:$4 sm:$0xff]  }
0x1445   :  { %v10329_v49 = vsub.f32 %v160_v19, %v182_v11  ;;  %v8566_v11 = vld [vmem:[#allocation15 + $0x88] ss:$16 sps:$4 sm:$0xff]  }
0x1447   :  { %v190_v61 = vmul.f32 %v10329_v49, %v10329_v49 }
0x144b   :  { %v176_v48 = vpop.xlane.xlu1 %175 }
0x144c   :  { %v183_v8 = vmul.f32 0.0078125, %v176_v48  ;;  %v8557_v48 = vld [vmem:[#allocation15 + $0xa0] ss:$16 sps:$4 sm:$0xff]  }
0x144d   :  { %6872 = vmatpush1.bf16.msra.mxu0 %v8557_v48  ;;  %v10562_v48 = vld [vmem:[#allocation43_spill] sm:$0xff] }
0x144e   :  { %v10318_v13 = vsub.f32 %v161_v24, %v183_v8  ;;  %v8560_v8 = vld [vmem:[#allocation15 + $0xa8] ss:$16 sps:$4 sm:$0xff]  }
0x144f   :  { %6925 = vmatpush1.bf16.msra.mxu1 %v8560_v8  ;;  %v10563_v8 = vld [vmem:[#allocation44_spill] sm:$0xff] }
0x1450   :  { %v191_v12 = vmul.f32 %v10318_v13, %v10318_v13  ;;  %6926 = vmatprep.subr.bf16.mxu1 %v8568_v52 }
0x1453   :  { %6927 = vmatpush1.bf16.msra.mxu1 %v8566_v11 }
0x1454   :  { %6928 = vmatprep.subr.bf16.mxu1 %v8574_v27 }
0x14d9   :  { %v8476_v0 = vpop.f32.mrf.mxu1 }
0x14da   :  { %v10331_v5 = vadd.f32 %v8790_v4, %v8476_v0  ;;  %v8571_v4 = vld [vmem:[#allocation15 + $0x64] ss:$16 sps:$4 sm:$0xff]  }
0x14db   :  { %v6576_v58 = vpop.f32.mrf.mxu1 }
0x14dc   :  { %v10316_v29 = vadd.f32 %v6576_v58, %v160_v19  ;;  %v8565_v58 = vld [vmem:[#allocation15 + $0x84] ss:$16 sps:$4 sm:$0xff]  }
0x14dd   :  { %v8477_v43 = vpop.f32.mrf.mxu1  ;;  %6873 = vmatprep.subr.bf16.mxu0 %v8565_v58 }
0x14de   :  { %v10320_v40 = vadd.f32 %v8789_v46, %v8477_v43  ;;  %6591 = vadd.xlane.f32.xlu0 %v10316_v29  ;;  %v8563_v46 = vld [vmem:[#allocation15 + $0x80] ss:$16 sps:$4 sm:$0xff]  }
0x14df   :  { %v6579_v9 = vpop.f32.mrf.mxu1  ;;  %6874 = vmatpush1.bf16.msra.mxu0 %v8563_v46 }
0x14e0   :  { %v10323_v56 = vadd.f32 %v6579_v9, %v161_v24  ;;  %6597 = vadd.xlane.f32.xlu1 %v10320_v40  ;;  %6875 = vmatprep.subr.bf16.mxu0 %v8571_v4 }
0x14e2   :  { %6593 = vadd.xlane.f32.xlu0 %v10323_v56 }
0x14e4   :  { %196 = vadd.xlane.f32.xlu1 %v191_v12  ;;  %v8569_v12 = vld [vmem:[#allocation15 + $0x60] ss:$16 sps:$4 sm:$0xff]  }
0x14e5   :  { %6876 = vmatpush1.bf16.msra.mxu0 %v8569_v12 }
0x14e6   :  { %6595 = vadd.xlane.f32.xlu0 %v10331_v5 }
0x14ea   :  { %194 = vadd.xlane.f32.xlu0 %v190_v61  ;;  %v8572_v61 = vld [vmem:[#allocation15 + $0x68] ss:$16 sps:$4 sm:$0xff]  }
0x14eb   :  { %6929 = vmatpush1.bf16.msra.mxu1 %v8572_v61 }
0x1567   :  { %v6592_v35 = vpop.xlane.xlu0 %6591 }
0x1568   :  { %v6599_v36 = vmul.f32 0.0078125, %v6592_v35  ;;  %v8577_v35 = vld [vmem:[#allocation15 + $0x44] ss:$16 sps:$4 sm:$0xff]  }
0x1569   :  { %v6598_v39 = vpop.xlane.xlu1 %6597  ;;  %6877 = vmatprep.subr.bf16.mxu0 %v8577_v35 }
0x156a   :  { %v10337_v42 = vsub.f32 %v10316_v29, %v6599_v36  ;;  %v6602_v34 = vmul.f32 0.0078125, %v6598_v39  ;;  %v8578_v36 = vld [vmem:[#allocation15 + $0x48] ss:$16 sps:$4 sm:$0xff]   ;;  %v8580_v39 = vld [vmem:[#allocation15 + $0x4c] ss:$16 sps:$4 sm:$0xff]   ;;  %6878 = vmatpush1.bf16.msra.mxu0 %v8575_v31 }
0x156b   :  { %v6594_v45 = vpop.xlane.xlu0 %6593  ;;  %6930 = vmatprep.subr.bf16.mxu1 %v8580_v39 }
0x156c   :  { %v6600_v41 = vmul.f32 0.0078125, %v6594_v45  ;;  %v6607_v30 = vmul.f32 %v10337_v42, %v10337_v42  ;;  %v10345_v33 = vsub.f32 %v10320_v40, %v6602_v34  ;;  %v10548_v34 = vld [vmem:[#allocation30_spill] sm:$0xff]  ;;  %6931 = vmatpush1.bf16.msra.mxu1 %v8578_v36 }
0x156d   :  { %v197_v20 = vpop.xlane.xlu1 %196 }
0x156e   :  { %v10342_v44 = vsub.f32 %v10323_v56, %v6600_v41  ;;  %v203_v7 = vmul.f32 0.0078125, %v197_v20  ;;  %6611 = vadd.xlane.f32.xlu0 %v6607_v30  ;;  %v6610_v38 = vmul.f32 %v10345_v33, %v10345_v33  ;;  %v8581_v41 = vld [vmem:[#allocation15 + $0x20] ss:$16 sps:$4 sm:$0xff]   ;;  %v8583_v30 = vld [vmem:[#allocation15 + $0x24] ss:$16 sps:$4 sm:$0xff]  }
0x156f   :  { %v6596_v3 = vpop.xlane.xlu0 %6595  ;;  %v8584_v20 = vld [vmem:[#allocation15 + $0x28] ss:$16 sps:$4 sm:$0xff]   ;;  %6879 = vmatprep.subr.bf16.mxu0 %v8583_v30 }
0x1570   :  { %v207_v37 = vadd.f32 1e-05, %v203_v7  ;;  %v6601_v6 = vmul.f32 0.0078125, %v6596_v3  ;;  %v6608_v15 = vmul.f32 %v10342_v44, %v10342_v44  ;;  %v8586_v7 = vld [vmem:[#allocation15 + $0x2c] ss:$16 sps:$4 sm:$0xff]   ;;  %6880 = vmatpush1.bf16.msra.mxu0 %v8581_v41 }
0x1571   :  { %v10550_v3 = vld [vmem:[#allocation31_spill] sm:$0xff]  ;;  %6932 = vmatprep.subr.bf16.mxu1 %v8586_v7 }
0x1572   :  { %8773 = vrsqrt.f32 %v207_v37  ;;  %v10350_v18 = vsub.f32 %v10331_v5, %v6601_v6  ;;  %6613 = vadd.xlane.f32.xlu1 %v6608_v15  ;;  %v8587_v37 = vld [vmem:[#allocation15] ss:$16 sps:$4 sm:$0xff]   ;;  %v8589_v6 = vld [vmem:[#allocation15 + $0x4] ss:$16 sps:$4 sm:$0xff]   ;;  %6933 = vmatpush1.bf16.msra.mxu1 %v8584_v20  ;;  %v8590_v15 = vld [vmem:[#allocation15 + $0x8] ss:$16 sps:$4 sm:$0xff]  }
0x1573   :  { %v195_v54 = vpop.xlane.xlu0 %194  ;;  %6881 = vmatprep.subr.bf16.mxu0 %v8589_v6 }
0x1574   :  { %v202_v59 = vmul.f32 0.0078125, %v195_v54  ;;  %v6609_v19 = vmul.f32 %v10350_v18, %v10350_v18  ;;  %v8592_v54 = vld [vmem:[#allocation15 + $0xc] ss:$16 sps:$4 sm:$0xff]   ;;  %6882 = vmatpush1.bf16.msra.mxu0 %v8587_v37 }
0x1575   :  { %6934 = vmatprep.subr.bf16.mxu1 %v8592_v54 }
0x1576   :  { %v206_v24 = vadd.f32 1e-05, %v202_v59  ;;  %6617 = vadd.xlane.f32.xlu1 %v6610_v38  ;;  %6615 = vadd.xlane.f32.xlu0 %v6609_v19  ;;  %v10552_v59 = vld [vmem:[#allocation33_spill] sm:$0xff]  ;;  %v10553_v38 = vld [vmem:[#allocation34_spill] sm:$0xff]  ;;  %v10554_v19 = vld [vmem:[#allocation35_spill] sm:$0xff] }
0x1577   :  { %6935 = vmatpush1.bf16.msra.mxu1 %v8590_v15 }
0x1578   :  { %8775 = vrsqrt.f32 %v206_v24  ;;  %v10555_v24 = vld [vmem:[#allocation36_spill] sm:$0xff] }
0x157f   :  { %v8774_v0 = vpop.eup %8773 }
0x1580   :  { %v215_v43 = vmul.f32 %v8774_v0, %v10318_v13  ;;  %v10564_v0 = vld [vmem:[#allocation45_spill] sm:$0xff] }
0x1582   :  { %v223_v26 = vmul.f32 %v9215_v2, %v215_v43 }
0x1585   :  { %v8776_v9 = vpop.eup %8775 }
0x1586   :  { %v214_v16 = vmul.f32 %v8776_v9, %v10329_v49  ;;  %v231_v49 = vadd.f32 %v9227_v17, %v223_v26 }
0x1587   :  { %1694 = vrot.lane.b32.xlu1 %v9489_v23, %s9033_s17  ;;  %v10549_v23 = vld [vmem:[#allocation29_spill] sm:$0xff] }
0x1588   :  { %v222_v13 = vmul.f32 %v9215_v2, %v214_v16 }
0x158a   :  { %v230_v45 = vadd.f32 %v9227_v17, %v222_v13  ;;  %v10551_v17 = vld [vmem:[#allocation32_spill] sm:$0xff]  ;;  %v10425_v13 = vld [vmem:[#allocation9] sm:$0x7f] }
0x158b   :  { %1696 = vrot.lane.b32.xlu1 %v10548_v34, %s9033_s17 }
0x158c   :  { %1692 = vrot.lane.b32.xlu0 %v10549_v23, %s9033_s17  ;;  %v346_v2 = vpack.c.bf16 %v231_v49, %v230_v45 }
0x158e   :  { %8006 = vmatprep.mubr.bf16.mxu0 %v346_v2 }
0x158f   :  { %1698 = vrot.lane.b32.xlu1 %v10550_v3, %s9033_s17  ;;  %6899 = vmatprep.mubr.bf16.mxu0 %v10547_v21 }
0x1590   :  { %2434 = vrot.lane.b32.xlu0 %v10551_v17, %s9048_s27 }
0x1593   :  { %2436 = vrot.lane.b32.xlu1 %v10552_v59, %s9048_s27  ;;  %v8595_v59 = vld [vmem:[#allocation17 + $0x38] sm:$0xff]  }
0x1594   :  { %2438 = vrot.lane.b32.xlu0 %v10553_v38, %s9048_s27  ;;  %v8596_v38 = vld [vmem:[#allocation17 + $0xb8] sm:$0xff]  }
0x1597   :  { %2440 = vrot.lane.b32.xlu1 %v10554_v19, %s9048_s27 }
0x1598   :  { %3168 = vrot.lane.b32.xlu0 %v10555_v24, %s9047_s26  ;;  %v8597_v24 = vld [vmem:[#allocation17 + $0x70] sm:$0xff]  }
0x159b   :  { %3170 = vrot.lane.b32.xlu1 %v10556_v53, %s9047_s26  ;;  %v8598_v53 = vld [vmem:[#allocation17 + $0xf0] sm:$0xff]  }
0x159c   :  { %3172 = vrot.lane.b32.xlu0 %v10557_v47, %s9047_s26 }
0x159f   :  { %3174 = vrot.lane.b32.xlu1 %v10558_v57, %s9047_s26 }
0x15a0   :  { %3902 = vrot.lane.b32.xlu0 %v10559_v1, %s9037_s0  ;;  %v8599_v1 = vld [vmem:[#allocation17 + $0x30] sm:$0xff]  }
0x15a3   :  { %3904 = vrot.lane.b32.xlu1 %v10560_v62, %s9037_s0  ;;  %v8600_v62 = vld [vmem:[#allocation17 + $0xb0] sm:$0xff]  }
0x15a4   :  { %3906 = vrot.lane.b32.xlu0 %v10561_v55, %s9037_s0  ;;  %v8601_v55 = vld [vmem:[#allocation17 + $0x68] sm:$0xff]  }
0x15a7   :  { %3908 = vrot.lane.b32.xlu1 %v10562_v48, %s9037_s0  ;;  %v8602_v48 = vld [vmem:[#allocation17 + $0xe8] sm:$0xff]  }
0x15a8   :  { %4636 = vrot.lane.b32.xlu0 %v9977_v32, %s9046_s5  ;;  %v8593_v32 = vld [vmem:[#allocation17 + $0x78] sm:$0xff]  }
0x15a9   :  { %7934 = vmatprep.subr.bf16.mxu0 %v8593_v32  ;;  %v8603_v32 = vld [vmem:[#allocation17 + $0x28] sm:$0xff]  }
0x15ab   :  { %4638 = vrot.lane.b32.xlu1 %v9984_v22, %s9046_s5  ;;  %v8594_v22 = vld [vmem:[#allocation17 + $0xf8] sm:$0xff]  }
0x15ac   :  { %4640 = vrot.lane.b32.xlu0 %v10563_v8, %s9046_s5  ;;  %7962 = vmatprep.subr.bf16.mxu1 %v8594_v22  ;;  %v8604_v22 = vld [vmem:[#allocation17 + $0xa8] sm:$0xff]  }
0x15af   :  { %4642 = vrot.lane.b32.xlu1 %v10564_v0, %s9046_s5 }
0x15b0   :  { %5370 = vrot.lane.b32.xlu0 %v10097_v50, %s9045_s9 }
0x15b3   :  { %5372 = vrot.lane.b32.xlu1 %v10104_v25, %s9045_s9 }
0x15b4   :  { %5374 = vrot.lane.b32.xlu0 %v10112_v28, %s9045_s9 }
0x15b7   :  { %5376 = vrot.lane.b32.xlu1 %v10121_v14, %s9045_s9 }
0x15b8   :  { %6104 = vrot.lane.b32.xlu0 %v10278_v10, %s9044_s6 }
0x15bb   :  { %6106 = vrot.lane.b32.xlu1 %v10287_v51, %s9044_s6 }
0x15bc   :  { %6108 = vrot.lane.b32.xlu0 %v10297_v63, %s9044_s6 }
0x15bf   :  { %6110 = vrot.lane.b32.xlu1 %v10304_v60, %s9044_s6  ;;  %v10565_v60 = vld [vmem:[#allocation28_spill] sm:$0xff] }
0x15c0   :  { %v6637_v4 = vsub.s32 4, %v10565_v60  ;;  %v6645_v35 = vsub.s32 5, %v10565_v60 }
0x15c2   :  { %v6638_v31 = vrot.slane %v10425_v13, %v6637_v4  ;;  %v6646_v23 = vrot.slane %v10425_v13, %v6645_v35  ;;  %v8611_v35 = vld [vmem:[#allocation17 + $0x18] sm:$0xff]  }
0x15f7   :  { %v6612_v50 = vpop.xlane.xlu0 %6611 }
0x15f8   :  { %v6619_v25 = vmul.f32 0.0078125, %v6612_v50  ;;  %v8605_v50 = vld [vmem:[#allocation17 + $0x60] sm:$0xff]  }
0x15fa   :  { %v6623_v28 = vadd.f32 1e-05, %v6619_v25  ;;  %v8606_v25 = vld [vmem:[#allocation17 + $0xe0] sm:$0xff]  }
0x15fb   :  { %v6614_v14 = vpop.xlane.xlu1 %6613 }
0x15fc   :  { %8777 = vrsqrt.f32 %v6623_v28  ;;  %v6620_v58 = vmul.f32 0.0078125, %v6614_v14 }
0x15fe   :  { %v6624_v10 = vadd.f32 1e-05, %v6620_v58  ;;  %v8607_v58 = vld [vmem:[#allocation17 + $0x20] sm:$0xff]  }
0x15ff   :  { %v6618_v52 = vpop.xlane.xlu1 %6617  ;;  %v6616_v43 = vpop.xlane.xlu0 %6615 }
0x1600   :  { %8779 = vrsqrt.f32 %v6624_v10  ;;  %v6622_v51 = vmul.f32 0.0078125, %v6618_v52  ;;  %v6621_v46 = vmul.f32 0.0078125, %v6616_v43  ;;  %v8608_v10 = vld [vmem:[#allocation17 + $0xa0] sm:$0xff]   ;;  %v8609_v52 = vld [vmem:[#allocation17 + $0x58] sm:$0xff]  }
0x1601   :  { %v8610_v43 = vld [vmem:[#allocation17 + $0xd8] sm:$0xff]  }
0x1602   :  { %v6626_v63 = vadd.f32 1e-05, %v6622_v51  ;;  %v6625_v11 = vadd.f32 1e-05, %v6621_v46 }
0x1603   :  { %v1695_v9 = vpop.permute.xlu1 %1694  ;;  %v1693_v12 = vpop.permute.xlu0 %1692 }
0x1604   :  { %8781 = vrsqrt.f32 %v6626_v63  ;;  %1706 = vst.msk [vmem:[#allocation19 + $0x8] sm:$0xff] %vm1704_vm10, %v1695_v9  ;;  %1705 = vst.msk [vmem:[#allocation19] sm:$0xff] %vm1704_vm10, %v1693_v12 }
0x1605   :  { %8783 = vrsqrt.f32 %v6625_v11 }
0x1607   :  { %v1697_v61 = vpop.permute.xlu1 %1696  ;;  %v2435_v16 = vpop.permute.xlu0 %2434 }
0x1608   :  { %1707 = vst.msk [vmem:[#allocation19 + $0x10] sm:$0xff] %vm1704_vm10, %v1697_v61 }
0x1609   :  { %2447 = vst.msk [vmem:[#allocation19] sm:$0xff] %vm2446_vm11, %v2435_v16  ;;  %v8778_v26 = vpop.eup %8777 }
0x160a   :  { %v6631_v27 = vmul.f32 %v8778_v26, %v10337_v42 }
0x160b   :  { %v1699_v36 = vpop.permute.xlu1 %1698  ;;  %v2439_v39 = vpop.permute.xlu0 %2438 }
0x160c   :  { %1708 = vst.msk [vmem:[#allocation19 + $0x18] sm:$0xff] %vm1704_vm10, %v1699_v36  ;;  %v6639_v34 = vmul.f32 %v6638_v31, %v6631_v27  ;;  %v8612_v36 = vld [vmem:[#allocation17 + $0x98] sm:$0xff]  }
0x160d   :  { %2449 = vst.msk [vmem:[#allocation19 + $0x10] sm:$0xff] %vm2446_vm11, %v2439_v39  ;;  %v8780_v45 = vpop.eup %8779  ;;  %v8613_v39 = vld [vmem:[#allocation17 + $0x50] sm:$0xff]  }
0x160e   :  { %v6632_v49 = vmul.f32 %v8780_v45, %v10342_v44  ;;  %v6647_v7 = vadd.f32 %v6646_v23, %v6639_v34  ;;  %v8614_v45 = vld [vmem:[#allocation17 + $0xd0] sm:$0xff]  }
0x160f   :  { %v2437_v42 = vpop.permute.xlu1 %2436  ;;  %v3169_v2 = vpop.permute.xlu0 %3168  ;;  %v8616_v34 = vld [vmem:[#allocation17 + $0x90] sm:$0xff]  }
0x1610   :  { %2448 = vst.msk [vmem:[#allocation19 + $0x8] sm:$0xff] %vm2446_vm11, %v2437_v42  ;;  %v6640_v41 = vmul.f32 %v6638_v31, %v6632_v49  ;;  %v8615_v49 = vld [vmem:[#allocation17 + $0x10] sm:$0xff]   ;;  %v8618_v42 = vld [vmem:[#allocation17 + $0xc8] sm:$0xff]  }
0x1611   :  { %3181 = vst.msk [vmem:[#allocation19] sm:$0xff] %vm3180_vm12, %v3169_v2  ;;  %v8782_v30 = vpop.eup %8781  ;;  %v8619_v2 = vld [vmem:[#allocation17 + $0x8] sm:$0xff]  }
0x1612   :  { %v8784_v20 = vpop.eup %8783  ;;  %v6648_v3 = vadd.f32 %v6646_v23, %v6640_v41  ;;  %v6634_v17 = vmul.f32 %v8782_v30, %v10345_v33  ;;  %v8620_v41 = vld [vmem:[#allocation17 + $0x88] sm:$0xff]   ;;  %v8621_v30 = vld [vmem:[#allocation17 + $0x40] sm:$0xff]  }
0x1613   :  { %v2441_v37 = vpop.permute.xlu1 %2440  ;;  %v3173_v6 = vpop.permute.xlu0 %3172  ;;  %v6633_v44 = vmul.f32 %v8784_v20, %v10350_v18  ;;  %v8622_v20 = vld [vmem:[#allocation17 + $0xc0] sm:$0xff]  }
0x1614   :  { %2450 = vst.msk [vmem:[#allocation19 + $0x18] sm:$0xff] %vm2446_vm11, %v2441_v37  ;;  %v6651_v15 = vpack.c.bf16 %v6648_v3, %v6647_v7  ;;  %v6642_v54 = vmul.f32 %v6638_v31, %v6634_v17  ;;  %v8623_v7 = vld [vmem:[#allocation17] sm:$0xff]   ;;  %v6685_v17 = vld [vmem:[%s10497_s8] sm:$0xf]  ;;  %v10566_v37 = vsub.s32 0, %v10565_v60  ;;  %s9049_s8 = smov [#allocation19]  }
0x1615   :  { %3183 = vst.msk [vmem:[#allocation19 + $0x10] sm:$0xff] %vm3180_vm12, %v3173_v6  ;;  %v6641_v19 = vmul.f32 %v6638_v31, %v6633_v44  ;;  %v8624_v3 = vld [vmem:[#allocation17 + $0x80] sm:$0xff]   ;;  %v10567_v44 = vsub.s32 2, %v10565_v60  ;;  %s7412_s28 = sshll.u32 %s9049_s8, 4  ;;  %s7413_s28 = int_to_ptr.vmem [resolvable:$true] %s7412_s28 }
0x1616   :  { %6900 = vmatmul.mubr.bf16.vlgmr.msra.gmra.mxu0 %v6651_v15  ;;  %6953 = vmatmul.mubr.bf16.vlgmr.msra.gmra.mxu1 %v6651_v15  ;;  %v6650_v57 = vadd.f32 %v6646_v23, %v6642_v54  ;;  %v6690_v6 = vrot.slane %v6685_v17, %v10566_v37  ;;  %s8972_s29 = scalar_lea.vmem %s7413_s28, 512  ;;  %p8977_p4 = scmp.lt.s32.totalorder %s7413_s28, %s7413_s28 }
0x1617   :  { %v3171_v47 = vpop.permute.xlu1 %3170  ;;  %v3903_v33 = vpop.permute.xlu0 %3902  ;;  %6909 = vmatprep.mubr.bf16.mxu0 %v10547_v21  ;;  %6962 = vmatprep.mubr.bf16.mxu1 %v10547_v21  ;;  %v6649_v18 = vadd.f32 %v6646_v23, %v6641_v19  ;;  %v8617_v23 = vld [vmem:[#allocation17 + $0x48] sm:$0xff]   ;;  %v6698_v15 = vrot.slane %v6685_v17, %v10567_v44  ;;  %v10568_v19 = vsub.s32 1, %v10565_v60  ;;  %p8973_p3 = scmp.ne.s32.totalorder %s7413_s28, %s8972_s29  ;;  %p8978_p5 = scmp.lt.s32.totalorder %s8972_s29, %s8972_s29 }
0x1618   :  { %3182 = vst.msk [vmem:[#allocation19 + $0x8] sm:$0xff] %vm3180_vm12, %v3171_v47  ;;  %7935 = vmatpush3.bf16.msra.mxu0 %v8595_v59  ;;  %7963 = vmatpush3.bf16.msra.mxu1 %v8596_v38 }
0x1619   :  { %3915 = vst.msk [vmem:[#allocation19] sm:$0xff] %vm3914_vm13, %v3903_v33  ;;  %7936 = vmatprep.subr.bf16.mxu0 %v8597_v24  ;;  %7964 = vmatprep.subr.bf16.mxu1 %v8598_v53  ;;  %v6652_v21 = vpack.c.bf16 %v6650_v57, %v6649_v18  ;;  %v6694_v24 = vrot.slane %v6685_v17, %v10568_v19  ;;  %v10569_v33 = vsub.s32 3, %v10565_v60  ;;  %p8979_p6 = por %p8978_p5, %p8977_p4 }
0x161b   :  { %v3175_v8 = vpop.permute.xlu1 %3174  ;;  %v3907_v0 = vpop.permute.xlu0 %3906  ;;  %v6702_v18 = vrot.slane %v6685_v17, %v10569_v33  ;;  %p8980_p7 = pnand %p8979_p6, %p8973_p3 }
0x161c   :  { %3184 = vst.msk [vmem:[#allocation19 + $0x18] sm:$0xff] %vm3180_vm12, %v3175_v8  ;;  %7937 = vmatpush3.bf16.msra.mxu0 %v8599_v1  ;;  %7965 = vmatpush3.bf16.msra.mxu1 %v8600_v62 }
0x161d   :  { %3917 = vst.msk [vmem:[#allocation19 + $0x10] sm:$0xff] %vm3914_vm13, %v3907_v0  ;;  %7938 = vmatprep.subr.bf16.mxu0 %v8601_v55  ;;  %7966 = vmatprep.subr.bf16.mxu1 %v8602_v48 }
0x161e   :  { %6910 = vmatmul.mubr.bf16.gmra.mxu0 %v6652_v21  ;;  %6963 = vmatmul.mubr.bf16.gmra.mxu1 %v6652_v21 }
0x161f   :  { %v3905_v28 = vpop.permute.xlu1 %3904  ;;  %v4637_v14 = vpop.permute.xlu0 %4636 }
0x1620   :  { %3916 = vst.msk [vmem:[#allocation19 + $0x8] sm:$0xff] %vm3914_vm13, %v3905_v28  ;;  %7939 = vmatpush3.bf16.msra.mxu0 %v8603_v32  ;;  %7967 = vmatpush3.bf16.msra.mxu1 %v8604_v22 }
0x1621   :  { %4649 = vst.msk [vmem:[#allocation19] sm:$0xff] %vm4648_vm14, %v4637_v14  ;;  %7940 = vmatprep.subr.bf16.mxu0 %v8605_v50  ;;  %7968 = vmatprep.subr.bf16.mxu1 %v8606_v25 }
0x1623   :  { %v3909_v51 = vpop.permute.xlu1 %3908  ;;  %v4641_v46 = vpop.permute.xlu0 %4640 }
0x1624   :  { %3918 = vst.msk [vmem:[#allocation19 + $0x18] sm:$0xff] %vm3914_vm13, %v3909_v51  ;;  %7941 = vmatpush3.bf16.msra.mxu0 %v8607_v58  ;;  %7969 = vmatpush3.bf16.msra.mxu1 %v8608_v10 }
0x1625   :  { %4651 = vst.msk [vmem:[#allocation19 + $0x10] sm:$0xff] %vm4648_vm14, %v4641_v46  ;;  %7942 = vmatprep.subr.bf16.mxu0 %v8609_v52  ;;  %7970 = vmatprep.subr.bf16.mxu1 %v8610_v43 }
0x1627   :  { %v4639_v63 = vpop.permute.xlu1 %4638  ;;  %v5371_v11 = vpop.permute.xlu0 %5370 }
0x1628   :  { %4650 = vst.msk [vmem:[#allocation19 + $0x8] sm:$0xff] %vm4648_vm14, %v4639_v63  ;;  %7943 = vmatpush3.bf16.msra.mxu0 %v8611_v35  ;;  %7971 = vmatpush3.bf16.msra.mxu1 %v8612_v36 }
0x1629   :  { %5383 = vst.msk [vmem:[#allocation19] sm:$0xff] %vm5382_vm15, %v5371_v11  ;;  %7944 = vmatprep.subr.bf16.mxu0 %v8613_v39  ;;  %7972 = vmatprep.subr.bf16.mxu1 %v8614_v45 }
0x162b   :  { %v4643_v9 = vpop.permute.xlu1 %4642  ;;  %v5375_v12 = vpop.permute.xlu0 %5374 }
0x162c   :  { %4652 = vst.msk [vmem:[#allocation19 + $0x18] sm:$0xff] %vm4648_vm14, %v4643_v9  ;;  %7945 = vmatpush3.bf16.msra.mxu0 %v8615_v49  ;;  %7973 = vmatpush3.bf16.msra.mxu1 %v8616_v34 }
0x162d   :  { %5385 = vst.msk [vmem:[#allocation19 + $0x10] sm:$0xff] %vm5382_vm15, %v5375_v12  ;;  %7946 = vmatprep.subr.bf16.mxu0 %v8617_v23  ;;  %7974 = vmatprep.subr.bf16.mxu1 %v8618_v42 }
0x162f   :  { %v5373_v4 = vpop.permute.xlu1 %5372  ;;  %v6105_v61 = vpop.permute.xlu0 %6104 }
0x1630   :  { %5384 = vst.msk [vmem:[#allocation19 + $0x8] sm:$0xff] %vm5382_vm15, %v5373_v4  ;;  %7947 = vmatpush3.bf16.msra.mxu0 %v8619_v2  ;;  %7975 = vmatpush3.bf16.msra.mxu1 %v8620_v41 }
0x1631   :  { %6117 = vst.msk [vmem:[#allocation19] sm:$0xff] %vm6116_vm0, %v6105_v61  ;;  %7948 = vmatprep.subr.bf16.mxu0 %v8621_v30  ;;  %7976 = vmatprep.subr.bf16.mxu1 %v8622_v20 }
0x1633   :  { %v5377_v16 = vpop.permute.xlu1 %5376  ;;  %v6109_v26 = vpop.permute.xlu0 %6108 }
0x1634   :  { %5386 = vst.msk [vmem:[#allocation19 + $0x18] sm:$0xff] %vm5382_vm15, %v5377_v16  ;;  %7949 = vmatpush3.bf16.msra.mxu0 %v8623_v7  ;;  %7977 = vmatpush3.bf16.msra.mxu1 %v8624_v3 }
0x1635   :  { %6119 = vst.msk [vmem:[#allocation19 + $0x10] sm:$0xff] %vm6116_vm0, %v6109_v26 }
0x1637   :  { %v6107_v27 = vpop.permute.xlu1 %6106 }
0x1638   :  { %6118 = vst.msk [vmem:[#allocation19 + $0x8] sm:$0xff] %vm6116_vm0, %v6107_v27 }
0x163b   :  { %v6111_v31 = vpop.permute.xlu1 %6110 }
0x163c   :  { %6120 = vst.msk [vmem:[#allocation19 + $0x18] sm:$0xff] %vm6116_vm0, %v6111_v31 }
0x16d6   :  { %v6901_v54 = vpop.f32.mrf.mxu0  ;;  %v6954_v59 = vpop.f32.mrf.mxu1 }
0x16d7   :  { %v6902_v38 = vadd.f32 %v6901_v54, %v6690_v6  ;;  %v6955_v53 = vadd.f32 %v6954_v59, %v6698_v15 }
0x16d8   :  { %v6903_v47 = vpop.f32.mrf.mxu0  ;;  %v6956_v57 = vpop.f32.mrf.mxu1 }
0x16d9   :  { %v6989_v55 = vmul.f32 0.01, %v6902_v38  ;;  %v6904_v48 = vadd.f32 %v6903_v47, %v6694_v24  ;;  %vm6973_vm1 = vcmp.gt.f32.partialorder %v6902_v38, 0.0  ;;  %v6991_v21 = vmul.f32 0.01, %v6955_v53 }
0x16da   :  { %v6905_v1 = vpop.f32.mrf.mxu0  ;;  %v6958_v62 = vpop.f32.mrf.mxu1  ;;  %v6957_v32 = vadd.f32 %v6956_v57, %v6702_v18  ;;  %vm6975_vm2 = vcmp.gt.f32.partialorder %v6955_v53, 0.0 }
0x16db   :  { %v6906_v8 = vadd.f32 %v6905_v1, %v6690_v6  ;;  %v6959_v0 = vadd.f32 %v6958_v62, %v6698_v15  ;;  %v7005_v43 = vsel %vm6973_vm1, %v6902_v38, %v6989_v55  ;;  %v6990_v51 = vmul.f32 0.01, %v6904_v48 }
0x16dc   :  { %v6907_v22 = vpop.f32.mrf.mxu0  ;;  %v6960_v50 = vpop.f32.mrf.mxu1  ;;  %v7007_v46 = vsel %vm6975_vm2, %v6955_v53, %v6991_v21  ;;  %v6992_v63 = vmul.f32 0.01, %v6957_v32  ;;  %vm6974_vm6 = vcmp.gt.f32.partialorder %v6904_v48, 0.0  ;;  %vm6976_vm7 = vcmp.gt.f32.partialorder %v6957_v32, 0.0 }
0x16dd   :  { %v6993_v25 = vmul.f32 0.01, %v6906_v8  ;;  %v6995_v28 = vmul.f32 0.01, %v6959_v0  ;;  %v6908_v14 = vadd.f32 %v6907_v22, %v6694_v24  ;;  %v6961_v58 = vadd.f32 %v6960_v50, %v6702_v18 }
0x16de   :  { %v6911_v10 = vpop.f32.mrf.mxu0  ;;  %v6964_v52 = vpop.f32.mrf.mxu1  ;;  %vm6977_vm3 = vcmp.gt.f32.partialorder %v6906_v8, 0.0  ;;  %vm6979_vm4 = vcmp.gt.f32.partialorder %v6959_v0, 0.0  ;;  %v7006_v41 = vsel %vm6974_vm6, %v6904_v48, %v6990_v51  ;;  %v7008_v30 = vsel %vm6976_vm7, %v6957_v32, %v6992_v63 }
0x16df   :  { %vm6978_vm5 = vcmp.gt.f32.partialorder %v6908_v14, 0.0  ;;  %v6994_v11 = vmul.f32 0.01, %v6908_v14  ;;  %vm6980_vm8 = vcmp.gt.f32.partialorder %v6961_v58, 0.0  ;;  %v6996_v4 = vmul.f32 0.01, %v6961_v58 }
0x16e0   :  { %v6913_v9 = vpop.f32.mrf.mxu0  ;;  %v6966_v12 = vpop.f32.mrf.mxu1  ;;  %v7009_v61 = vsel %vm6977_vm3, %v6906_v8, %v6993_v25  ;;  %v7011_v16 = vsel %vm6979_vm4, %v6959_v0, %v6995_v28  ;;  %v6912_v34 = vadd.f32 %v6911_v10, %v6690_v6  ;;  %v6965_v23 = vadd.f32 %v6964_v52, %v6698_v15 }
0x16e1   :  { %v6914_v26 = vadd.f32 %v6913_v9, %v6694_v24  ;;  %v6967_v27 = vadd.f32 %v6966_v12, %v6702_v18  ;;  %v7010_v45 = vsel %vm6978_vm5, %v6908_v14, %v6994_v11  ;;  %v7012_v49 = vsel %vm6980_vm8, %v6961_v58, %v6996_v4 }
0x16e2   :  { %v6915_v31 = vpop.f32.mrf.mxu0  ;;  %v6968_v35 = vpop.f32.mrf.mxu1  ;;  %v7021_v20 = vpack.c.bf16 %v7009_v61, %v7005_v43  ;;  %v7023_v7 = vpack.c.bf16 %v7011_v16, %v7007_v46  ;;  %v7022_v54 = vpack.c.bf16 %v7010_v45, %v7006_v41  ;;  %v7024_v59 = vpack.c.bf16 %v7012_v49, %v7008_v30 }
0x16e3   :  { %v6916_v36 = vadd.f32 %v6915_v31, %v6690_v6  ;;  %v6969_v39 = vadd.f32 %v6968_v35, %v6698_v15  ;;  %v6998_v3 = vmul.f32 0.01, %v6914_v26  ;;  %v7000_v17 = vmul.f32 0.01, %v6967_v27 }
0x16e4   :  { %v6917_v42 = vpop.f32.mrf.mxu0  ;;  %v6970_v2 = vpop.f32.mrf.mxu1  ;;  %vm6982_vm9 = vcmp.gt.f32.partialorder %v6914_v26, 0.0  ;;  %vm6984_vm10 = vcmp.gt.f32.partialorder %v6967_v27, 0.0  ;;  %7321 = vmatprep.mubr.bf16.mxu0 %v7022_v54  ;;  %7370 = vmatprep.mubr.bf16.mxu1 %v7024_v59  ;;  %v6997_v53 = vmul.f32 0.01, %v6912_v34  ;;  %v6999_v47 = vmul.f32 0.01, %v6965_v23 }
0x16e5   :  { %v6918_v37 = vadd.f32 %v6917_v42, %v6694_v24  ;;  %v6971_v44 = vadd.f32 %v6970_v2, %v6702_v18  ;;  %v7001_v38 = vmul.f32 0.01, %v6916_v36  ;;  %v7003_v19 = vmul.f32 0.01, %v6969_v39  ;;  %7322 = vmatmul.mubr.bf16.vlgmr.msra.gmra.mxu0 %v7021_v20  ;;  %7371 = vmatmul.mubr.bf16.vlgmr.msra.gmra.mxu1 %v7023_v7 }
0x16e6   :  { %vm6985_vm13 = vcmp.gt.f32.partialorder %v6916_v36, 0.0  ;;  %vm6987_vm14 = vcmp.gt.f32.partialorder %v6969_v39, 0.0  ;;  %v7014_v24 = vsel %vm6982_vm9, %v6914_v26, %v6998_v3  ;;  %v7016_v18 = vsel %vm6984_vm10, %v6967_v27, %v7000_v17 }
0x16e7   :  { %vm6986_vm11 = vcmp.gt.f32.partialorder %v6918_v37, 0.0  ;;  %v7002_v6 = vmul.f32 0.01, %v6918_v37  ;;  %vm6988_vm12 = vcmp.gt.f32.partialorder %v6971_v44, 0.0  ;;  %v7004_v15 = vmul.f32 0.01, %v6971_v44 }
0x16e8   :  { %vm6981_vm15 = vcmp.gt.f32.partialorder %v6912_v34, 0.0  ;;  %vm6983_vm0 = vcmp.gt.f32.partialorder %v6965_v23, 0.0  ;;  %v7017_v55 = vsel %vm6985_vm13, %v6916_v36, %v7001_v38  ;;  %v7019_v48 = vsel %vm6987_vm14, %v6969_v39, %v7003_v19 }
0x16e9   :  { %v7018_v33 = vsel %vm6986_vm11, %v6918_v37, %v7002_v6  ;;  %v7020_v57 = vsel %vm6988_vm12, %v6971_v44, %v7004_v15  ;;  %v7013_v8 = vsel %vm6981_vm15, %v6912_v34, %v6997_v53  ;;  %v7015_v0 = vsel %vm6983_vm0, %v6965_v23, %v6999_v47 }
0x16ea   :  { %v7026_v1 = vpack.c.bf16 %v7018_v33, %v7014_v24  ;;  %v7028_v62 = vpack.c.bf16 %v7020_v57, %v7016_v18  ;;  %v7025_v21 = vpack.c.bf16 %v7017_v55, %v7013_v8  ;;  %v7027_v32 = vpack.c.bf16 %v7019_v48, %v7015_v0 }
0x16ec   :  { %7329 = vmatprep.mubr.bf16.mxu0 %v7026_v1  ;;  %7378 = vmatprep.mubr.bf16.mxu1 %v7028_v62 }
0x16ed   :  { %7330 = vmatmul.mubr.bf16.gmra.mxu0 %v7025_v21  ;;  %7379 = vmatmul.mubr.bf16.gmra.mxu1 %v7027_v32 }
0x16ee   :  { %8983 = shalt.err (!%p8980_p7)
}
0x16ef   :  { %7418 = dma.vmem_to_hbm [thread:$0]  %s7413_s28, 512, %s10500_s11, [#allocation20], %s9028_s22, %s9028_s22, %s9029_s23   ;;  %v7095_v22 = vsub.s32 6, %v10565_v60 }
0x16f0   :  { %s9050_s11 = smov [#allocation18]  }
0x16f1   :  { %v7096_v28 = vrot.slane %v10425_v13, %v7095_v22  ;;  %s7400_s13 = sshll.u32 %s9050_s11, 4  ;;  %s7401_s13 = int_to_ptr.vmem [resolvable:$true] %s7400_s13 }
0x16f2   :  { %s8992_s0 = scalar_lea.vmem %s7401_s13, 512  ;;  %p8997_p9 = scmp.lt.s32.totalorder %s7401_s13, %s7401_s13 }
0x16f3   :  { %p8993_p8 = scmp.ne.s32.totalorder %s7401_s13, %s8992_s0  ;;  %p8998_p10 = scmp.lt.s32.totalorder %s8992_s0, %s8992_s0 }
0x16f5   :  { %p8999_p11 = por %p8998_p10, %p8997_p9 }
0x16f7   :  { %p9000_p12 = pnand %p8999_p11, %p8993_p8 }
0x17a5   :  { %v7950_v50 = vpop.f32.mrf.mxu0  ;;  %v7978_v25 = vpop.f32.mrf.mxu1 }
0x17a7   :  { %v7951_v14 = vpop.f32.mrf.mxu0  ;;  %v7979_v58 = vpop.f32.mrf.mxu1 }
0x17a8   :  { %v7952_v10 = vadd.f32 %v7951_v14, %v7950_v50  ;;  %v7980_v46 = vadd.f32 %v7979_v58, %v7978_v25 }
0x17a9   :  { %v7953_v52 = vpop.f32.mrf.mxu0  ;;  %v7981_v43 = vpop.f32.mrf.mxu1 }
0x17aa   :  { %v7324_v51 = vadd.f32 %v7952_v10, %v7096_v28 }
0x17ab   :  { %v7954_v63 = vpop.f32.mrf.mxu0  ;;  %v7982_v11 = vpop.f32.mrf.mxu1 }
0x17ac   :  { %v7373_v9 = vadd.f32 %v7980_v46, %v7324_v51  ;;  %v7955_v12 = vadd.f32 %v7954_v63, %v7953_v52  ;;  %v7983_v26 = vadd.f32 %v7982_v11, %v7981_v43 }
0x17ad   :  { %v7956_v4 = vpop.f32.mrf.mxu0  ;;  %v7984_v61 = vpop.f32.mrf.mxu1 }
0x17ae   :  { %v7387_v16 = vadd.f32 %v7373_v9, %v10316_v29  ;;  %v7327_v60 = vadd.f32 %v7955_v12, %v7096_v28 }
0x17af   :  { %v7957_v27 = vpop.f32.mrf.mxu0  ;;  %v7985_v31 = vpop.f32.mrf.mxu1 }
0x17b0   :  { %7391 = vst [vmem:[#allocation18] sm:$0xff] %v7387_v16  ;;  %v7376_v13 = vadd.f32 %v7983_v26, %v7327_v60  ;;  %v7958_v35 = vadd.f32 %v7957_v27, %v7956_v4  ;;  %v7986_v34 = vadd.f32 %v7985_v31, %v7984_v61 }
0x17b1   :  { %v7959_v36 = vpop.f32.mrf.mxu0  ;;  %v7987_v39 = vpop.f32.mrf.mxu1 }
0x17b2   :  { %v7388_v45 = vadd.f32 %v7376_v13, %v10323_v56  ;;  %v7332_v49 = vadd.f32 %v7958_v35, %v7096_v28 }
0x17b3   :  { %v7960_v23 = vpop.f32.mrf.mxu0  ;;  %v7988_v42 = vpop.f32.mrf.mxu1 }
0x17b4   :  { %7392 = vst [vmem:[#allocation18 + $0x8] sm:$0xff] %v7388_v45  ;;  %v7381_v2 = vadd.f32 %v7986_v34, %v7332_v49  ;;  %v7961_v41 = vadd.f32 %v7960_v23, %v7959_v36  ;;  %v7989_v20 = vadd.f32 %v7988_v42, %v7987_v39 }
0x17b6   :  { %v7389_v29 = vadd.f32 %v7381_v2, %v10331_v5  ;;  %v7335_v30 = vadd.f32 %v7961_v41, %v7096_v28 }
0x17b8   :  { %7393 = vst [vmem:[#allocation18 + $0x10] sm:$0xff] %v7389_v29  ;;  %v7384_v7 = vadd.f32 %v7989_v20, %v7335_v30 }
0x17ba   :  { %v7390_v3 = vadd.f32 %v7384_v7, %v10320_v40 }
0x17bc   :  { %7394 = vst [vmem:[#allocation18 + $0x18] sm:$0xff] %v7390_v3 }
0x17bd   :  { %9003 = shalt.err (!%p9000_p12)
}
0x17be   :  { %7406 = dma.vmem_to_hbm [thread:$0]  %s7401_s13, 512, %s10499_s10, [#allocation5], %s9028_s22, %s9028_s22, %s9029_s23  }
0x17bf   :  { %9022 = dma.done.wait [#allocation5], 512  }
0x17c0   :  { %9023 = vsyncadd [#allocation5], 4294966784 }
0x17c1   :  { %9024 = dma.done.wait [#allocation20], 512  }
0x17c2   :  { %9025 = vsyncadd [#allocation20], 4294966784 }
0x17c3   :  { %7425 = vsyncpa [#allocation4], 1 }
0x17c4   :  { %7426 = vsyncpa [#allocation7], 1 }
0x17c5   :  { %7427 = vsyncpa [#allocation10], 1 }
0x17c6   :  { %7428 = vsyncpa [#allocation13], 1 }
0x17c7   :  { %7429 = vsyncpa [#allocation16], 1 }
0x17c8   :  { %7430 = vsyncpa [#allocation5], 1 }
0x17c9   :  { %7431 = vsyncpa [#allocation20], 1 }

</bundles_post_ra>
